<compile_context>
chip_gen: v7x
topology: tpu7x:2x2x1
jax: 0.10.0
libtpu: 0.0.40
codegen_flags: <defaults>
</compile_context>

<pallas_src>
import functools

import jax
import jax.numpy as jnp
from jax import lax
from jax.experimental import pallas as pl
from jax.experimental.pallas import tpu as pltpu

# ---- small, kernel-friendly model sizes -------------------------------------
B = 4        # batch
T = 8        # caption sequence length
L = 16       # num_attention_locs (e.g. 4x4 spatial grid)
C = 32       # feature_size (channels per attention location)
H = 32       # hidden_size
E = 32       # embed_size
V = 64       # vocab_size
F0 = 48      # external (init_features) dim fed to EncoderCNN


# ================================ fused kernel ================================
def fused_kernel(feats_ref, emb_ref, onehot0_ref,
                 w_init_ref, w_img_ref, w_hfused_ref, w_ctx_ref, w_embg_ref,
                 bias_ref, xenc_ref, w_enc_ref, bn_ref,
                 out_ref, alpha_ref, enc_ref,
                 *, bt_steps, hidden, vocab, locs, seq):
    f32 = jnp.float32
    Hh, Vv, Ll, Tt = hidden, vocab, locs, seq

    # -------- EncoderCNN: linear -> dropout(identity) -> BatchNorm1d(eval) --------
    Ee = w_enc_ref.shape[1]
    b_enc = bias_ref[4:5, 0:Ee]
    y = jnp.dot(xenc_ref[...], w_enc_ref[...],
                preferred_element_type=f32) + b_enc
    gamma, beta = bn_ref[0:1, :], bn_ref[1:2, :]
    mean, var = bn_ref[2:3, :], bn_ref[3:4, :]
    enc_ref[...] = (y - mean) * lax.rsqrt(var + 1e-5) * gamma + beta

    # ------------------------------- decoder ---------------------------------
    feats = feats_ref[...]                                  # (B, L, C) bf16
    b = feats.shape[0]
    Cc = feats.shape[2]

    # column layout of the fused h-projection  h @ [w_latt | w_fbeta | w_hh | w_out]
    OFF_FB = Hh
    OFF_G = Hh + Cc
    OFF_LOG = Hh + Cc + 4 * Hh
    HF_W = OFF_LOG + Vv

    # bias slab rows (packed wrapper-side; b_comb dropped — softmax-invariant)
    b_init = bias_ref[0:1, 0:2 * Hh]
    b_img = bias_ref[1:2, 0:Hh]
    b_hfused = bias_ref[2:3, 0:HF_W]
    b_gates = bias_ref[3:4, 0:4 * Hh]
    w_comb3 = bias_ref[5:6, 0:Hh].reshape(1, 1, Hh)

    # init_hidden_state: mean over locations -> fused [init_h | init_c] matmul
    mean_f = jnp.mean(feats.astype(f32), axis=1).astype(jnp.bfloat16)
    hc0 = jnp.dot(mean_f, w_init_ref[...], preferred_element_type=f32) + b_init
    h, c = hc0[:, :Hh], hc0[:, Hh:]

    # Hoisted time-invariant attention image projection (done once).
    att_img = (jnp.dot(feats.reshape(b * Ll, Cc), w_img_ref[...],
                       preferred_element_type=f32).reshape(b, Ll, Hh) + b_img)

    # Hoisted embedding contribution to the LSTM gates (+ gate bias), one MXU push.
    emb_pre = jnp.dot(emb_ref[...], w_embg_ref[...],
                      preferred_element_type=f32) + b_gates   # ((T-1)*B, 4H)

    row = lax.broadcasted_iota(jnp.int32, (b, 1), 0)          # hoisted mask iota

    # step-0 slots of the lane-dense output slabs
    out_ref[:, 0:Vv] = onehot0_ref[...]                       # outputs[:, 0] = one-hot
    alpha_ref[:, 0:Ll] = jnp.zeros((b, Ll), f32)              # alphas[:, 0] = 0

    for t in range(Tt - 1):                                   # static, fully unrolled
        bt = bt_steps[t]                                      # static batch_size_t

        # ONE fused MXU push per step: h @ [w_latt | w_fbeta | w_hh | w_out]
        hp = jnp.dot(h, w_hfused_ref[...],
                     preferred_element_type=f32) + b_hfused   # (B, 256)

        # the logit slice corresponds to the PREVIOUS step's h_new (w_out folded);
        # masked rows were frozen so the masked store is identical to the unfused form.
        if t >= 1:
            prev_bt = bt_steps[t - 1]
            lp = hp[:, OFF_LOG:]
            if prev_bt >= b:
                out_ref[:, t * Vv:(t + 1) * Vv] = lp
            else:
                out_ref[:, t * Vv:(t + 1) * Vv] = jnp.where(row < prev_bt, lp, 0.0)

        att_h = hp[:, 0:Hh]                                   # (B, H)
        gate = jax.nn.sigmoid(hp[:, OFF_FB:OFF_G])            # f_beta gate (B, C)

        # spatial soft attention (b_comb dropped: cancels in the softmax)
        combined = jnp.maximum(att_img + att_h[:, None, :], 0.0)       # ReLU (B,L,H)
        logits = jnp.sum(combined * w_comb3, axis=-1)                  # (B, L)
        m = jnp.max(logits, axis=-1, keepdims=True)
        ex = jnp.exp(logits - m)
        alpha_t = ex * pl.reciprocal(jnp.sum(ex, axis=-1, keepdims=True),
                                     approx=True)                      # softmax

        # per-step lane-offset store of alphas (no end-of-kernel concat)
        if bt >= b:
            alpha_ref[:, (t + 1) * Ll:(t + 2) * Ll] = alpha_t
        else:
            alpha_ref[:, (t + 1) * Ll:(t + 2) * Ll] = jnp.where(row < bt, alpha_t, 0.0)

        # attention context on the MXU (batched matvec) instead of a sublane reduce
        ctx = jnp.einsum('bql,blc->bqc',
                         alpha_t[:, None, :].astype(jnp.bfloat16), feats,
                         preferred_element_type=f32)[:, 0, :]           # (B, C)
        att_ctx = gate * ctx

        # LSTMCell gates: hoisted emb term + ctx term + h term (from the fused push)
        g = (emb_pre[t * b:(t + 1) * b]
             + jnp.dot(att_ctx, w_ctx_ref[...], preferred_element_type=f32)
             + hp[:, OFF_G:OFF_LOG])
        i_g = jax.nn.sigmoid(g[:, 0 * Hh:1 * Hh])
        f_g = jax.nn.sigmoid(g[:, 1 * Hh:2 * Hh])
        g_g = jnp.tanh(g[:, 2 * Hh:3 * Hh])
        o_g = jax.nn.sigmoid(g[:, 3 * Hh:4 * Hh])
        c_new = f_g * c + i_g * g_g
        h_new = o_g * jnp.tanh(c_new)

        if bt >= b:
            # whole batch active this step: no masking work at all
            h, c = h_new, c_new
        else:
            # emulate PyTorch's [:batch_size_t] slicing by masking
            active = row < bt
            h = jnp.where(active, h_new, h)
            c = jnp.where(active, c_new, c)

    # one-step epilogue: logits of the final h (extra fused push, once per call)
    hp = jnp.dot(h, w_hfused_ref[...], preferred_element_type=f32) + b_hfused
    lp = hp[:, OFF_LOG:]
    last_bt = bt_steps[Tt - 2]
    if last_bt >= b:
        out_ref[:, (Tt - 1) * Vv:] = lp
    else:
        out_ref[:, (Tt - 1) * Vv:] = jnp.where(row < last_bt, lp, 0.0)


# ============================== forward wrapper ===============================
def soft_attention_encoder_decoder_forward(images, init_features, captions, lengths,
                                           persist_features, p):
    del images  # only consumed by the (absent) pretrained extractors
    Bc, Tc = captions.shape
    feature_size = p["w_img"].shape[0]
    hidden = p["w_hh"].shape[0]
    vocab = p["w_out"].shape[1]
    embed_size = p["embed"].shape[1]

    lengths = [int(l) for l in lengths]
    assert lengths == sorted(lengths, reverse=True), \
        "lengths must be sorted descending (required by the [:batch_size_t] masking)"

    feats = persist_features.reshape(Bc, -1, feature_size).astype(jnp.bfloat16)
    Lc = feats.shape[1]

    # TODO(synk): nn.Embedding gather stays in JAX glue (data-dependent gather).
    emb_2d = jnp.transpose(p["embed"][captions[:, :Tc - 1]], (1, 0, 2)).reshape(
        (Tc - 1) * Bc, embed_size).astype(jnp.bfloat16)                  # ((T-1)*B, E)
    onehot0 = jax.nn.one_hot(captions[:, 0], vocab, dtype=jnp.float32)   # (B, V)

    # static per-step active batch sizes
    bt_steps = tuple(int(sum(1 for l in lengths if l > t)) for t in range(Tc - 1))

    # ---- weight packing (wrapper-side) ----
    w_init = jnp.concatenate([p["w_init_h"], p["w_init_c"]], axis=1).astype(jnp.bfloat16)
    b_init = jnp.concatenate([p["b_init_h"], p["b_init_c"]], axis=1)     # (1, 2H)
    # fused recurrent projection: h @ [w_latt | w_fbeta | w_hh | w_out]  (H, 256)
    w_hfused = jnp.concatenate([p["w_latt"], p["w_fbeta"], p["w_hh"], p["w_out"]],
                               axis=1).astype(jnp.float32)
    b_hfused = jnp.concatenate(
        [p["b_latt"], p["b_fbeta"], jnp.zeros((1, 4 * hidden), jnp.float32), p["b_out"]],
        axis=1)                                                           # (1, 256)
    w_emb_gates = p["w_ih"][:embed_size].astype(jnp.bfloat16)             # (E, 4H)
    w_ctx_gates = p["w_ih"][embed_size:embed_size + feature_size].astype(jnp.float32)
    b_gates = (p["b_ih"] + p["b_hh"]).astype(jnp.float32)                 # (1, 4H)
    bn_packed = jnp.concatenate([p["bn_gamma"], p["bn_beta"],
                                 p["bn_mean"], p["bn_var"]], axis=0)      # (4, E)

    # one (8, 256) slab holds every small (1, N) vector  (b_comb removed entirely)
    slab_w = w_hfused.shape[1]

    def row_(x):
        x = x.reshape(1, -1).astype(jnp.float32)
        return jnp.pad(x, ((0, 0), (0, slab_w - x.shape[1])))

    rows = [row_(b_init), row_(p["b_img"]), row_(b_hfused), row_(b_gates),
            row_(p["enc_b"]), row_(p["w_comb"])]
    bias_slab = jnp.concatenate(
        rows + [jnp.zeros((8 - len(rows), slab_w), jnp.float32)], axis=0)  # (8, 256)

    vmem = pl.BlockSpec(memory_space=pltpu.MemorySpace.VMEM)
    inputs = [feats, emb_2d, onehot0,
              w_init, p["w_img"].astype(jnp.bfloat16), w_hfused, w_ctx_gates,
              w_emb_gates, bias_slab,
              init_features.astype(jnp.bfloat16), p["enc_w"].astype(jnp.bfloat16),
              bn_packed]

    kernel = functools.partial(fused_kernel, bt_steps=bt_steps, hidden=hidden,
                               vocab=vocab, locs=Lc, seq=Tc)

    out_flat, alpha_flat, enc_features = pl.pallas_call(
        kernel,
        out_shape=[
            jax.ShapeDtypeStruct((Bc, Tc * vocab), jnp.float32),   # lane-dense logits
            jax.ShapeDtypeStruct((Bc, Tc * Lc), jnp.float32),      # lane-dense alphas
            jax.ShapeDtypeStruct((Bc, embed_size), jnp.float32),   # EncoderCNN output
        ],
        in_specs=[vmem] * len(inputs),
    )(*inputs)

    outputs_btv = out_flat.reshape(Bc, Tc, vocab)             # (B, T, V)
    alphas = alpha_flat.reshape(Bc, Tc, Lc)                   # (B, T, L)

    # pack_padded_sequence(outputs, lengths, batch_first=True)[0]  (lengths static)
    max_len = int(max(lengths))
    packed_rows = []
    for t in range(max_len):
        bt = sum(1 for l in lengths if l > t)
        packed_rows.append(outputs_btv[:bt, t])
    packed = jnp.concatenate(packed_rows, axis=0)             # (sum(lengths), V)
    return packed, alphas, enc_features


# ============================= deterministic params ===========================
def init_params(key):
    ks = jax.random.split(key, 24)
    u = lambda k, shape, a=0.1: jax.random.uniform(k, shape, jnp.float32, -a, a)
    p = {}
    # EncoderCNN
    p["enc_w"] = u(ks[0], (F0, E))
    p["enc_b"] = u(ks[1], (1, E))
    p["bn_gamma"] = jnp.ones((1, E), jnp.float32)
    p["bn_beta"] = jnp.zeros((1, E), jnp.float32)
    p["bn_mean"] = jnp.zeros((1, E), jnp.float32)
    p["bn_var"] = jnp.ones((1, E), jnp.float32)
    # SoftAttentionDecoderRNN
    p["embed"] = u(ks[2], (V, E))
    p["w_init_h"] = u(ks[3], (C, H)); p["b_init_h"] = u(ks[4], (1, H))
    p["w_init_c"] = u(ks[5], (C, H)); p["b_init_c"] = u(ks[6], (1, H))
    p["w_img"] = u(ks[7], (C, H));    p["b_img"] = u(ks[8], (1, H))
    p["w_latt"] = u(ks[9], (H, H));   p["b_latt"] = u(ks[10], (1, H))
    p["w_comb"] = u(ks[11], (1, H));  p["b_comb"] = u(ks[12], (1, 1))  # b_comb cancels in softmax
    p["w_fbeta"] = u(ks[13], (H, C)); p["b_fbeta"] = u(ks[14], (1, C))
    p["w_ih"] = u(ks[15], (E + C, 4 * H)); p["b_ih"] = u(ks[16], (1, 4 * H))
    p["w_hh"] = u(ks[17], (H, 4 * H));     p["b_hh"] = u(ks[18], (1, 4 * H))
    p["w_out"] = u(ks[19], (H, V))
    p["b_out"] = jnp.zeros((1, V), jnp.float32)
    return p


# ===================================== main ===================================
if __name__ == "__main__":
    key = jax.random.PRNGKey(0)
    k_img, k_init, k_cap, k_pf = jax.random.split(key, 4)

    images = jax.random.normal(k_img, (B, 3, 16, 16), jnp.float32)   # NCHW, unused
    init_features = jax.random.normal(k_init, (B, F0), jnp.float32)
    captions = jax.random.randint(k_cap, (B, T), 0, V, dtype=jnp.int32)
    persist_features = jax.random.normal(k_pf, (B, L * C), jnp.float32)
    lengths = [8, 7, 5, 3]                                           # sorted descending

    params = init_params(jax.random.PRNGKey(42))

    outputs, alphas, enc_features = soft_attention_encoder_decoder_forward(
        images, init_features, captions, lengths, persist_features, params)
    jax.block_until_ready((outputs, alphas, enc_features))

    assert outputs.shape == (sum(lengths), V), outputs.shape
    assert alphas.shape == (B, T, L), alphas.shape
    assert enc_features.shape == (B, E), enc_features.shape
    print("KERNEL_OK")
</pallas_src>

<mosaic_0001>
module attributes {stable_mosaic.version = 11 : i64} {
  func.func @fused_kernel(%arg0: memref<4x16x32xbf16, #tpu.memory_space<vmem>>, %arg1: memref<28x32xbf16, #tpu.memory_space<vmem>>, %arg2: memref<4x64xf32, #tpu.memory_space<vmem>>, %arg3: memref<32x64xbf16, #tpu.memory_space<vmem>>, %arg4: memref<32x32xbf16, #tpu.memory_space<vmem>>, %arg5: memref<32x256xf32, #tpu.memory_space<vmem>>, %arg6: memref<32x128xf32, #tpu.memory_space<vmem>>, %arg7: memref<32x128xbf16, #tpu.memory_space<vmem>>, %arg8: memref<8x256xf32, #tpu.memory_space<vmem>>, %arg9: memref<4x48xbf16, #tpu.memory_space<vmem>>, %arg10: memref<48x32xbf16, #tpu.memory_space<vmem>>, %arg11: memref<4x32xf32, #tpu.memory_space<vmem>>, %arg12: memref<4x512xf32, #tpu.memory_space<vmem>>, %arg13: memref<4x128xf32, #tpu.memory_space<vmem>>, %arg14: memref<4x32xf32, #tpu.memory_space<vmem>>) attributes {dimension_semantics = [], scalar_prefetch = 0 : i64, scratch_operands = 0 : i64, tpu.core_type = #tpu.core_type<tc>} {
    %c4 = arith.constant 4 : index
    %c0 = arith.constant 0 : index
    %0 = vector.load %arg8[%c4, %c0] : memref<8x256xf32, #tpu.memory_space<vmem>>, vector<1x32xf32>
    %c0_0 = arith.constant 0 : index
    %c0_1 = arith.constant 0 : index
    %1 = vector.load %arg9[%c0_0, %c0_1] : memref<4x48xbf16, #tpu.memory_space<vmem>>, vector<4x48xbf16>
    %c0_2 = arith.constant 0 : index
    %c0_3 = arith.constant 0 : index
    %2 = vector.load %arg10[%c0_2, %c0_3] : memref<48x32xbf16, #tpu.memory_space<vmem>>, vector<48x32xbf16>
    %cst = arith.constant dense<0.000000e+00> : vector<4x32xf32>
    %3 = tpu.matmul %1, %2, %cst {dimension_numbers = #tpu.dot_dimension_numbers<[1], [0], [0], [1], [0, 0, 1, 1], [], []>} : vector<4x48xbf16>, vector<48x32xbf16>, vector<4x32xf32> -> vector<4x32xf32>
    %4 = vector.broadcast %0 : vector<1x32xf32> to vector<4x32xf32>
    %5 = arith.addf %3, %4 : vector<4x32xf32>
    %c0_4 = arith.constant 0 : index
    %c0_5 = arith.constant 0 : index
    %6 = vector.load %arg11[%c0_4, %c0_5] : memref<4x32xf32, #tpu.memory_space<vmem>>, vector<1x32xf32>
    %c1 = arith.constant 1 : index
    %c0_6 = arith.constant 0 : index
    %7 = vector.load %arg11[%c1, %c0_6] : memref<4x32xf32, #tpu.memory_space<vmem>>, vector<1x32xf32>
    %c2 = arith.constant 2 : index
    %c0_7 = arith.constant 0 : index
    %8 = vector.load %arg11[%c2, %c0_7] : memref<4x32xf32, #tpu.memory_space<vmem>>, vector<1x32xf32>
    %c3 = arith.constant 3 : index
    %c0_8 = arith.constant 0 : index
    %9 = vector.load %arg11[%c3, %c0_8] : memref<4x32xf32, #tpu.memory_space<vmem>>, vector<1x32xf32>
    %10 = vector.broadcast %8 : vector<1x32xf32> to vector<4x32xf32>
    %11 = arith.subf %5, %10 : vector<4x32xf32>
    %cst_9 = arith.constant 9.99999974E-6 : f32
    %12 = vector.broadcast %cst_9 : f32 to vector<1x32xf32>
    %13 = arith.addf %9, %12 : vector<1x32xf32>
    %14 = math.rsqrt %13 : vector<1x32xf32>
    %15 = vector.broadcast %14 : vector<1x32xf32> to vector<4x32xf32>
    %16 = arith.mulf %11, %15 : vector<4x32xf32>
    %17 = vector.broadcast %6 : vector<1x32xf32> to vector<4x32xf32>
    %18 = arith.mulf %16, %17 : vector<4x32xf32>
    %19 = vector.broadcast %7 : vector<1x32xf32> to vector<4x32xf32>
    %20 = arith.addf %18, %19 : vector<4x32xf32>
    %c0_10 = arith.constant 0 : index
    %c0_11 = arith.constant 0 : index
    %21 = vector.load %arg14[%c0_10, %c0_11] : memref<4x32xf32, #tpu.memory_space<vmem>>, vector<4x32xf32>
    tpu.vector_store %arg14[%c0_10, %c0_11], %20 {strides = array<i32>} : memref<4x32xf32, #tpu.memory_space<vmem>>, vector<4x32xf32>,
    %c0_12 = arith.constant 0 : index
    %c0_13 = arith.constant 0 : index
    %c0_14 = arith.constant 0 : index
    %22 = vector.load %arg0[%c0_12, %c0_13, %c0_14] : memref<4x16x32xbf16, #tpu.memory_space<vmem>>, vector<4x16x32xbf16>
    %c0_15 = arith.constant 0 : index
    %c0_16 = arith.constant 0 : index
    %23 = vector.load %arg8[%c0_15, %c0_16] : memref<8x256xf32, #tpu.memory_space<vmem>>, vector<1x64xf32>
    %c1_17 = arith.constant 1 : index
    %c0_18 = arith.constant 0 : index
    %24 = vector.load %arg8[%c1_17, %c0_18] : memref<8x256xf32, #tpu.memory_space<vmem>>, vector<1x32xf32>
    %c2_19 = arith.constant 2 : index
    %c0_20 = arith.constant 0 : index
    %25 = vector.load %arg8[%c2_19, %c0_20] : memref<8x256xf32, #tpu.memory_space<vmem>>, vector<1x256xf32>
    %c3_21 = arith.constant 3 : index
    %c0_22 = arith.constant 0 : index
    %26 = vector.load %arg8[%c3_21, %c0_22] : memref<8x256xf32, #tpu.memory_space<vmem>>, vector<1x128xf32>
    %c5 = arith.constant 5 : index
    %c0_23 = arith.constant 0 : index
    %27 = vector.load %arg8[%c5, %c0_23] : memref<8x256xf32, #tpu.memory_space<vmem>>, vector<1x32xf32>
    %28 = vector.shape_cast %27 : vector<1x32xf32> to vector<1x1x32xf32>
    %29 = arith.extf %22 : vector<4x16x32xbf16> to vector<4x16x32xf32>
    %cst_24 = arith.constant dense<0.000000e+00> : vector<4x32xf32>
    %30 = vector.multi_reduction <add>, %29, %cst_24 [1] : vector<4x16x32xf32> to vector<4x32xf32>
    %cst_25 = arith.constant 1.600000e+01 : f32
    %31 = vector.broadcast %cst_25 : f32 to vector<4x32xf32>
    %32 = arith.divf %30, %31 : vector<4x32xf32>
    %33 = arith.truncf %32 : vector<4x32xf32> to vector<4x32xbf16>
    %c0_26 = arith.constant 0 : index
    %c0_27 = arith.constant 0 : index
    %34 = vector.load %arg3[%c0_26, %c0_27] : memref<32x64xbf16, #tpu.memory_space<vmem>>, vector<32x64xbf16>
    %cst_28 = arith.constant dense<0.000000e+00> : vector<4x64xf32>
    %35 = tpu.matmul %33, %34, %cst_28 {dimension_numbers = #tpu.dot_dimension_numbers<[1], [0], [0], [1], [0, 0, 1, 1], [], []>} : vector<4x32xbf16>, vector<32x64xbf16>, vector<4x64xf32> -> vector<4x64xf32>
    %36 = vector.broadcast %23 : vector<1x64xf32> to vector<4x64xf32>
    %37 = arith.addf %35, %36 : vector<4x64xf32>
    %38 = vector.extract_strided_slice %37 {offsets = [0, 0], sizes = [4, 32], strides = [1, 1]} : vector<4x64xf32> to vector<4x32xf32>
    %39 = vector.extract_strided_slice %37 {offsets = [0, 32], sizes = [4, 32], strides = [1, 1]} : vector<4x64xf32> to vector<4x32xf32>
    %40 = vector.shape_cast %22 : vector<4x16x32xbf16> to vector<64x32xbf16>
    %c0_29 = arith.constant 0 : index
    %c0_30 = arith.constant 0 : index
    %41 = vector.load %arg4[%c0_29, %c0_30] : memref<32x32xbf16, #tpu.memory_space<vmem>>, vector<32x32xbf16>
    %cst_31 = arith.constant dense<0.000000e+00> : vector<64x32xf32>
    %42 = tpu.matmul %40, %41, %cst_31 {dimension_numbers = #tpu.dot_dimension_numbers<[1], [0], [0], [1], [0, 0, 1, 1], [], []>} : vector<64x32xbf16>, vector<32x32xbf16>, vector<64x32xf32> -> vector<64x32xf32>
    %43 = vector.shape_cast %42 : vector<64x32xf32> to vector<4x16x32xf32>
    %44 = vector.shape_cast %24 : vector<1x32xf32> to vector<1x1x32xf32>
    %45 = vector.broadcast %44 : vector<1x1x32xf32> to vector<4x16x32xf32>
    %46 = arith.addf %43, %45 : vector<4x16x32xf32>
    %c0_32 = arith.constant 0 : index
    %c0_33 = arith.constant 0 : index
    %47 = vector.load %arg1[%c0_32, %c0_33] : memref<28x32xbf16, #tpu.memory_space<vmem>>, vector<28x32xbf16>
    %c0_34 = arith.constant 0 : index
    %c0_35 = arith.constant 0 : index
    %48 = vector.load %arg7[%c0_34, %c0_35] : memref<32x128xbf16, #tpu.memory_space<vmem>>, vector<32x128xbf16>
    %cst_36 = arith.constant dense<0.000000e+00> : vector<28x128xf32>
    %49 = tpu.matmul %47, %48, %cst_36 {dimension_numbers = #tpu.dot_dimension_numbers<[1], [0], [0], [1], [0, 0, 1, 1], [], []>} : vector<28x32xbf16>, vector<32x128xbf16>, vector<28x128xf32> -> vector<28x128xf32>
    %50 = vector.broadcast %26 : vector<1x128xf32> to vector<28x128xf32>
    %51 = arith.addf %49, %50 : vector<28x128xf32>
    %52 = tpu.iota {dimensions = array<i32: 0>} : vector<4x1xi32>
    %c0_37 = arith.constant 0 : index
    %c0_38 = arith.constant 0 : index
    %53 = vector.load %arg2[%c0_37, %c0_38] : memref<4x64xf32, #tpu.memory_space<vmem>>, vector<4x64xf32>
    %c0_39 = arith.constant 0 : index
    %c0_40 = arith.constant 0 : index
    %54 = vector.load %arg12[%c0_39, %c0_40] : memref<4x512xf32, #tpu.memory_space<vmem>>, vector<4x64xf32>
    tpu.vector_store %arg12[%c0_39, %c0_40], %53 {strides = array<i32>} : memref<4x512xf32, #tpu.memory_space<vmem>>, vector<4x64xf32>,
    %cst_41 = arith.constant 0.000000e+00 : f32
    %55 = vector.broadcast %cst_41 : f32 to vector<4x16xf32>
    %c0_42 = arith.constant 0 : index
    %c0_43 = arith.constant 0 : index
    %56 = vector.load %arg13[%c0_42, %c0_43] : memref<4x128xf32, #tpu.memory_space<vmem>>, vector<4x16xf32>
    tpu.vector_store %arg13[%c0_42, %c0_43], %55 {strides = array<i32>} : memref<4x128xf32, #tpu.memory_space<vmem>>, vector<4x16xf32>,
    %c0_44 = arith.constant 0 : index
    %c0_45 = arith.constant 0 : index
    %57 = vector.load %arg5[%c0_44, %c0_45] : memref<32x256xf32, #tpu.memory_space<vmem>>, vector<32x256xf32>
    %cst_46 = arith.constant dense<0.000000e+00> : vector<4x256xf32>
    %58 = tpu.matmul %38, %57, %cst_46 {dimension_numbers = #tpu.dot_dimension_numbers<[1], [0], [0], [1], [0, 0, 1, 1], [], []>} : vector<4x32xf32>, vector<32x256xf32>, vector<4x256xf32> -> vector<4x256xf32>
    %59 = vector.broadcast %25 : vector<1x256xf32> to vector<4x256xf32>
    %60 = arith.addf %58, %59 : vector<4x256xf32>
    %61 = vector.extract_strided_slice %60 {offsets = [0, 0], sizes = [4, 32], strides = [1, 1]} : vector<4x256xf32> to vector<4x32xf32>
    %62 = vector.extract_strided_slice %60 {offsets = [0, 32], sizes = [4, 32], strides = [1, 1]} : vector<4x256xf32> to vector<4x32xf32>
    %63 = arith.negf %62 : vector<4x32xf32>
    %64 = math.exp %63 : vector<4x32xf32>
    %cst_47 = arith.constant 1.000000e+00 : f32
    %65 = vector.broadcast %cst_47 : f32 to vector<4x32xf32>
    %66 = arith.addf %65, %64 : vector<4x32xf32>
    %67 = arith.divf %65, %66 : vector<4x32xf32>
    %68 = vector.shape_cast %61 : vector<4x32xf32> to vector<4x1x32xf32>
    %69 = vector.broadcast %68 : vector<4x1x32xf32> to vector<4x16x32xf32>
    %70 = arith.addf %46, %69 : vector<4x16x32xf32>
    %cst_48 = arith.constant 0.000000e+00 : f32
    %71 = vector.broadcast %cst_48 : f32 to vector<4x16x32xf32>
    %72 = arith.maximumf %70, %71 : vector<4x16x32xf32>
    %73 = vector.broadcast %28 : vector<1x1x32xf32> to vector<4x16x32xf32>
    %74 = arith.mulf %72, %73 : vector<4x16x32xf32>
    %cst_49 = arith.constant dense<0.000000e+00> : vector<4x16xf32>
    %75 = vector.multi_reduction <add>, %74, %cst_49 [2] : vector<4x16x32xf32> to vector<4x16xf32>
    %cst_50 = arith.constant dense<0xFF800000> : vector<4xf32>
    %76 = vector.multi_reduction <maximumf>, %75, %cst_50 [1] : vector<4x16xf32> to vector<4xf32>
    %77 = vector.shape_cast %76 : vector<4xf32> to vector<4x1xf32>
    %78 = vector.broadcast %77 : vector<4x1xf32> to vector<4x16xf32>
    %79 = arith.subf %75, %78 : vector<4x16xf32>
    %80 = math.exp %79 : vector<4x16xf32>
    %cst_51 = arith.constant dense<0.000000e+00> : vector<4xf32>
    %81 = vector.multi_reduction <add>, %80, %cst_51 [1] : vector<4x16xf32> to vector<4xf32>
    %82 = vector.shape_cast %81 : vector<4xf32> to vector<4x1xf32>
    %83 = tpu.reciprocal %82 {approx = true} : vector<4x1xf32> -> vector<4x1xf32>
    %84 = vector.broadcast %83 : vector<4x1xf32> to vector<4x16xf32>
    %85 = arith.mulf %80, %84 : vector<4x16xf32>
    %c0_52 = arith.constant 0 : index
    %c16 = arith.constant 16 : index
    %86 = vector.load %arg13[%c0_52, %c16] : memref<4x128xf32, #tpu.memory_space<vmem>>, vector<4x16xf32>
    tpu.vector_store %arg13[%c0_52, %c16], %85 {strides = array<i32>} : memref<4x128xf32, #tpu.memory_space<vmem>>, vector<4x16xf32>,
    %87 = vector.shape_cast %85 : vector<4x16xf32> to vector<4x1x16xf32>
    %88 = arith.truncf %87 : vector<4x1x16xf32> to vector<4x1x16xbf16>
    "tpu.trace_start"() <{level = 10 : i32, message = "bql,blc->bqc"}> : () -> ()
    %cst_53 = arith.constant dense<0.000000e+00> : vector<4x1x32xf32>
    %89 = tpu.matmul %88, %22, %cst_53 {dimension_numbers = #tpu.dot_dimension_numbers<[2], [1], [1], [2], [0, 0, 0, 1, 1, 2], [0], [0]>} : vector<4x1x16xbf16>, vector<4x16x32xbf16>, vector<4x1x32xf32> -> vector<4x1x32xf32>
    "tpu.trace_stop"() : () -> ()
    %90 = vector.shape_cast %89 : vector<4x1x32xf32> to vector<4x32xf32>
    %91 = arith.mulf %67, %90 : vector<4x32xf32>
    %92 = vector.extract_strided_slice %51 {offsets = [0, 0], sizes = [4, 128], strides = [1, 1]} : vector<28x128xf32> to vector<4x128xf32>
    %c0_54 = arith.constant 0 : index
    %c0_55 = arith.constant 0 : index
    %93 = vector.load %arg6[%c0_54, %c0_55] : memref<32x128xf32, #tpu.memory_space<vmem>>, vector<32x128xf32>
    %cst_56 = arith.constant dense<0.000000e+00> : vector<4x128xf32>
    %94 = tpu.matmul %91, %93, %cst_56 {dimension_numbers = #tpu.dot_dimension_numbers<[1], [0], [0], [1], [0, 0, 1, 1], [], []>} : vector<4x32xf32>, vector<32x128xf32>, vector<4x128xf32> -> vector<4x128xf32>
    %95 = arith.addf %92, %94 : vector<4x128xf32>
    %96 = vector.extract_strided_slice %60 {offsets = [0, 64], sizes = [4, 128], strides = [1, 1]} : vector<4x256xf32> to vector<4x128xf32>
    %97 = arith.addf %95, %96 : vector<4x128xf32>
    %98 = vector.extract_strided_slice %97 {offsets = [0, 0], sizes = [4, 32], strides = [1, 1]} : vector<4x128xf32> to vector<4x32xf32>
    %99 = arith.negf %98 : vector<4x32xf32>
    %100 = math.exp %99 : vector<4x32xf32>
    %cst_57 = arith.constant 1.000000e+00 : f32
    %101 = vector.broadcast %cst_57 : f32 to vector<4x32xf32>
    %102 = arith.addf %101, %100 : vector<4x32xf32>
    %103 = arith.divf %101, %102 : vector<4x32xf32>
    %104 = vector.extract_strided_slice %97 {offsets = [0, 32], sizes = [4, 32], strides = [1, 1]} : vector<4x128xf32> to vector<4x32xf32>
    %105 = arith.negf %104 : vector<4x32xf32>
    %106 = math.exp %105 : vector<4x32xf32>
    %cst_58 = arith.constant 1.000000e+00 : f32
    %107 = vector.broadcast %cst_58 : f32 to vector<4x32xf32>
    %108 = arith.addf %107, %106 : vector<4x32xf32>
    %109 = arith.divf %107, %108 : vector<4x32xf32>
    %110 = vector.extract_strided_slice %97 {offsets = [0, 64], sizes = [4, 32], strides = [1, 1]} : vector<4x128xf32> to vector<4x32xf32>
    %111 = math.tanh %110 : vector<4x32xf32>
    %112 = vector.extract_strided_slice %97 {offsets = [0, 96], sizes = [4, 32], strides = [1, 1]} : vector<4x128xf32> to vector<4x32xf32>
    %113 = arith.negf %112 : vector<4x32xf32>
    %114 = math.exp %113 : vector<4x32xf32>
    %cst_59 = arith.constant 1.000000e+00 : f32
    %115 = vector.broadcast %cst_59 : f32 to vector<4x32xf32>
    %116 = arith.addf %115, %114 : vector<4x32xf32>
    %117 = arith.divf %115, %116 : vector<4x32xf32>
    %118 = arith.mulf %109, %39 : vector<4x32xf32>
    %119 = arith.mulf %103, %111 : vector<4x32xf32>
    %120 = arith.addf %118, %119 : vector<4x32xf32>
    %121 = math.tanh %120 : vector<4x32xf32>
    %122 = arith.mulf %117, %121 : vector<4x32xf32>
    %c0_60 = arith.constant 0 : index
    %c0_61 = arith.constant 0 : index
    %123 = vector.load %arg5[%c0_60, %c0_61] : memref<32x256xf32, #tpu.memory_space<vmem>>, vector<32x256xf32>
    %cst_62 = arith.constant dense<0.000000e+00> : vector<4x256xf32>
    %124 = tpu.matmul %122, %123, %cst_62 {dimension_numbers = #tpu.dot_dimension_numbers<[1], [0], [0], [1], [0, 0, 1, 1], [], []>} : vector<4x32xf32>, vector<32x256xf32>, vector<4x256xf32> -> vector<4x256xf32>
    %125 = vector.broadcast %25 : vector<1x256xf32> to vector<4x256xf32>
    %126 = arith.addf %124, %125 : vector<4x256xf32>
    %127 = vector.extract_strided_slice %126 {offsets = [0, 192], sizes = [4, 64], strides = [1, 1]} : vector<4x256xf32> to vector<4x64xf32>
    %c0_63 = arith.constant 0 : index
    %c64 = arith.constant 64 : index
    %128 = vector.load %arg12[%c0_63, %c64] : memref<4x512xf32, #tpu.memory_space<vmem>>, vector<4x64xf32>
    tpu.vector_store %arg12[%c0_63, %c64], %127 {strides = array<i32>} : memref<4x512xf32, #tpu.memory_space<vmem>>, vector<4x64xf32>,
    %129 = vector.extract_strided_slice %126 {offsets = [0, 0], sizes = [4, 32], strides = [1, 1]} : vector<4x256xf32> to vector<4x32xf32>
    %130 = vector.extract_strided_slice %126 {offsets = [0, 32], sizes = [4, 32], strides = [1, 1]} : vector<4x256xf32> to vector<4x32xf32>
    %131 = arith.negf %130 : vector<4x32xf32>
    %132 = math.exp %131 : vector<4x32xf32>
    %cst_64 = arith.constant 1.000000e+00 : f32
    %133 = vector.broadcast %cst_64 : f32 to vector<4x32xf32>
    %134 = arith.addf %133, %132 : vector<4x32xf32>
    %135 = arith.divf %133, %134 : vector<4x32xf32>
    %136 = vector.shape_cast %129 : vector<4x32xf32> to vector<4x1x32xf32>
    %137 = vector.broadcast %136 : vector<4x1x32xf32> to vector<4x16x32xf32>
    %138 = arith.addf %46, %137 : vector<4x16x32xf32>
    %cst_65 = arith.constant 0.000000e+00 : f32
    %139 = vector.broadcast %cst_65 : f32 to vector<4x16x32xf32>
    %140 = arith.maximumf %138, %139 : vector<4x16x32xf32>
    %141 = vector.broadcast %28 : vector<1x1x32xf32> to vector<4x16x32xf32>
    %142 = arith.mulf %140, %141 : vector<4x16x32xf32>
    %cst_66 = arith.constant dense<0.000000e+00> : vector<4x16xf32>
    %143 = vector.multi_reduction <add>, %142, %cst_66 [2] : vector<4x16x32xf32> to vector<4x16xf32>
    %cst_67 = arith.constant dense<0xFF800000> : vector<4xf32>
    %144 = vector.multi_reduction <maximumf>, %143, %cst_67 [1] : vector<4x16xf32> to vector<4xf32>
    %145 = vector.shape_cast %144 : vector<4xf32> to vector<4x1xf32>
    %146 = vector.broadcast %145 : vector<4x1xf32> to vector<4x16xf32>
    %147 = arith.subf %143, %146 : vector<4x16xf32>
    %148 = math.exp %147 : vector<4x16xf32>
    %cst_68 = arith.constant dense<0.000000e+00> : vector<4xf32>
    %149 = vector.multi_reduction <add>, %148, %cst_68 [1] : vector<4x16xf32> to vector<4xf32>
    %150 = vector.shape_cast %149 : vector<4xf32> to vector<4x1xf32>
    %151 = tpu.reciprocal %150 {approx = true} : vector<4x1xf32> -> vector<4x1xf32>
    %152 = vector.broadcast %151 : vector<4x1xf32> to vector<4x16xf32>
    %153 = arith.mulf %148, %152 : vector<4x16xf32>
    %c0_69 = arith.constant 0 : index
    %c32 = arith.constant 32 : index
    %154 = vector.load %arg13[%c0_69, %c32] : memref<4x128xf32, #tpu.memory_space<vmem>>, vector<4x16xf32>
    tpu.vector_store %arg13[%c0_69, %c32], %153 {strides = array<i32>} : memref<4x128xf32, #tpu.memory_space<vmem>>, vector<4x16xf32>,
    %155 = vector.shape_cast %153 : vector<4x16xf32> to vector<4x1x16xf32>
    %156 = arith.truncf %155 : vector<4x1x16xf32> to vector<4x1x16xbf16>
    "tpu.trace_start"() <{level = 10 : i32, message = "bql,blc->bqc"}> : () -> ()
    %cst_70 = arith.constant dense<0.000000e+00> : vector<4x1x32xf32>
    %157 = tpu.matmul %156, %22, %cst_70 {dimension_numbers = #tpu.dot_dimension_numbers<[2], [1], [1], [2], [0, 0, 0, 1, 1, 2], [0], [0]>} : vector<4x1x16xbf16>, vector<4x16x32xbf16>, vector<4x1x32xf32> -> vector<4x1x32xf32>
    "tpu.trace_stop"() : () -> ()
    %158 = vector.shape_cast %157 : vector<4x1x32xf32> to vector<4x32xf32>
    %159 = arith.mulf %135, %158 : vector<4x32xf32>
    %160 = vector.extract_strided_slice %51 {offsets = [4, 0], sizes = [4, 128], strides = [1, 1]} : vector<28x128xf32> to vector<4x128xf32>
    %c0_71 = arith.constant 0 : index
    %c0_72 = arith.constant 0 : index
    %161 = vector.load %arg6[%c0_71, %c0_72] : memref<32x128xf32, #tpu.memory_space<vmem>>, vector<32x128xf32>
    %cst_73 = arith.constant dense<0.000000e+00> : vector<4x128xf32>
    %162 = tpu.matmul %159, %161, %cst_73 {dimension_numbers = #tpu.dot_dimension_numbers<[1], [0], [0], [1], [0, 0, 1, 1], [], []>} : vector<4x32xf32>, vector<32x128xf32>, vector<4x128xf32> -> vector<4x128xf32>
    %163 = arith.addf %160, %162 : vector<4x128xf32>
    %164 = vector.extract_strided_slice %126 {offsets = [0, 64], sizes = [4, 128], strides = [1, 1]} : vector<4x256xf32> to vector<4x128xf32>
    %165 = arith.addf %163, %164 : vector<4x128xf32>
    %166 = vector.extract_strided_slice %165 {offsets = [0, 0], sizes = [4, 32], strides = [1, 1]} : vector<4x128xf32> to vector<4x32xf32>
    %167 = arith.negf %166 : vector<4x32xf32>
    %168 = math.exp %167 : vector<4x32xf32>
    %cst_74 = arith.constant 1.000000e+00 : f32
    %169 = vector.broadcast %cst_74 : f32 to vector<4x32xf32>
    %170 = arith.addf %169, %168 : vector<4x32xf32>
    %171 = arith.divf %169, %170 : vector<4x32xf32>
    %172 = vector.extract_strided_slice %165 {offsets = [0, 32], sizes = [4, 32], strides = [1, 1]} : vector<4x128xf32> to vector<4x32xf32>
    %173 = arith.negf %172 : vector<4x32xf32>
    %174 = math.exp %173 : vector<4x32xf32>
    %cst_75 = arith.constant 1.000000e+00 : f32
    %175 = vector.broadcast %cst_75 : f32 to vector<4x32xf32>
    %176 = arith.addf %175, %174 : vector<4x32xf32>
    %177 = arith.divf %175, %176 : vector<4x32xf32>
    %178 = vector.extract_strided_slice %165 {offsets = [0, 64], sizes = [4, 32], strides = [1, 1]} : vector<4x128xf32> to vector<4x32xf32>
    %179 = math.tanh %178 : vector<4x32xf32>
    %180 = vector.extract_strided_slice %165 {offsets = [0, 96], sizes = [4, 32], strides = [1, 1]} : vector<4x128xf32> to vector<4x32xf32>
    %181 = arith.negf %180 : vector<4x32xf32>
    %182 = math.exp %181 : vector<4x32xf32>
    %cst_76 = arith.constant 1.000000e+00 : f32
    %183 = vector.broadcast %cst_76 : f32 to vector<4x32xf32>
    %184 = arith.addf %183, %182 : vector<4x32xf32>
    %185 = arith.divf %183, %184 : vector<4x32xf32>
    %186 = arith.mulf %177, %120 : vector<4x32xf32>
    %187 = arith.mulf %171, %179 : vector<4x32xf32>
    %188 = arith.addf %186, %187 : vector<4x32xf32>
    %189 = math.tanh %188 : vector<4x32xf32>
    %190 = arith.mulf %185, %189 : vector<4x32xf32>
    %c0_77 = arith.constant 0 : index
    %c0_78 = arith.constant 0 : index
    %191 = vector.load %arg5[%c0_77, %c0_78] : memref<32x256xf32, #tpu.memory_space<vmem>>, vector<32x256xf32>
    %cst_79 = arith.constant dense<0.000000e+00> : vector<4x256xf32>
    %192 = tpu.matmul %190, %191, %cst_79 {dimension_numbers = #tpu.dot_dimension_numbers<[1], [0], [0], [1], [0, 0, 1, 1], [], []>} : vector<4x32xf32>, vector<32x256xf32>, vector<4x256xf32> -> vector<4x256xf32>
    %193 = vector.broadcast %25 : vector<1x256xf32> to vector<4x256xf32>
    %194 = arith.addf %192, %193 : vector<4x256xf32>
    %195 = vector.extract_strided_slice %194 {offsets = [0, 192], sizes = [4, 64], strides = [1, 1]} : vector<4x256xf32> to vector<4x64xf32>
    %c0_80 = arith.constant 0 : index
    %c128 = arith.constant 128 : index
    %196 = vector.load %arg12[%c0_80, %c128] : memref<4x512xf32, #tpu.memory_space<vmem>>, vector<4x64xf32>
    tpu.vector_store %arg12[%c0_80, %c128], %195 {strides = array<i32>} : memref<4x512xf32, #tpu.memory_space<vmem>>, vector<4x64xf32>,
    %197 = vector.extract_strided_slice %194 {offsets = [0, 0], sizes = [4, 32], strides = [1, 1]} : vector<4x256xf32> to vector<4x32xf32>
    %198 = vector.extract_strided_slice %194 {offsets = [0, 32], sizes = [4, 32], strides = [1, 1]} : vector<4x256xf32> to vector<4x32xf32>
    %199 = arith.negf %198 : vector<4x32xf32>
    %200 = math.exp %199 : vector<4x32xf32>
    %cst_81 = arith.constant 1.000000e+00 : f32
    %201 = vector.broadcast %cst_81 : f32 to vector<4x32xf32>
    %202 = arith.addf %201, %200 : vector<4x32xf32>
    %203 = arith.divf %201, %202 : vector<4x32xf32>
    %204 = vector.shape_cast %197 : vector<4x32xf32> to vector<4x1x32xf32>
    %205 = vector.broadcast %204 : vector<4x1x32xf32> to vector<4x16x32xf32>
    %206 = arith.addf %46, %205 : vector<4x16x32xf32>
    %cst_82 = arith.constant 0.000000e+00 : f32
    %207 = vector.broadcast %cst_82 : f32 to vector<4x16x32xf32>
    %208 = arith.maximumf %206, %207 : vector<4x16x32xf32>
    %209 = vector.broadcast %28 : vector<1x1x32xf32> to vector<4x16x32xf32>
    %210 = arith.mulf %208, %209 : vector<4x16x32xf32>
    %cst_83 = arith.constant dense<0.000000e+00> : vector<4x16xf32>
    %211 = vector.multi_reduction <add>, %210, %cst_83 [2] : vector<4x16x32xf32> to vector<4x16xf32>
    %cst_84 = arith.constant dense<0xFF800000> : vector<4xf32>
    %212 = vector.multi_reduction <maximumf>, %211, %cst_84 [1] : vector<4x16xf32> to vector<4xf32>
    %213 = vector.shape_cast %212 : vector<4xf32> to vector<4x1xf32>
    %214 = vector.broadcast %213 : vector<4x1xf32> to vector<4x16xf32>
    %215 = arith.subf %211, %214 : vector<4x16xf32>
    %216 = math.exp %215 : vector<4x16xf32>
    %cst_85 = arith.constant dense<0.000000e+00> : vector<4xf32>
    %217 = vector.multi_reduction <add>, %216, %cst_85 [1] : vector<4x16xf32> to vector<4xf32>
    %218 = vector.shape_cast %217 : vector<4xf32> to vector<4x1xf32>
    %219 = tpu.reciprocal %218 {approx = true} : vector<4x1xf32> -> vector<4x1xf32>
    %220 = vector.broadcast %219 : vector<4x1xf32> to vector<4x16xf32>
    %221 = arith.mulf %216, %220 : vector<4x16xf32>
    %c0_86 = arith.constant 0 : index
    %c48 = arith.constant 48 : index
    %222 = vector.load %arg13[%c0_86, %c48] : memref<4x128xf32, #tpu.memory_space<vmem>>, vector<4x16xf32>
    tpu.vector_store %arg13[%c0_86, %c48], %221 {strides = array<i32>} : memref<4x128xf32, #tpu.memory_space<vmem>>, vector<4x16xf32>,
    %223 = vector.shape_cast %221 : vector<4x16xf32> to vector<4x1x16xf32>
    %224 = arith.truncf %223 : vector<4x1x16xf32> to vector<4x1x16xbf16>
    "tpu.trace_start"() <{level = 10 : i32, message = "bql,blc->bqc"}> : () -> ()
    %cst_87 = arith.constant dense<0.000000e+00> : vector<4x1x32xf32>
    %225 = tpu.matmul %224, %22, %cst_87 {dimension_numbers = #tpu.dot_dimension_numbers<[2], [1], [1], [2], [0, 0, 0, 1, 1, 2], [0], [0]>} : vector<4x1x16xbf16>, vector<4x16x32xbf16>, vector<4x1x32xf32> -> vector<4x1x32xf32>
    "tpu.trace_stop"() : () -> ()
    %226 = vector.shape_cast %225 : vector<4x1x32xf32> to vector<4x32xf32>
    %227 = arith.mulf %203, %226 : vector<4x32xf32>
    %228 = vector.extract_strided_slice %51 {offsets = [8, 0], sizes = [4, 128], strides = [1, 1]} : vector<28x128xf32> to vector<4x128xf32>
    %c0_88 = arith.constant 0 : index
    %c0_89 = arith.constant 0 : index
    %229 = vector.load %arg6[%c0_88, %c0_89] : memref<32x128xf32, #tpu.memory_space<vmem>>, vector<32x128xf32>
    %cst_90 = arith.constant dense<0.000000e+00> : vector<4x128xf32>
    %230 = tpu.matmul %227, %229, %cst_90 {dimension_numbers = #tpu.dot_dimension_numbers<[1], [0], [0], [1], [0, 0, 1, 1], [], []>} : vector<4x32xf32>, vector<32x128xf32>, vector<4x128xf32> -> vector<4x128xf32>
    %231 = arith.addf %228, %230 : vector<4x128xf32>
    %232 = vector.extract_strided_slice %194 {offsets = [0, 64], sizes = [4, 128], strides = [1, 1]} : vector<4x256xf32> to vector<4x128xf32>
    %233 = arith.addf %231, %232 : vector<4x128xf32>
    %234 = vector.extract_strided_slice %233 {offsets = [0, 0], sizes = [4, 32], strides = [1, 1]} : vector<4x128xf32> to vector<4x32xf32>
    %235 = arith.negf %234 : vector<4x32xf32>
    %236 = math.exp %235 : vector<4x32xf32>
    %cst_91 = arith.constant 1.000000e+00 : f32
    %237 = vector.broadcast %cst_91 : f32 to vector<4x32xf32>
    %238 = arith.addf %237, %236 : vector<4x32xf32>
    %239 = arith.divf %237, %238 : vector<4x32xf32>
    %240 = vector.extract_strided_slice %233 {offsets = [0, 32], sizes = [4, 32], strides = [1, 1]} : vector<4x128xf32> to vector<4x32xf32>
    %241 = arith.negf %240 : vector<4x32xf32>
    %242 = math.exp %241 : vector<4x32xf32>
    %cst_92 = arith.constant 1.000000e+00 : f32
    %243 = vector.broadcast %cst_92 : f32 to vector<4x32xf32>
    %244 = arith.addf %243, %242 : vector<4x32xf32>
    %245 = arith.divf %243, %244 : vector<4x32xf32>
    %246 = vector.extract_strided_slice %233 {offsets = [0, 64], sizes = [4, 32], strides = [1, 1]} : vector<4x128xf32> to vector<4x32xf32>
    %247 = math.tanh %246 : vector<4x32xf32>
    %248 = vector.extract_strided_slice %233 {offsets = [0, 96], sizes = [4, 32], strides = [1, 1]} : vector<4x128xf32> to vector<4x32xf32>
    %249 = arith.negf %248 : vector<4x32xf32>
    %250 = math.exp %249 : vector<4x32xf32>
    %cst_93 = arith.constant 1.000000e+00 : f32
    %251 = vector.broadcast %cst_93 : f32 to vector<4x32xf32>
    %252 = arith.addf %251, %250 : vector<4x32xf32>
    %253 = arith.divf %251, %252 : vector<4x32xf32>
    %254 = arith.mulf %245, %188 : vector<4x32xf32>
    %255 = arith.mulf %239, %247 : vector<4x32xf32>
    %256 = arith.addf %254, %255 : vector<4x32xf32>
    %257 = math.tanh %256 : vector<4x32xf32>
    %258 = arith.mulf %253, %257 : vector<4x32xf32>
    %c0_94 = arith.constant 0 : index
    %c0_95 = arith.constant 0 : index
    %259 = vector.load %arg5[%c0_94, %c0_95] : memref<32x256xf32, #tpu.memory_space<vmem>>, vector<32x256xf32>
    %cst_96 = arith.constant dense<0.000000e+00> : vector<4x256xf32>
    %260 = tpu.matmul %258, %259, %cst_96 {dimension_numbers = #tpu.dot_dimension_numbers<[1], [0], [0], [1], [0, 0, 1, 1], [], []>} : vector<4x32xf32>, vector<32x256xf32>, vector<4x256xf32> -> vector<4x256xf32>
    %261 = vector.broadcast %25 : vector<1x256xf32> to vector<4x256xf32>
    %262 = arith.addf %260, %261 : vector<4x256xf32>
    %263 = vector.extract_strided_slice %262 {offsets = [0, 192], sizes = [4, 64], strides = [1, 1]} : vector<4x256xf32> to vector<4x64xf32>
    %c0_97 = arith.constant 0 : index
    %c192 = arith.constant 192 : index
    %264 = vector.load %arg12[%c0_97, %c192] : memref<4x512xf32, #tpu.memory_space<vmem>>, vector<4x64xf32>
    tpu.vector_store %arg12[%c0_97, %c192], %263 {strides = array<i32>} : memref<4x512xf32, #tpu.memory_space<vmem>>, vector<4x64xf32>,
    %265 = vector.extract_strided_slice %262 {offsets = [0, 0], sizes = [4, 32], strides = [1, 1]} : vector<4x256xf32> to vector<4x32xf32>
    %266 = vector.extract_strided_slice %262 {offsets = [0, 32], sizes = [4, 32], strides = [1, 1]} : vector<4x256xf32> to vector<4x32xf32>
    %267 = arith.negf %266 : vector<4x32xf32>
    %268 = math.exp %267 : vector<4x32xf32>
    %cst_98 = arith.constant 1.000000e+00 : f32
    %269 = vector.broadcast %cst_98 : f32 to vector<4x32xf32>
    %270 = arith.addf %269, %268 : vector<4x32xf32>
    %271 = arith.divf %269, %270 : vector<4x32xf32>
    %272 = vector.shape_cast %265 : vector<4x32xf32> to vector<4x1x32xf32>
    %273 = vector.broadcast %272 : vector<4x1x32xf32> to vector<4x16x32xf32>
    %274 = arith.addf %46, %273 : vector<4x16x32xf32>
    %cst_99 = arith.constant 0.000000e+00 : f32
    %275 = vector.broadcast %cst_99 : f32 to vector<4x16x32xf32>
    %276 = arith.maximumf %274, %275 : vector<4x16x32xf32>
    %277 = vector.broadcast %28 : vector<1x1x32xf32> to vector<4x16x32xf32>
    %278 = arith.mulf %276, %277 : vector<4x16x32xf32>
    %cst_100 = arith.constant dense<0.000000e+00> : vector<4x16xf32>
    %279 = vector.multi_reduction <add>, %278, %cst_100 [2] : vector<4x16x32xf32> to vector<4x16xf32>
    %cst_101 = arith.constant dense<0xFF800000> : vector<4xf32>
    %280 = vector.multi_reduction <maximumf>, %279, %cst_101 [1] : vector<4x16xf32> to vector<4xf32>
    %281 = vector.shape_cast %280 : vector<4xf32> to vector<4x1xf32>
    %282 = vector.broadcast %281 : vector<4x1xf32> to vector<4x16xf32>
    %283 = arith.subf %279, %282 : vector<4x16xf32>
    %284 = math.exp %283 : vector<4x16xf32>
    %cst_102 = arith.constant dense<0.000000e+00> : vector<4xf32>
    %285 = vector.multi_reduction <add>, %284, %cst_102 [1] : vector<4x16xf32> to vector<4xf32>
    %286 = vector.shape_cast %285 : vector<4xf32> to vector<4x1xf32>
    %287 = tpu.reciprocal %286 {approx = true} : vector<4x1xf32> -> vector<4x1xf32>
    %288 = vector.broadcast %287 : vector<4x1xf32> to vector<4x16xf32>
    %289 = arith.mulf %284, %288 : vector<4x16xf32>
    %c3_i32 = arith.constant 3 : i32
    %290 = vector.broadcast %c3_i32 : i32 to vector<4x1xi32>
    %291 = arith.cmpi slt, %52, %290 : vector<4x1xi32>
    %cst_103 = arith.constant 0.000000e+00 : f32
    %292 = vector.shape_cast %291 : vector<4x1xi1> to vector<4x1xi1>
    %293 = vector.broadcast %292 : vector<4x1xi1> to vector<4x16xi1>
    %294 = vector.broadcast %cst_103 : f32 to vector<4x16xf32>
    %295 = arith.select %293, %289, %294 : vector<4x16xi1>, vector<4x16xf32>
    %c0_104 = arith.constant 0 : index
    %c64_105 = arith.constant 64 : index
    %296 = vector.load %arg13[%c0_104, %c64_105] : memref<4x128xf32, #tpu.memory_space<vmem>>, vector<4x16xf32>
    tpu.vector_store %arg13[%c0_104, %c64_105], %295 {strides = array<i32>} : memref<4x128xf32, #tpu.memory_space<vmem>>, vector<4x16xf32>,
    %297 = vector.shape_cast %289 : vector<4x16xf32> to vector<4x1x16xf32>
    %298 = arith.truncf %297 : vector<4x1x16xf32> to vector<4x1x16xbf16>
    "tpu.trace_start"() <{level = 10 : i32, message = "bql,blc->bqc"}> : () -> ()
    %cst_106 = arith.constant dense<0.000000e+00> : vector<4x1x32xf32>
    %299 = tpu.matmul %298, %22, %cst_106 {dimension_numbers = #tpu.dot_dimension_numbers<[2], [1], [1], [2], [0, 0, 0, 1, 1, 2], [0], [0]>} : vector<4x1x16xbf16>, vector<4x16x32xbf16>, vector<4x1x32xf32> -> vector<4x1x32xf32>
    "tpu.trace_stop"() : () -> ()
    %300 = vector.shape_cast %299 : vector<4x1x32xf32> to vector<4x32xf32>
    %301 = arith.mulf %271, %300 : vector<4x32xf32>
    %302 = vector.extract_strided_slice %51 {offsets = [12, 0], sizes = [4, 128], strides = [1, 1]} : vector<28x128xf32> to vector<4x128xf32>
    %c0_107 = arith.constant 0 : index
    %c0_108 = arith.constant 0 : index
    %303 = vector.load %arg6[%c0_107, %c0_108] : memref<32x128xf32, #tpu.memory_space<vmem>>, vector<32x128xf32>
    %cst_109 = arith.constant dense<0.000000e+00> : vector<4x128xf32>
    %304 = tpu.matmul %301, %303, %cst_109 {dimension_numbers = #tpu.dot_dimension_numbers<[1], [0], [0], [1], [0, 0, 1, 1], [], []>} : vector<4x32xf32>, vector<32x128xf32>, vector<4x128xf32> -> vector<4x128xf32>
    %305 = arith.addf %302, %304 : vector<4x128xf32>
    %306 = vector.extract_strided_slice %262 {offsets = [0, 64], sizes = [4, 128], strides = [1, 1]} : vector<4x256xf32> to vector<4x128xf32>
    %307 = arith.addf %305, %306 : vector<4x128xf32>
    %308 = vector.extract_strided_slice %307 {offsets = [0, 0], sizes = [4, 32], strides = [1, 1]} : vector<4x128xf32> to vector<4x32xf32>
    %309 = arith.negf %308 : vector<4x32xf32>
    %310 = math.exp %309 : vector<4x32xf32>
    %cst_110 = arith.constant 1.000000e+00 : f32
    %311 = vector.broadcast %cst_110 : f32 to vector<4x32xf32>
    %312 = arith.addf %311, %310 : vector<4x32xf32>
    %313 = arith.divf %311, %312 : vector<4x32xf32>
    %314 = vector.extract_strided_slice %307 {offsets = [0, 32], sizes = [4, 32], strides = [1, 1]} : vector<4x128xf32> to vector<4x32xf32>
    %315 = arith.negf %314 : vector<4x32xf32>
    %316 = math.exp %315 : vector<4x32xf32>
    %cst_111 = arith.constant 1.000000e+00 : f32
    %317 = vector.broadcast %cst_111 : f32 to vector<4x32xf32>
    %318 = arith.addf %317, %316 : vector<4x32xf32>
    %319 = arith.divf %317, %318 : vector<4x32xf32>
    %320 = vector.extract_strided_slice %307 {offsets = [0, 64], sizes = [4, 32], strides = [1, 1]} : vector<4x128xf32> to vector<4x32xf32>
    %321 = math.tanh %320 : vector<4x32xf32>
    %322 = vector.extract_strided_slice %307 {offsets = [0, 96], sizes = [4, 32], strides = [1, 1]} : vector<4x128xf32> to vector<4x32xf32>
    %323 = arith.negf %322 : vector<4x32xf32>
    %324 = math.exp %323 : vector<4x32xf32>
    %cst_112 = arith.constant 1.000000e+00 : f32
    %325 = vector.broadcast %cst_112 : f32 to vector<4x32xf32>
    %326 = arith.addf %325, %324 : vector<4x32xf32>
    %327 = arith.divf %325, %326 : vector<4x32xf32>
    %328 = arith.mulf %319, %256 : vector<4x32xf32>
    %329 = arith.mulf %313, %321 : vector<4x32xf32>
    %330 = arith.addf %328, %329 : vector<4x32xf32>
    %331 = math.tanh %330 : vector<4x32xf32>
    %332 = arith.mulf %327, %331 : vector<4x32xf32>
    %c3_i32_113 = arith.constant 3 : i32
    %333 = vector.broadcast %c3_i32_113 : i32 to vector<4x1xi32>
    %334 = arith.cmpi slt, %52, %333 : vector<4x1xi32>
    %335 = vector.shape_cast %334 : vector<4x1xi1> to vector<4x1xi1>
    %336 = vector.broadcast %335 : vector<4x1xi1> to vector<4x32xi1>
    %337 = arith.select %336, %332, %258 : vector<4x32xi1>, vector<4x32xf32>
    %338 = vector.shape_cast %334 : vector<4x1xi1> to vector<4x1xi1>
    %339 = vector.broadcast %338 : vector<4x1xi1> to vector<4x32xi1>
    %340 = arith.select %339, %330, %256 : vector<4x32xi1>, vector<4x32xf32>
    %c0_114 = arith.constant 0 : index
    %c0_115 = arith.constant 0 : index
    %341 = vector.load %arg5[%c0_114, %c0_115] : memref<32x256xf32, #tpu.memory_space<vmem>>, vector<32x256xf32>
    %cst_116 = arith.constant dense<0.000000e+00> : vector<4x256xf32>
    %342 = tpu.matmul %337, %341, %cst_116 {dimension_numbers = #tpu.dot_dimension_numbers<[1], [0], [0], [1], [0, 0, 1, 1], [], []>} : vector<4x32xf32>, vector<32x256xf32>, vector<4x256xf32> -> vector<4x256xf32>
    %343 = vector.broadcast %25 : vector<1x256xf32> to vector<4x256xf32>
    %344 = arith.addf %342, %343 : vector<4x256xf32>
    %345 = vector.extract_strided_slice %344 {offsets = [0, 192], sizes = [4, 64], strides = [1, 1]} : vector<4x256xf32> to vector<4x64xf32>
    %c3_i32_117 = arith.constant 3 : i32
    %346 = vector.broadcast %c3_i32_117 : i32 to vector<4x1xi32>
    %347 = arith.cmpi slt, %52, %346 : vector<4x1xi32>
    %cst_118 = arith.constant 0.000000e+00 : f32
    %348 = vector.shape_cast %347 : vector<4x1xi1> to vector<4x1xi1>
    %349 = vector.broadcast %348 : vector<4x1xi1> to vector<4x64xi1>
    %350 = vector.broadcast %cst_118 : f32 to vector<4x64xf32>
    %351 = arith.select %349, %345, %350 : vector<4x64xi1>, vector<4x64xf32>
    %c0_119 = arith.constant 0 : index
    %c256 = arith.constant 256 : index
    %352 = vector.load %arg12[%c0_119, %c256] : memref<4x512xf32, #tpu.memory_space<vmem>>, vector<4x64xf32>
    tpu.vector_store %arg12[%c0_119, %c256], %351 {strides = array<i32>} : memref<4x512xf32, #tpu.memory_space<vmem>>, vector<4x64xf32>,
    %353 = vector.extract_strided_slice %344 {offsets = [0, 0], sizes = [4, 32], strides = [1, 1]} : vector<4x256xf32> to vector<4x32xf32>
    %354 = vector.extract_strided_slice %344 {offsets = [0, 32], sizes = [4, 32], strides = [1, 1]} : vector<4x256xf32> to vector<4x32xf32>
    %355 = arith.negf %354 : vector<4x32xf32>
    %356 = math.exp %355 : vector<4x32xf32>
    %cst_120 = arith.constant 1.000000e+00 : f32
    %357 = vector.broadcast %cst_120 : f32 to vector<4x32xf32>
    %358 = arith.addf %357, %356 : vector<4x32xf32>
    %359 = arith.divf %357, %358 : vector<4x32xf32>
    %360 = vector.shape_cast %353 : vector<4x32xf32> to vector<4x1x32xf32>
    %361 = vector.broadcast %360 : vector<4x1x32xf32> to vector<4x16x32xf32>
    %362 = arith.addf %46, %361 : vector<4x16x32xf32>
    %cst_121 = arith.constant 0.000000e+00 : f32
    %363 = vector.broadcast %cst_121 : f32 to vector<4x16x32xf32>
    %364 = arith.maximumf %362, %363 : vector<4x16x32xf32>
    %365 = vector.broadcast %28 : vector<1x1x32xf32> to vector<4x16x32xf32>
    %366 = arith.mulf %364, %365 : vector<4x16x32xf32>
    %cst_122 = arith.constant dense<0.000000e+00> : vector<4x16xf32>
    %367 = vector.multi_reduction <add>, %366, %cst_122 [2] : vector<4x16x32xf32> to vector<4x16xf32>
    %cst_123 = arith.constant dense<0xFF800000> : vector<4xf32>
    %368 = vector.multi_reduction <maximumf>, %367, %cst_123 [1] : vector<4x16xf32> to vector<4xf32>
    %369 = vector.shape_cast %368 : vector<4xf32> to vector<4x1xf32>
    %370 = vector.broadcast %369 : vector<4x1xf32> to vector<4x16xf32>
    %371 = arith.subf %367, %370 : vector<4x16xf32>
    %372 = math.exp %371 : vector<4x16xf32>
    %cst_124 = arith.constant dense<0.000000e+00> : vector<4xf32>
    %373 = vector.multi_reduction <add>, %372, %cst_124 [1] : vector<4x16xf32> to vector<4xf32>
    %374 = vector.shape_cast %373 : vector<4xf32> to vector<4x1xf32>
    %375 = tpu.reciprocal %374 {approx = true} : vector<4x1xf32> -> vector<4x1xf32>
    %376 = vector.broadcast %375 : vector<4x1xf32> to vector<4x16xf32>
    %377 = arith.mulf %372, %376 : vector<4x16xf32>
    %c3_i32_125 = arith.constant 3 : i32
    %378 = vector.broadcast %c3_i32_125 : i32 to vector<4x1xi32>
    %379 = arith.cmpi slt, %52, %378 : vector<4x1xi32>
    %cst_126 = arith.constant 0.000000e+00 : f32
    %380 = vector.shape_cast %379 : vector<4x1xi1> to vector<4x1xi1>
    %381 = vector.broadcast %380 : vector<4x1xi1> to vector<4x16xi1>
    %382 = vector.broadcast %cst_126 : f32 to vector<4x16xf32>
    %383 = arith.select %381, %377, %382 : vector<4x16xi1>, vector<4x16xf32>
    %c0_127 = arith.constant 0 : index
    %c80 = arith.constant 80 : index
    %384 = vector.load %arg13[%c0_127, %c80] : memref<4x128xf32, #tpu.memory_space<vmem>>, vector<4x16xf32>
    tpu.vector_store %arg13[%c0_127, %c80], %383 {strides = array<i32>} : memref<4x128xf32, #tpu.memory_space<vmem>>, vector<4x16xf32>,
    %385 = vector.shape_cast %377 : vector<4x16xf32> to vector<4x1x16xf32>
    %386 = arith.truncf %385 : vector<4x1x16xf32> to vector<4x1x16xbf16>
    "tpu.trace_start"() <{level = 10 : i32, message = "bql,blc->bqc"}> : () -> ()
    %cst_128 = arith.constant dense<0.000000e+00> : vector<4x1x32xf32>
    %387 = tpu.matmul %386, %22, %cst_128 {dimension_numbers = #tpu.dot_dimension_numbers<[2], [1], [1], [2], [0, 0, 0, 1, 1, 2], [0], [0]>} : vector<4x1x16xbf16>, vector<4x16x32xbf16>, vector<4x1x32xf32> -> vector<4x1x32xf32>
    "tpu.trace_stop"() : () -> ()
    %388 = vector.shape_cast %387 : vector<4x1x32xf32> to vector<4x32xf32>
    %389 = arith.mulf %359, %388 : vector<4x32xf32>
    %390 = vector.extract_strided_slice %51 {offsets = [16, 0], sizes = [4, 128], strides = [1, 1]} : vector<28x128xf32> to vector<4x128xf32>
    %c0_129 = arith.constant 0 : index
    %c0_130 = arith.constant 0 : index
    %391 = vector.load %arg6[%c0_129, %c0_130] : memref<32x128xf32, #tpu.memory_space<vmem>>, vector<32x128xf32>
    %cst_131 = arith.constant dense<0.000000e+00> : vector<4x128xf32>
    %392 = tpu.matmul %389, %391, %cst_131 {dimension_numbers = #tpu.dot_dimension_numbers<[1], [0], [0], [1], [0, 0, 1, 1], [], []>} : vector<4x32xf32>, vector<32x128xf32>, vector<4x128xf32> -> vector<4x128xf32>
    %393 = arith.addf %390, %392 : vector<4x128xf32>
    %394 = vector.extract_strided_slice %344 {offsets = [0, 64], sizes = [4, 128], strides = [1, 1]} : vector<4x256xf32> to vector<4x128xf32>
    %395 = arith.addf %393, %394 : vector<4x128xf32>
    %396 = vector.extract_strided_slice %395 {offsets = [0, 0], sizes = [4, 32], strides = [1, 1]} : vector<4x128xf32> to vector<4x32xf32>
    %397 = arith.negf %396 : vector<4x32xf32>
    %398 = math.exp %397 : vector<4x32xf32>
    %cst_132 = arith.constant 1.000000e+00 : f32
    %399 = vector.broadcast %cst_132 : f32 to vector<4x32xf32>
    %400 = arith.addf %399, %398 : vector<4x32xf32>
    %401 = arith.divf %399, %400 : vector<4x32xf32>
    %402 = vector.extract_strided_slice %395 {offsets = [0, 32], sizes = [4, 32], strides = [1, 1]} : vector<4x128xf32> to vector<4x32xf32>
    %403 = arith.negf %402 : vector<4x32xf32>
    %404 = math.exp %403 : vector<4x32xf32>
    %cst_133 = arith.constant 1.000000e+00 : f32
    %405 = vector.broadcast %cst_133 : f32 to vector<4x32xf32>
    %406 = arith.addf %405, %404 : vector<4x32xf32>
    %407 = arith.divf %405, %406 : vector<4x32xf32>
    %408 = vector.extract_strided_slice %395 {offsets = [0, 64], sizes = [4, 32], strides = [1, 1]} : vector<4x128xf32> to vector<4x32xf32>
    %409 = math.tanh %408 : vector<4x32xf32>
    %410 = vector.extract_strided_slice %395 {offsets = [0, 96], sizes = [4, 32], strides = [1, 1]} : vector<4x128xf32> to vector<4x32xf32>
    %411 = arith.negf %410 : vector<4x32xf32>
    %412 = math.exp %411 : vector<4x32xf32>
    %cst_134 = arith.constant 1.000000e+00 : f32
    %413 = vector.broadcast %cst_134 : f32 to vector<4x32xf32>
    %414 = arith.addf %413, %412 : vector<4x32xf32>
    %415 = arith.divf %413, %414 : vector<4x32xf32>
    %416 = arith.mulf %407, %340 : vector<4x32xf32>
    %417 = arith.mulf %401, %409 : vector<4x32xf32>
    %418 = arith.addf %416, %417 : vector<4x32xf32>
    %419 = math.tanh %418 : vector<4x32xf32>
    %420 = arith.mulf %415, %419 : vector<4x32xf32>
    %c3_i32_135 = arith.constant 3 : i32
    %421 = vector.broadcast %c3_i32_135 : i32 to vector<4x1xi32>
    %422 = arith.cmpi slt, %52, %421 : vector<4x1xi32>
    %423 = vector.shape_cast %422 : vector<4x1xi1> to vector<4x1xi1>
    %424 = vector.broadcast %423 : vector<4x1xi1> to vector<4x32xi1>
    %425 = arith.select %424, %420, %337 : vector<4x32xi1>, vector<4x32xf32>
    %426 = vector.shape_cast %422 : vector<4x1xi1> to vector<4x1xi1>
    %427 = vector.broadcast %426 : vector<4x1xi1> to vector<4x32xi1>
    %428 = arith.select %427, %418, %340 : vector<4x32xi1>, vector<4x32xf32>
    %c0_136 = arith.constant 0 : index
    %c0_137 = arith.constant 0 : index
    %429 = vector.load %arg5[%c0_136, %c0_137] : memref<32x256xf32, #tpu.memory_space<vmem>>, vector<32x256xf32>
    %cst_138 = arith.constant dense<0.000000e+00> : vector<4x256xf32>
    %430 = tpu.matmul %425, %429, %cst_138 {dimension_numbers = #tpu.dot_dimension_numbers<[1], [0], [0], [1], [0, 0, 1, 1], [], []>} : vector<4x32xf32>, vector<32x256xf32>, vector<4x256xf32> -> vector<4x256xf32>
    %431 = vector.broadcast %25 : vector<1x256xf32> to vector<4x256xf32>
    %432 = arith.addf %430, %431 : vector<4x256xf32>
    %433 = vector.extract_strided_slice %432 {offsets = [0, 192], sizes = [4, 64], strides = [1, 1]} : vector<4x256xf32> to vector<4x64xf32>
    %c3_i32_139 = arith.constant 3 : i32
    %434 = vector.broadcast %c3_i32_139 : i32 to vector<4x1xi32>
    %435 = arith.cmpi slt, %52, %434 : vector<4x1xi32>
    %cst_140 = arith.constant 0.000000e+00 : f32
    %436 = vector.shape_cast %435 : vector<4x1xi1> to vector<4x1xi1>
    %437 = vector.broadcast %436 : vector<4x1xi1> to vector<4x64xi1>
    %438 = vector.broadcast %cst_140 : f32 to vector<4x64xf32>
    %439 = arith.select %437, %433, %438 : vector<4x64xi1>, vector<4x64xf32>
    %c0_141 = arith.constant 0 : index
    %c320 = arith.constant 320 : index
    %440 = vector.load %arg12[%c0_141, %c320] : memref<4x512xf32, #tpu.memory_space<vmem>>, vector<4x64xf32>
    tpu.vector_store %arg12[%c0_141, %c320], %439 {strides = array<i32>} : memref<4x512xf32, #tpu.memory_space<vmem>>, vector<4x64xf32>,
    %441 = vector.extract_strided_slice %432 {offsets = [0, 0], sizes = [4, 32], strides = [1, 1]} : vector<4x256xf32> to vector<4x32xf32>
    %442 = vector.extract_strided_slice %432 {offsets = [0, 32], sizes = [4, 32], strides = [1, 1]} : vector<4x256xf32> to vector<4x32xf32>
    %443 = arith.negf %442 : vector<4x32xf32>
    %444 = math.exp %443 : vector<4x32xf32>
    %cst_142 = arith.constant 1.000000e+00 : f32
    %445 = vector.broadcast %cst_142 : f32 to vector<4x32xf32>
    %446 = arith.addf %445, %444 : vector<4x32xf32>
    %447 = arith.divf %445, %446 : vector<4x32xf32>
    %448 = vector.shape_cast %441 : vector<4x32xf32> to vector<4x1x32xf32>
    %449 = vector.broadcast %448 : vector<4x1x32xf32> to vector<4x16x32xf32>
    %450 = arith.addf %46, %449 : vector<4x16x32xf32>
    %cst_143 = arith.constant 0.000000e+00 : f32
    %451 = vector.broadcast %cst_143 : f32 to vector<4x16x32xf32>
    %452 = arith.maximumf %450, %451 : vector<4x16x32xf32>
    %453 = vector.broadcast %28 : vector<1x1x32xf32> to vector<4x16x32xf32>
    %454 = arith.mulf %452, %453 : vector<4x16x32xf32>
    %cst_144 = arith.constant dense<0.000000e+00> : vector<4x16xf32>
    %455 = vector.multi_reduction <add>, %454, %cst_144 [2] : vector<4x16x32xf32> to vector<4x16xf32>
    %cst_145 = arith.constant dense<0xFF800000> : vector<4xf32>
    %456 = vector.multi_reduction <maximumf>, %455, %cst_145 [1] : vector<4x16xf32> to vector<4xf32>
    %457 = vector.shape_cast %456 : vector<4xf32> to vector<4x1xf32>
    %458 = vector.broadcast %457 : vector<4x1xf32> to vector<4x16xf32>
    %459 = arith.subf %455, %458 : vector<4x16xf32>
    %460 = math.exp %459 : vector<4x16xf32>
    %cst_146 = arith.constant dense<0.000000e+00> : vector<4xf32>
    %461 = vector.multi_reduction <add>, %460, %cst_146 [1] : vector<4x16xf32> to vector<4xf32>
    %462 = vector.shape_cast %461 : vector<4xf32> to vector<4x1xf32>
    %463 = tpu.reciprocal %462 {approx = true} : vector<4x1xf32> -> vector<4x1xf32>
    %464 = vector.broadcast %463 : vector<4x1xf32> to vector<4x16xf32>
    %465 = arith.mulf %460, %464 : vector<4x16xf32>
    %c2_i32 = arith.constant 2 : i32
    %466 = vector.broadcast %c2_i32 : i32 to vector<4x1xi32>
    %467 = arith.cmpi slt, %52, %466 : vector<4x1xi32>
    %cst_147 = arith.constant 0.000000e+00 : f32
    %468 = vector.shape_cast %467 : vector<4x1xi1> to vector<4x1xi1>
    %469 = vector.broadcast %468 : vector<4x1xi1> to vector<4x16xi1>
    %470 = vector.broadcast %cst_147 : f32 to vector<4x16xf32>
    %471 = arith.select %469, %465, %470 : vector<4x16xi1>, vector<4x16xf32>
    %c0_148 = arith.constant 0 : index
    %c96 = arith.constant 96 : index
    %472 = vector.load %arg13[%c0_148, %c96] : memref<4x128xf32, #tpu.memory_space<vmem>>, vector<4x16xf32>
    tpu.vector_store %arg13[%c0_148, %c96], %471 {strides = array<i32>} : memref<4x128xf32, #tpu.memory_space<vmem>>, vector<4x16xf32>,
    %473 = vector.shape_cast %465 : vector<4x16xf32> to vector<4x1x16xf32>
    %474 = arith.truncf %473 : vector<4x1x16xf32> to vector<4x1x16xbf16>
    "tpu.trace_start"() <{level = 10 : i32, message = "bql,blc->bqc"}> : () -> ()
    %cst_149 = arith.constant dense<0.000000e+00> : vector<4x1x32xf32>
    %475 = tpu.matmul %474, %22, %cst_149 {dimension_numbers = #tpu.dot_dimension_numbers<[2], [1], [1], [2], [0, 0, 0, 1, 1, 2], [0], [0]>} : vector<4x1x16xbf16>, vector<4x16x32xbf16>, vector<4x1x32xf32> -> vector<4x1x32xf32>
    "tpu.trace_stop"() : () -> ()
    %476 = vector.shape_cast %475 : vector<4x1x32xf32> to vector<4x32xf32>
    %477 = arith.mulf %447, %476 : vector<4x32xf32>
    %478 = vector.extract_strided_slice %51 {offsets = [20, 0], sizes = [4, 128], strides = [1, 1]} : vector<28x128xf32> to vector<4x128xf32>
    %c0_150 = arith.constant 0 : index
    %c0_151 = arith.constant 0 : index
    %479 = vector.load %arg6[%c0_150, %c0_151] : memref<32x128xf32, #tpu.memory_space<vmem>>, vector<32x128xf32>
    %cst_152 = arith.constant dense<0.000000e+00> : vector<4x128xf32>
    %480 = tpu.matmul %477, %479, %cst_152 {dimension_numbers = #tpu.dot_dimension_numbers<[1], [0], [0], [1], [0, 0, 1, 1], [], []>} : vector<4x32xf32>, vector<32x128xf32>, vector<4x128xf32> -> vector<4x128xf32>
    %481 = arith.addf %478, %480 : vector<4x128xf32>
    %482 = vector.extract_strided_slice %432 {offsets = [0, 64], sizes = [4, 128], strides = [1, 1]} : vector<4x256xf32> to vector<4x128xf32>
    %483 = arith.addf %481, %482 : vector<4x128xf32>
    %484 = vector.extract_strided_slice %483 {offsets = [0, 0], sizes = [4, 32], strides = [1, 1]} : vector<4x128xf32> to vector<4x32xf32>
    %485 = arith.negf %484 : vector<4x32xf32>
    %486 = math.exp %485 : vector<4x32xf32>
    %cst_153 = arith.constant 1.000000e+00 : f32
    %487 = vector.broadcast %cst_153 : f32 to vector<4x32xf32>
    %488 = arith.addf %487, %486 : vector<4x32xf32>
    %489 = arith.divf %487, %488 : vector<4x32xf32>
    %490 = vector.extract_strided_slice %483 {offsets = [0, 32], sizes = [4, 32], strides = [1, 1]} : vector<4x128xf32> to vector<4x32xf32>
    %491 = arith.negf %490 : vector<4x32xf32>
    %492 = math.exp %491 : vector<4x32xf32>
    %cst_154 = arith.constant 1.000000e+00 : f32
    %493 = vector.broadcast %cst_154 : f32 to vector<4x32xf32>
    %494 = arith.addf %493, %492 : vector<4x32xf32>
    %495 = arith.divf %493, %494 : vector<4x32xf32>
    %496 = vector.extract_strided_slice %483 {offsets = [0, 64], sizes = [4, 32], strides = [1, 1]} : vector<4x128xf32> to vector<4x32xf32>
    %497 = math.tanh %496 : vector<4x32xf32>
    %498 = vector.extract_strided_slice %483 {offsets = [0, 96], sizes = [4, 32], strides = [1, 1]} : vector<4x128xf32> to vector<4x32xf32>
    %499 = arith.negf %498 : vector<4x32xf32>
    %500 = math.exp %499 : vector<4x32xf32>
    %cst_155 = arith.constant 1.000000e+00 : f32
    %501 = vector.broadcast %cst_155 : f32 to vector<4x32xf32>
    %502 = arith.addf %501, %500 : vector<4x32xf32>
    %503 = arith.divf %501, %502 : vector<4x32xf32>
    %504 = arith.mulf %495, %428 : vector<4x32xf32>
    %505 = arith.mulf %489, %497 : vector<4x32xf32>
    %506 = arith.addf %504, %505 : vector<4x32xf32>
    %507 = math.tanh %506 : vector<4x32xf32>
    %508 = arith.mulf %503, %507 : vector<4x32xf32>
    %c2_i32_156 = arith.constant 2 : i32
    %509 = vector.broadcast %c2_i32_156 : i32 to vector<4x1xi32>
    %510 = arith.cmpi slt, %52, %509 : vector<4x1xi32>
    %511 = vector.shape_cast %510 : vector<4x1xi1> to vector<4x1xi1>
    %512 = vector.broadcast %511 : vector<4x1xi1> to vector<4x32xi1>
    %513 = arith.select %512, %508, %425 : vector<4x32xi1>, vector<4x32xf32>
    %514 = vector.shape_cast %510 : vector<4x1xi1> to vector<4x1xi1>
    %515 = vector.broadcast %514 : vector<4x1xi1> to vector<4x32xi1>
    %516 = arith.select %515, %506, %428 : vector<4x32xi1>, vector<4x32xf32>
    %c0_157 = arith.constant 0 : index
    %c0_158 = arith.constant 0 : index
    %517 = vector.load %arg5[%c0_157, %c0_158] : memref<32x256xf32, #tpu.memory_space<vmem>>, vector<32x256xf32>
    %cst_159 = arith.constant dense<0.000000e+00> : vector<4x256xf32>
    %518 = tpu.matmul %513, %517, %cst_159 {dimension_numbers = #tpu.dot_dimension_numbers<[1], [0], [0], [1], [0, 0, 1, 1], [], []>} : vector<4x32xf32>, vector<32x256xf32>, vector<4x256xf32> -> vector<4x256xf32>
    %519 = vector.broadcast %25 : vector<1x256xf32> to vector<4x256xf32>
    %520 = arith.addf %518, %519 : vector<4x256xf32>
    %521 = vector.extract_strided_slice %520 {offsets = [0, 192], sizes = [4, 64], strides = [1, 1]} : vector<4x256xf32> to vector<4x64xf32>
    %c2_i32_160 = arith.constant 2 : i32
    %522 = vector.broadcast %c2_i32_160 : i32 to vector<4x1xi32>
    %523 = arith.cmpi slt, %52, %522 : vector<4x1xi32>
    %cst_161 = arith.constant 0.000000e+00 : f32
    %524 = vector.shape_cast %523 : vector<4x1xi1> to vector<4x1xi1>
    %525 = vector.broadcast %524 : vector<4x1xi1> to vector<4x64xi1>
    %526 = vector.broadcast %cst_161 : f32 to vector<4x64xf32>
    %527 = arith.select %525, %521, %526 : vector<4x64xi1>, vector<4x64xf32>
    %c0_162 = arith.constant 0 : index
    %c384 = arith.constant 384 : index
    %528 = vector.load %arg12[%c0_162, %c384] : memref<4x512xf32, #tpu.memory_space<vmem>>, vector<4x64xf32>
    tpu.vector_store %arg12[%c0_162, %c384], %527 {strides = array<i32>} : memref<4x512xf32, #tpu.memory_space<vmem>>, vector<4x64xf32>,
    %529 = vector.extract_strided_slice %520 {offsets = [0, 0], sizes = [4, 32], strides = [1, 1]} : vector<4x256xf32> to vector<4x32xf32>
    %530 = vector.extract_strided_slice %520 {offsets = [0, 32], sizes = [4, 32], strides = [1, 1]} : vector<4x256xf32> to vector<4x32xf32>
    %531 = arith.negf %530 : vector<4x32xf32>
    %532 = math.exp %531 : vector<4x32xf32>
    %cst_163 = arith.constant 1.000000e+00 : f32
    %533 = vector.broadcast %cst_163 : f32 to vector<4x32xf32>
    %534 = arith.addf %533, %532 : vector<4x32xf32>
    %535 = arith.divf %533, %534 : vector<4x32xf32>
    %536 = vector.shape_cast %529 : vector<4x32xf32> to vector<4x1x32xf32>
    %537 = vector.broadcast %536 : vector<4x1x32xf32> to vector<4x16x32xf32>
    %538 = arith.addf %46, %537 : vector<4x16x32xf32>
    %cst_164 = arith.constant 0.000000e+00 : f32
    %539 = vector.broadcast %cst_164 : f32 to vector<4x16x32xf32>
    %540 = arith.maximumf %538, %539 : vector<4x16x32xf32>
    %541 = vector.broadcast %28 : vector<1x1x32xf32> to vector<4x16x32xf32>
    %542 = arith.mulf %540, %541 : vector<4x16x32xf32>
    %cst_165 = arith.constant dense<0.000000e+00> : vector<4x16xf32>
    %543 = vector.multi_reduction <add>, %542, %cst_165 [2] : vector<4x16x32xf32> to vector<4x16xf32>
    %cst_166 = arith.constant dense<0xFF800000> : vector<4xf32>
    %544 = vector.multi_reduction <maximumf>, %543, %cst_166 [1] : vector<4x16xf32> to vector<4xf32>
    %545 = vector.shape_cast %544 : vector<4xf32> to vector<4x1xf32>
    %546 = vector.broadcast %545 : vector<4x1xf32> to vector<4x16xf32>
    %547 = arith.subf %543, %546 : vector<4x16xf32>
    %548 = math.exp %547 : vector<4x16xf32>
    %cst_167 = arith.constant dense<0.000000e+00> : vector<4xf32>
    %549 = vector.multi_reduction <add>, %548, %cst_167 [1] : vector<4x16xf32> to vector<4xf32>
    %550 = vector.shape_cast %549 : vector<4xf32> to vector<4x1xf32>
    %551 = tpu.reciprocal %550 {approx = true} : vector<4x1xf32> -> vector<4x1xf32>
    %552 = vector.broadcast %551 : vector<4x1xf32> to vector<4x16xf32>
    %553 = arith.mulf %548, %552 : vector<4x16xf32>
    %c2_i32_168 = arith.constant 2 : i32
    %554 = vector.broadcast %c2_i32_168 : i32 to vector<4x1xi32>
    %555 = arith.cmpi slt, %52, %554 : vector<4x1xi32>
    %cst_169 = arith.constant 0.000000e+00 : f32
    %556 = vector.shape_cast %555 : vector<4x1xi1> to vector<4x1xi1>
    %557 = vector.broadcast %556 : vector<4x1xi1> to vector<4x16xi1>
    %558 = vector.broadcast %cst_169 : f32 to vector<4x16xf32>
    %559 = arith.select %557, %553, %558 : vector<4x16xi1>, vector<4x16xf32>
    %c0_170 = arith.constant 0 : index
    %c112 = arith.constant 112 : index
    %560 = vector.load %arg13[%c0_170, %c112] : memref<4x128xf32, #tpu.memory_space<vmem>>, vector<4x16xf32>
    tpu.vector_store %arg13[%c0_170, %c112], %559 {strides = array<i32>} : memref<4x128xf32, #tpu.memory_space<vmem>>, vector<4x16xf32>,
    %561 = vector.shape_cast %553 : vector<4x16xf32> to vector<4x1x16xf32>
    %562 = arith.truncf %561 : vector<4x1x16xf32> to vector<4x1x16xbf16>
    "tpu.trace_start"() <{level = 10 : i32, message = "bql,blc->bqc"}> : () -> ()
    %cst_171 = arith.constant dense<0.000000e+00> : vector<4x1x32xf32>
    %563 = tpu.matmul %562, %22, %cst_171 {dimension_numbers = #tpu.dot_dimension_numbers<[2], [1], [1], [2], [0, 0, 0, 1, 1, 2], [0], [0]>} : vector<4x1x16xbf16>, vector<4x16x32xbf16>, vector<4x1x32xf32> -> vector<4x1x32xf32>
    "tpu.trace_stop"() : () -> ()
    %564 = vector.shape_cast %563 : vector<4x1x32xf32> to vector<4x32xf32>
    %565 = arith.mulf %535, %564 : vector<4x32xf32>
    %566 = vector.extract_strided_slice %51 {offsets = [24, 0], sizes = [4, 128], strides = [1, 1]} : vector<28x128xf32> to vector<4x128xf32>
    %c0_172 = arith.constant 0 : index
    %c0_173 = arith.constant 0 : index
    %567 = vector.load %arg6[%c0_172, %c0_173] : memref<32x128xf32, #tpu.memory_space<vmem>>, vector<32x128xf32>
    %cst_174 = arith.constant dense<0.000000e+00> : vector<4x128xf32>
    %568 = tpu.matmul %565, %567, %cst_174 {dimension_numbers = #tpu.dot_dimension_numbers<[1], [0], [0], [1], [0, 0, 1, 1], [], []>} : vector<4x32xf32>, vector<32x128xf32>, vector<4x128xf32> -> vector<4x128xf32>
    %569 = arith.addf %566, %568 : vector<4x128xf32>
    %570 = vector.extract_strided_slice %520 {offsets = [0, 64], sizes = [4, 128], strides = [1, 1]} : vector<4x256xf32> to vector<4x128xf32>
    %571 = arith.addf %569, %570 : vector<4x128xf32>
    %572 = vector.extract_strided_slice %571 {offsets = [0, 0], sizes = [4, 32], strides = [1, 1]} : vector<4x128xf32> to vector<4x32xf32>
    %573 = arith.negf %572 : vector<4x32xf32>
    %574 = math.exp %573 : vector<4x32xf32>
    %cst_175 = arith.constant 1.000000e+00 : f32
    %575 = vector.broadcast %cst_175 : f32 to vector<4x32xf32>
    %576 = arith.addf %575, %574 : vector<4x32xf32>
    %577 = arith.divf %575, %576 : vector<4x32xf32>
    %578 = vector.extract_strided_slice %571 {offsets = [0, 32], sizes = [4, 32], strides = [1, 1]} : vector<4x128xf32> to vector<4x32xf32>
    %579 = arith.negf %578 : vector<4x32xf32>
    %580 = math.exp %579 : vector<4x32xf32>
    %cst_176 = arith.constant 1.000000e+00 : f32
    %581 = vector.broadcast %cst_176 : f32 to vector<4x32xf32>
    %582 = arith.addf %581, %580 : vector<4x32xf32>
    %583 = arith.divf %581, %582 : vector<4x32xf32>
    %584 = vector.extract_strided_slice %571 {offsets = [0, 64], sizes = [4, 32], strides = [1, 1]} : vector<4x128xf32> to vector<4x32xf32>
    %585 = math.tanh %584 : vector<4x32xf32>
    %586 = vector.extract_strided_slice %571 {offsets = [0, 96], sizes = [4, 32], strides = [1, 1]} : vector<4x128xf32> to vector<4x32xf32>
    %587 = arith.negf %586 : vector<4x32xf32>
    %588 = math.exp %587 : vector<4x32xf32>
    %cst_177 = arith.constant 1.000000e+00 : f32
    %589 = vector.broadcast %cst_177 : f32 to vector<4x32xf32>
    %590 = arith.addf %589, %588 : vector<4x32xf32>
    %591 = arith.divf %589, %590 : vector<4x32xf32>
    %592 = arith.mulf %583, %516 : vector<4x32xf32>
    %593 = arith.mulf %577, %585 : vector<4x32xf32>
    %594 = arith.addf %592, %593 : vector<4x32xf32>
    %595 = math.tanh %594 : vector<4x32xf32>
    %596 = arith.mulf %591, %595 : vector<4x32xf32>
    %c2_i32_178 = arith.constant 2 : i32
    %597 = vector.broadcast %c2_i32_178 : i32 to vector<4x1xi32>
    %598 = arith.cmpi slt, %52, %597 : vector<4x1xi32>
    %599 = vector.shape_cast %598 : vector<4x1xi1> to vector<4x1xi1>
    %600 = vector.broadcast %599 : vector<4x1xi1> to vector<4x32xi1>
    %601 = arith.select %600, %596, %513 : vector<4x32xi1>, vector<4x32xf32>
    %c0_179 = arith.constant 0 : index
    %c0_180 = arith.constant 0 : index
    %602 = vector.load %arg5[%c0_179, %c0_180] : memref<32x256xf32, #tpu.memory_space<vmem>>, vector<32x256xf32>
    %cst_181 = arith.constant dense<0.000000e+00> : vector<4x256xf32>
    %603 = tpu.matmul %601, %602, %cst_181 {dimension_numbers = #tpu.dot_dimension_numbers<[1], [0], [0], [1], [0, 0, 1, 1], [], []>} : vector<4x32xf32>, vector<32x256xf32>, vector<4x256xf32> -> vector<4x256xf32>
    %604 = vector.broadcast %25 : vector<1x256xf32> to vector<4x256xf32>
    %605 = arith.addf %603, %604 : vector<4x256xf32>
    %606 = vector.extract_strided_slice %605 {offsets = [0, 192], sizes = [4, 64], strides = [1, 1]} : vector<4x256xf32> to vector<4x64xf32>
    %c2_i32_182 = arith.constant 2 : i32
    %607 = vector.broadcast %c2_i32_182 : i32 to vector<4x1xi32>
    %608 = arith.cmpi slt, %52, %607 : vector<4x1xi32>
    %cst_183 = arith.constant 0.000000e+00 : f32
    %609 = vector.shape_cast %608 : vector<4x1xi1> to vector<4x1xi1>
    %610 = vector.broadcast %609 : vector<4x1xi1> to vector<4x64xi1>
    %611 = vector.broadcast %cst_183 : f32 to vector<4x64xf32>
    %612 = arith.select %610, %606, %611 : vector<4x64xi1>, vector<4x64xf32>
    %c0_184 = arith.constant 0 : index
    %c448 = arith.constant 448 : index
    %613 = vector.load %arg12[%c0_184, %c448] : memref<4x512xf32, #tpu.memory_space<vmem>>, vector<4x64xf32>
    tpu.vector_store %arg12[%c0_184, %c448], %612 {strides = array<i32>} : memref<4x512xf32, #tpu.memory_space<vmem>>, vector<4x64xf32>,
    return
  }
}

</mosaic_0001>

<bundles_post_ra>
// kernel: tpu_custom_call.1
= control target key start
LH: loop header
LB: loop body
LE: loop exit
PB: predicated region body
PF: predicated region fallthrough
CT: control target
= control target key end

     0   :  { %20 = vsyncpa [#allocation3], 0  ;;  %s9678_s0 = inlined_call_operand.vmem [shape: bf16[4,16,32], index: 0, kind: input, shape index: {}]   ;;  %s9679_s1 = inlined_call_operand.hbm [shape: bf16[28,32], index: 1, kind: input, shape index: {}]   ;;  %s9680_s2 = inlined_call_operand.hbm [shape: f32[4,64], index: 2, kind: input, shape index: {}]   ;;  %s9681_s3 = inlined_call_operand.vmem [shape: bf16[32,64], index: 3, kind: input, shape index: {}]   ;;  %s9682_s4 = inlined_call_operand.hbm [shape: bf16[32,32], index: 4, kind: input, shape index: {}]   ;;  %s9683_s5 = inlined_call_operand.hbm [shape: f32[32,256], index: 5, kind: input, shape index: {}]   ;;  %s9684_s6 = inlined_call_operand.hbm [shape: f32[32,128], index: 6, kind: input, shape index: {}]   ;;  %s9685_s7 = inlined_call_operand.hbm [shape: bf16[32,128], index: 7, kind: input, shape index: {}]   ;;  %s9686_s8 = inlined_call_operand.hbm [shape: f32[8,256], index: 8, kind: input, shape index: {}]   ;;  %s9687_s9 = inlined_call_operand.vmem [shape: bf16[4,48], index: 9, kind: input, shape index: {}]   ;;  %s9688_s10 = inlined_call_operand.vmem [shape: bf16[48,32], index: 10, kind: input, shape index: {}]   ;;  %s9689_s11 = inlined_call_operand.vmem [shape: f32[4,32], index: 11, kind: input, shape index: {}]   ;;  %s9690_s12 = inlined_call_operand.hbm [shape: f32[4,512], index: 12, kind: output, shape index: {0}]   ;;  %s9691_s13 = inlined_call_operand.hbm [shape: f32[4,128], index: 13, kind: output, shape index: {1}]   ;;  %s9692_s14 = inlined_call_operand.hbm [shape: f32[4,32], index: 14, kind: output, shape index: {2}]  }
   0x1   :  { %21 = vsyncpa [#allocation6], 0 }
   0x2   :  { %22 = vsyncpa [#allocation9], 0 }
   0x3   :  { %23 = vsyncpa [#allocation12], 0 }
   0x4   :  { %24 = vsyncpa [#allocation4], 0 }
   0x5   :  { %25 = vsyncpa [#allocation16], 0  ;;  %s7786_s29 = smov [#allocation5]   ;;  %s7787_s15 = smov [#allocation8]  }
   0x6   :  { %s46_s30 = sshll.u32 %s7786_s29, 4  ;;  %s69_s16 = sshll.u32 %s7787_s15, 4  ;;  %s47_s30 = int_to_ptr.vmem [resolvable:$true] %s46_s30  ;;  %s7886_s16 = int_to_ptr.vmem [resolvable:$true] %s69_s16 }
   0x7   :  { %s7554_s19 = scalar_lea.hbm %s9680_s2, 64 }
   0x8   :  { %p7555_p0 = scmp.ne.s32.totalorder %s9680_s2, %s7554_s19  ;;  %p7558_p1 = scmp.lt.u32.totalorder %s7554_s19, %s9680_s2 }
   0xa   :  { %p7560_p2 = pnand %p7558_p1, %p7555_p0 }
   0xc   :  { %7563 = shalt.err (!%p7560_p2)
}
   0xd   :  { %s7564_s24 = scalar_lea.vmem %s47_s30, 64  ;;  %p7569_p4 = scmp.lt.s32.totalorder %s47_s30, %s47_s30 }
   0xe   :  { %p7565_p3 = scmp.ne.s32.totalorder %s47_s30, %s7564_s24  ;;  %p7570_p5 = scmp.lt.s32.totalorder %s7564_s24, %s7564_s24 }
  0x10   :  { %p7571_p6 = por %p7570_p5, %p7569_p4 }
  0x12   :  { %p7572_p7 = pnand %p7571_p6, %p7565_p3 }
  0x14   :  { %7575 = shalt.err (!%p7572_p7)
}
  0x15   :  { %49 = dma.hbm_to_vmem [thread:$0]  %s9680_s2, 64, %s47_s30, [#allocation6]  }
  0x16   :  { %s7576_s29 = scalar_lea.hbm %s9683_s5, 1024 }
  0x17   :  { %p7577_p8 = scmp.ne.s32.totalorder %s9683_s5, %s7576_s29  ;;  %p7580_p9 = scmp.lt.u32.totalorder %s7576_s29, %s9683_s5 }
  0x19   :  { %p7582_p10 = pnand %p7580_p9, %p7577_p8 }
  0x1b   :  { %7585 = shalt.err (!%p7582_p10)
}
  0x1c   :  { %s7586_s20 = scalar_lea.vmem %s7886_s16, 1024  ;;  %p7591_p12 = scmp.lt.s32.totalorder %s7886_s16, %s7886_s16 }
  0x1d   :  { %p7587_p11 = scmp.ne.s32.totalorder %s7886_s16, %s7586_s20  ;;  %p7592_p13 = scmp.lt.s32.totalorder %s7586_s20, %s7586_s20 }
  0x1f   :  { %p7593_p0 = por %p7592_p13, %p7591_p12 }
  0x21   :  { %p7594_p1 = pnand %p7593_p0, %p7587_p11 }
  0x23   :  { %7597 = shalt.err (!%p7594_p1)
}
  0x24   :  { %s7788_s2 = smov 256   ;;  %s7789_s30 = smov 16  }
  0x25   :  { %75 = dma.hbm_to_vmem [thread:$0]  %s9683_s5, 1024, %s7886_s16, [#allocation9], %s7788_s2, %s7788_s2, %s7789_s30  }
  0x26   :  { %s7790_s23 = smov [#allocation11]   ;;  %s7791_s25 = smov [#allocation2]  }
  0x27   :  { %s93_s24 = sshll.u32 %s7790_s23, 4  ;;  %s33_s26 = sshll.u32 %s7791_s25, 4  ;;  %s94_s24 = int_to_ptr.vmem [resolvable:$true] %s93_s24  ;;  %s7917_s26 = int_to_ptr.vmem [resolvable:$true] %s33_s26 }
  0x28   :  { %s7598_s29 = scalar_lea.hbm %s9685_s7, 256 }
  0x29   :  { %p7599_p2 = scmp.ne.s32.totalorder %s9685_s7, %s7598_s29  ;;  %p7602_p3 = scmp.lt.u32.totalorder %s7598_s29, %s9685_s7 }
  0x2b   :  { %p7604_p4 = pnand %p7602_p3, %p7599_p2 }
  0x2d   :  { %7607 = shalt.err (!%p7604_p4)
}
  0x2e   :  { %s7608_s5 = scalar_lea.vmem %s94_s24, 256  ;;  %p7613_p6 = scmp.lt.s32.totalorder %s94_s24, %s94_s24 }
  0x2f   :  { %p7609_p5 = scmp.ne.s32.totalorder %s94_s24, %s7608_s5  ;;  %p7614_p7 = scmp.lt.s32.totalorder %s7608_s5, %s7608_s5 }
  0x31   :  { %p7615_p8 = por %p7614_p7, %p7613_p6 }
  0x33   :  { %p7616_p9 = pnand %p7615_p8, %p7609_p5 }
  0x35   :  { %7619 = shalt.err (!%p7616_p9)
}
  0x36   :  { %s7792_s16 = smov 64   ;;  %s7793_s20 = smov 4  }
  0x37   :  { %99 = dma.hbm_to_vmem [thread:$0]  %s9685_s7, 256, %s94_s24, [#allocation12], %s7792_s16, %s7792_s16, %s7793_s20  }
  0x38   :  { %s7620_s23 = scalar_lea.hbm %s9679_s1, 256 }
  0x39   :  { %p7621_p10 = scmp.ne.s32.totalorder %s9679_s1, %s7620_s23  ;;  %p7624_p11 = scmp.lt.u32.totalorder %s7620_s23, %s9679_s1 }
  0x3b   :  { %p7626_p12 = pnand %p7624_p11, %p7621_p10 }
  0x3d   :  { %7629 = shalt.err (!%p7626_p12)
}
  0x3e   :  { %s7630_s15 = scalar_lea.vmem %s7917_s26, 256  ;;  %p7635_p0 = scmp.lt.s32.totalorder %s7917_s26, %s7917_s26 }
  0x3f   :  { %p7631_p13 = scmp.ne.s32.totalorder %s7917_s26, %s7630_s15  ;;  %p7636_p1 = scmp.lt.s32.totalorder %s7630_s15, %s7630_s15 }
  0x41   :  { %p7637_p2 = por %p7636_p1, %p7635_p0 }
  0x43   :  { %p7638_p3 = pnand %p7637_p2, %p7631_p13 }
  0x45   :  { %7641 = shalt.err (!%p7638_p3)
}
  0x46   :  { %39 = dma.hbm_to_vmem [thread:$0]  %s9679_s1, 256, %s7917_s26, [#allocation3], %s7792_s16, %s7792_s16, %s7793_s20  }
  0x47   :  { %s7794_s17 = smov [#allocation7]   ;;  %s7795_s19 = smov [#allocation10]  }
  0x48   :  { %s57_s18 = sshll.u32 %s7794_s17, 4  ;;  %s81_s5 = sshll.u32 %s7795_s19, 4  ;;  %s58_s18 = int_to_ptr.vmem [resolvable:$true] %s57_s18  ;;  %s7954_s5 = int_to_ptr.vmem [resolvable:$true] %s81_s5 }
  0x49   :  { %s7642_s21 = scalar_lea.hbm %s9682_s4, 256 }
  0x4a   :  { %p7643_p4 = scmp.ne.s32.totalorder %s9682_s4, %s7642_s21  ;;  %p7646_p5 = scmp.lt.u32.totalorder %s7642_s21, %s9682_s4 }
  0x4c   :  { %p7648_p6 = pnand %p7646_p5, %p7643_p4 }
  0x4e   :  { %7651 = shalt.err (!%p7648_p6)
}
  0x4f   :  { %s7652_s1 = scalar_lea.vmem %s58_s18, 256  ;;  %p7657_p8 = scmp.lt.s32.totalorder %s58_s18, %s58_s18 }
  0x50   :  { %p7653_p7 = scmp.ne.s32.totalorder %s58_s18, %s7652_s1  ;;  %p7658_p9 = scmp.lt.s32.totalorder %s7652_s1, %s7652_s1 }
  0x52   :  { %p7659_p10 = por %p7658_p9, %p7657_p8 }
  0x54   :  { %p7660_p11 = pnand %p7659_p10, %p7653_p7 }
  0x56   :  { %7663 = shalt.err (!%p7660_p11)
}
  0x57   :  { %63 = dma.hbm_to_vmem [thread:$0]  %s9682_s4, 256, %s58_s18, [#allocation6], %s7792_s16, %s7792_s16, %s7793_s20  }
  0x58   :  { %s7664_s7 = scalar_lea.hbm %s9684_s6, 512 }
  0x59   :  { %p7665_p12 = scmp.ne.s32.totalorder %s9684_s6, %s7664_s7  ;;  %p7668_p13 = scmp.lt.u32.totalorder %s7664_s7, %s9684_s6 }
  0x5b   :  { %p7670_p0 = pnand %p7668_p13, %p7665_p12 }
  0x5d   :  { %7673 = shalt.err (!%p7670_p0)
}
  0x5e   :  { %s7674_s30 = scalar_lea.vmem %s7954_s5, 512  ;;  %p7679_p2 = scmp.lt.s32.totalorder %s7954_s5, %s7954_s5 }
  0x5f   :  { %p7675_p1 = scmp.ne.s32.totalorder %s7954_s5, %s7674_s30  ;;  %p7680_p3 = scmp.lt.s32.totalorder %s7674_s30, %s7674_s30 }
  0x61   :  { %p7681_p4 = por %p7680_p3, %p7679_p2 }
  0x63   :  { %p7682_p5 = pnand %p7681_p4, %p7675_p1 }
  0x65   :  { %7685 = shalt.err (!%p7682_p5)
}
  0x66   :  { %s7796_s4 = smov 128   ;;  %s7797_s20 = smov 8  }
  0x67   :  { %87 = dma.hbm_to_vmem [thread:$0]  %s9684_s6, 512, %s7954_s5, [#allocation9], %s7796_s4, %s7796_s4, %s7797_s20  }
  0x68   :  { %s7798_s22 = smov [#allocation13]   ;;  %s7686_s1 = scalar_lea.hbm %s9686_s8, 256 }
  0x69   :  { %s106_s23 = sshll.u32 %s7798_s22, 4  ;;  %p7687_p6 = scmp.ne.s32.totalorder %s9686_s8, %s7686_s1  ;;  %s107_s23 = int_to_ptr.vmem [resolvable:$true] %s106_s23 }
  0x6a   :  { %p7690_p7 = scmp.lt.u32.totalorder %s7686_s1, %s9686_s8 }
  0x6c   :  { %p7692_p8 = pnand %p7690_p7, %p7687_p6 }
  0x6e   :  { %7695 = shalt.err (!%p7692_p8)
}
  0x6f   :  { %s7696_s7 = scalar_lea.vmem %s107_s23, 256  ;;  %p7701_p10 = scmp.lt.s32.totalorder %s107_s23, %s107_s23 }
  0x70   :  { %p7697_p9 = scmp.ne.s32.totalorder %s107_s23, %s7696_s7  ;;  %p7702_p11 = scmp.lt.s32.totalorder %s7696_s7, %s7696_s7 }
  0x72   :  { %p7703_p12 = por %p7702_p11, %p7701_p10 }
  0x74   :  { %p7704_p13 = pnand %p7703_p12, %p7697_p9 }
  0x76   :  { %7707 = shalt.err (!%p7704_p13)
}
  0x77   :  { %109 = dma.hbm_to_vmem [thread:$0]  %s9686_s8, 256, %s107_s23, [#allocation12]  }
  0x78   :  { %7774 = dma.done.wait [#allocation3], 256  }
  0x79   :  { %7775 = vsyncadd [#allocation3], 4294967040 }
  0x7a   :  { %7776 = dma.done.wait [#allocation6], 320  }
  0x7b   :  { %7777 = vsyncadd [#allocation6], 4294966976 }
  0x7c   :  { %7778 = dma.done.wait [#allocation9], 1536  }
  0x7d   :  { %7779 = vsyncadd [#allocation9], 4294965760 }
  0x7e   :  { %7780 = dma.done.wait [#allocation12], 512  }
  0x7f   :  { %7781 = vsyncadd [#allocation12], 4294966784  ;;  %v9695_v0 = vmov 0.0   ;;  %vm7800_vm0 = vmmov 0   ;;  %v7320_v1 = vld [vmem:[%s9681_s3] sm:$0xff]   ;;  %v7321_v2 = vld [vmem:[%s9681_s3 + $0x8] sm:$0xff]  }
  0x80   :  { %6914 = vmatprep.subr.bf16.mxu1 %v9695_v0  ;;  %6918 = vmatprep.mubr.msk.bf16.mxu1 %vm7800_vm0, %v9695_v0  ;;  %v8015_v3 = vld [vmem:[%s9678_s0] sm:$0xff]   ;;  %v8020_v4 = vld [vmem:[%s9678_s0 + $0x8] sm:$0xff]   ;;  %v8025_v5 = vld [vmem:[%s9678_s0 + $0x10] sm:$0xff]   ;;  %vm258_vm1 = vcmask 261120   ;;  %vm164_vm2 = vcmask 392192   ;;  %vm316_vm3 = vcmask 1041409  }
  0x81   :  { %6904 = vmatprep.subr.bf16.mxu0 %v9695_v0  ;;  %6910 = vmatprep.mubr.msk.bf16.mxu0 %vm7800_vm0, %v9695_v0  ;;  %v8031_v6 = vld [vmem:[%s9678_s0 + $0x18] sm:$0xff]   ;;  %v250_v7 = vunpack.c.l.bf16 %v8015_v3  ;;  %v251_v8 = vunpack.c.h.bf16 %v8015_v3  ;;  %v252_v9 = vunpack.c.l.bf16 %v8020_v4  ;;  %v253_v10 = vunpack.c.h.bf16 %v8020_v4  ;;  %v7326_v15 = vld [vmem:[%s9688_s10] sm:$0xff]   ;;  %v7327_v20 = vld [vmem:[%s9688_s10 + $0x8] sm:$0xff]   ;;  %s7805_s17 = smov 96   ;;  %s7806_s19 = smov 80  }
  0x82   :  { %6915 = vmatpush3.bf16.msra.mxu1 %v7320_v1  ;;  %v254_v11 = vunpack.c.l.bf16 %v8025_v5  ;;  %v255_v12 = vunpack.c.h.bf16 %v8025_v5  ;;  %v256_v13 = vunpack.c.l.bf16 %v8031_v6  ;;  %v257_v14 = vunpack.c.h.bf16 %v8031_v6  ;;  %6905 = vmatpush3.bf16.msra.mxu0 %v7326_v15  ;;  %v7328_v31 = vld [vmem:[%s9688_s10 + $0x10] sm:$0xff]   ;;  %v7329_v33 = vld [vmem:[#allocation11] sm:$0xff]   ;;  %v139_v43 = vld [vmem:[%s9687_s9] sm:$0x3]  ;;  %s7807_s2 = smov 112   ;;  %s7809_s4 = smov [#allocation15]  }
  0x83   :  { %6916 = vmatprep.subr.bf16.mxu1 %v9695_v0  ;;  %v259_v16 = vsel %vm258_vm1, %v250_v7, 0.0  ;;  %v260_v17 = vsel %vm258_vm1, %v251_v8, 0.0  ;;  %v268_v18 = vsel %vm258_vm1, %v252_v9, 0.0  ;;  %v269_v19 = vsel %vm258_vm1, %v253_v10, 0.0  ;;  %6906 = vmatprep.subr.bf16.mxu0 %v9695_v0  ;;  %v8059_v37 = vld [vmem:[#allocation7] sm:$0xff]   ;;  %v7331_v47 = vld [vmem:[#allocation2] sm:$0xff]  }
  0x84   :  { %v261_v21 = vadd.f32 %v260_v17, %v259_v16  ;;  %v270_v22 = vadd.f32 %v269_v19, %v268_v18  ;;  %v277_v23 = vsel %vm258_vm1, %v254_v11, 0.0  ;;  %v278_v24 = vsel %vm258_vm1, %v255_v12, 0.0  ;;  %v7330_v49 = vld [vmem:[#allocation11 + $0x8] sm:$0xff]   ;;  %v594_v54 = vld [vmem:[#allocation8 + $0x18] sm:$0xff]  ;;  %v591_v61 = vld [vmem:[#allocation8] sm:$0xff]  ;;  %s6684_s20 = sshll.u32 %s7809_s4, 4  ;;  %s9634_s20 = int_to_ptr.vmem [resolvable:$true] %s6684_s20 }
  0x85   :  { %v279_v25 = vadd.f32 %v278_v24, %v277_v23  ;;  %v286_v26 = vsel %vm258_vm1, %v256_v13, 0.0  ;;  %v287_v27 = vsel %vm258_vm1, %v257_v14, 0.0  ;;  %v592_v53 = vld [vmem:[#allocation8 + $0x8] sm:$0xff]  ;;  %v593_v62 = vld [vmem:[#allocation8 + $0x10] sm:$0xff]  ;;  %v598_v8 = vld [vmem:[#allocation8 + $0x38] sm:$0xff]  ;;  %vm318_vm4 = vcmask 1042434  }
  0x86   :  { %6917 = vmatpush3.bf16.msra.mxu1 %v7321_v2  ;;  %v262_v28 = vrot.slane %v261_v21, 4  ;;  %v271_v29 = vrot.slane %v270_v22, 4  ;;  %v288_v30 = vadd.f32 %v287_v27, %v286_v26  ;;  %6907 = vmatpush3.bf16.msra.mxu0 %v7327_v20  ;;  %v8067_v60 = vpack.c.bf16 %v594_v54, %v592_v53  ;;  %v596_v7 = vld [vmem:[#allocation8 + $0x28] sm:$0xff]  ;;  %v595_v17 = vld [vmem:[#allocation8 + $0x20] sm:$0xff]  ;;  %v597_v18 = vld [vmem:[#allocation8 + $0x30] sm:$0xff]  ;;  %s7810_s18 = smov [#allocation17]  }
  0x87   :  { %v280_v32 = vrot.slane %v279_v25, 4  ;;  %6908 = vmatprep.subr.bf16.mxu0 %v9695_v0  ;;  %6922 = vmatprep.subr.bf16.mxu1 %v8059_v37  ;;  %v7333_v10 = vld [vmem:[#allocation2 + $0x8] sm:$0x3f]   ;;  %v8069_v14 = vpack.c.bf16 %v593_v62, %v591_v61  ;;  %v8072_v16 = vpack.c.bf16 %v598_v8, %v596_v7  ;;  %vm320_vm5 = vcmask 1043459   ;;  %v6718_v61 = vld [vmem:[%s9689_s11] ss:$0 sm:$0xff] }
  0x88   :  { %v263_v34 = vadd.f32 %v262_v28, %v261_v21  ;;  %v272_v35 = vadd.f32 %v271_v29, %v270_v22  ;;  %v289_v36 = vrot.slane %v288_v30, 4  ;;  %v7334_v29 = vld [vmem:[#allocation7 + $0x8] sm:$0xff]   ;;  %vm234_vm6 = vcmask 257024   ;;  %s6694_s21 = sshll.u32 %s7810_s18, 4  ;;  %s6695_s21 = int_to_ptr.vmem [resolvable:$true] %s6694_s21 }
  0x89   :  { %v281_v38 = vadd.f32 %v280_v32, %v279_v25  ;;  %v8077_v25 = vpack.c.bf16 %v597_v18, %v595_v17  ;;  %v6719_v7 = vld [vmem:[%s9689_s11 + $0x1] ss:$0 sm:$0xff]  ;;  %v8140_v18 = vld [vmem:[#allocation13 + $0x2] ss:$8 sm:$0x3]  ;;  %vm589_vm7 = vcmask 125952  }
  0x8a   :  { %v264_v39 = vrot.slane %v263_v34, 2  ;;  %v273_v40 = vrot.slane %v272_v35, 2  ;;  %v290_v41 = vadd.f32 %v289_v36, %v288_v30  ;;  %6909 = vmatpush3.bf16.msra.mxu0 %v7328_v31  ;;  %590 = vst.msk [vmem:[#allocation15] sm:$0xf] %vm589_vm7, %v9695_v0  ;;  %vm802_vm8 = vcmask 130112  }
  0x8b   :  { %v282_v42 = vrot.slane %v281_v38, 2  ;;  %6934 = vmatprep.subr.bf16.mxu0 %v7329_v33  ;;  %vm1089_vm9 = vcmask 130048   ;;  %vm1421_vm10 = vcmask 523264   ;;  %vm587_vm11 = vcmask 519168  }
  0x8c   :  { %v265_v44 = vadd.f32 %v264_v39, %v263_v34  ;;  %v274_v45 = vadd.f32 %v273_v40, %v272_v35  ;;  %v291_v46 = vrot.slane %v290_v41, 2  ;;  %v8100_v34 = vld [vmem:[#allocation13 + $0x3] ss:$0 sm:$0xff]  ;;  %vm1533_vm12 = vcmask 1043968  }
  0x8d   :  { %v283_v48 = vadd.f32 %v282_v42, %v281_v38  ;;  %6911 = vmatmul.mubr.msk.bf16.vlgmr.msra.gmra.mrb[0].mxu0 %vm164_vm2, %v139_v43  ;;  %vm1030_vm15 = vcmask 261312   ;;  %vm1910_vm2 = vcmask 388352  }
  0x8e   :  { %v266_v50 = vrot.slane %v265_v44, 1  ;;  %v275_v51 = vrot.slane %v274_v45, 1  ;;  %v292_v52 = vadd.f32 %v291_v46, %v290_v41  ;;  %6935 = vmatpush3.bf16.msra.mxu0 %v7329_v33  ;;  %6938 = vmatprep.mubr.msk.bf16.mxu0 %vm258_vm1, %v7331_v47  ;;  %v244_v41 = vld [vmem:[#allocation13] ss:$0 sm:$0xff] }
  0x8f   :  { %v284_v55 = vrot.slane %v283_v48, 1  ;;  %6936 = vmatprep.subr.bf16.mxu0 %v7330_v49 }
  0x90   :  { %v267_v56 = vadd.f32 %v266_v50, %v265_v44  ;;  %v276_v57 = vadd.f32 %v275_v51, %v274_v45  ;;  %v293_v58 = vrot.slane %v292_v52, 1  ;;  %v219_v50 = vlaneseq }
  0x91   :  { %v285_v59 = vadd.f32 %v284_v55, %v283_v48  ;;  %v211_v48 = vld [vmem:[%s9689_s11 + $0x3] sm:$0x1] }
  0x92   :  { %v294_v63 = vadd.f32 %v293_v58, %v292_v52  ;;  %v296_v1 = vmul.f32 0.0625, %v267_v56  ;;  %v297_v2 = vmul.f32 0.0625, %v276_v57  ;;  %6937 = vmatpush3.bf16.msra.mxu0 %v7330_v49  ;;  %v217_v49 = vadd.f32 1e-05, %v211_v48  ;;  %v138_v52 = vld [vmem:[#allocation13 + $0x4] ss:$0 sm:$0xff] }
  0x93   :  { %v298_v9 = vmul.f32 0.0625, %v285_v59  ;;  %7188 = vmatprep.subr.bf16.mxu0 %v8067_v60  ;;  %v8125_v51 = vshrl.u32 %v219_v50, 7  ;;  %v6717_v56 = vld [vmem:[%s9689_s11 + $0x2] ss:$0 sm:$0xff]  ;;  %s7804_s11 = smov 32  }
  0x94   :  { %v299_v11 = vmul.f32 0.0625, %v294_v63  ;;  %v300_v12 = vpack.c.bf16 %v296_v1, %v296_v1  ;;  %v301_v13 = vpack.c.bf16 %v297_v2, %v297_v2  ;;  %7339 = vrsqrt.f32 %v217_v49 }
  0x95   :  { %v302_v15 = vpack.c.bf16 %v298_v9, %v298_v9  ;;  %6939 = vmatmul.mubr.msk.bf16.vlgmr.msra.gmra.mrb[4].mxu0 %vm258_vm1, %v7333_v10  ;;  %v8128_v54 = vsub.s32 0, %v8125_v51  ;;  %vm3528_vm13 = vcmp.lt.s32.totalorder %v8125_v51, 3  ;;  %vm5249_vm14 = vcmp.lt.s32.totalorder %v8125_v51, 2 }
  0x96   :  { %v303_v19 = vpack.c.bf16 %v299_v11, %v299_v11  ;;  %v312_v20 = vunpack.c.l.b16 %v300_v12  ;;  %v313_v21 = vunpack.c.l.b16 %v301_v13  ;;  %7190 = vmatpush1.bf16.msra.mxu0 %v8069_v14  ;;  %677 = vmatprep.mubr.f32.mxu0 %v9695_v0 }
  0x97   :  { %v314_v22 = vunpack.c.l.b16 %v302_v15  ;;  %7192 = vmatprep.subr.bf16.mxu0 %v8072_v16  ;;  %v7801_v15 = vmov 1966171168  }
  0x98   :  { %v315_v23 = vunpack.c.l.b16 %v303_v19  ;;  %v317_v24 = vsel %vm316_vm3, %v313_v21, %v312_v20  ;;  %v692_v17 = vunpack.c.l.s4 %v7801_v15  ;;  %v8144_v20 = vrot.slane %v8140_v18, %v8128_v54 }
  0x99   :  { %v319_v26 = vsel %vm318_vm4, %v314_v22, %v317_v24 }
  0x9a   :  { %v321_v27 = vsel %vm320_vm5, %v315_v23, %v319_v26  ;;  %7194 = vmatpush1.bf16.msra.mxu0 %v8077_v25  ;;  %v693_v19 = vunpack.c.0.s8 %v692_v17  ;;  %v245_v26 = vld [vmem:[#allocation13 + $0x1] ss:$0 sm:$0xff] }
  0x9b   :  { %v322_v28 = vpack.c.b16 %v321_v27, %v321_v27  ;;  %6942 = vmatprep.subr.bf16.mxu0 %v9695_v0 }
  0x9c   :  { %v8147_v21 = vsub.s32 %v693_v19, %v8125_v51 }
  0x9d   :  { %6919 = vmatmul.mubr.msk.bf16.vlgmr.msra.gmra.mrb[0].mxu1 %vm258_vm1, %v322_v28 }
  0x9e   :  { %6923 = vmatpush3.bf16.msra.mxu1 %v8059_v37  ;;  %6926 = vmatprep.mubr.msk.bf16.mxu1 %vm258_vm1, %v8015_v3  ;;  %v7340_v55 = vpop.eup %7339 }
  0x9f   :  { %6924 = vmatprep.subr.bf16.mxu1 %v7334_v29  ;;  %v222_v58 = vrot.slane %v7340_v55, %v8128_v54 }
  0xa2   :  { %6925 = vmatpush3.bf16.msra.mxu1 %v7334_v29 }
  0xa3   :  { %6948 = vmatprep.subr.bf16.mxu1 %v9695_v0 }
  0xa5   :  { %6927 = vmatmul.mubr.msk.bf16.vlgmr.msra.gmra.mrb[4].mxu1 %vm258_vm1, %v8020_v4 }
  0xa6   :  { %6930 = vmatprep.mubr.msk.bf16.mxu1 %vm258_vm1, %v8025_v5  ;;  %6949 = vmatpush3.bf16.msra.mxu1 %v8020_v4 }
  0xa7   :  { %6960 = vmatprep.subr.bf16.mxu1 %v9695_v0 }
  0xad   :  { %6931 = vmatmul.mubr.msk.bf16.gmra.mrb[8].mxu1 %vm258_vm1, %v8031_v6 }
  0xae   :  { %6950 = vmatprep.mubr.msk.bf16.mxu1 %vm7800_vm0, %v9695_v0 }
 0x160   :  { %v202_v30 = vpop.f32.mrb[0].mxu0 }
 0x161   :  { %v6912_v31 = vpop.f32.mrb[1].mxu0  ;;  %v203_v53 = vadd.f32 %v202_v30, %v138_v52  ;;  %v8177_v52 = vld [vmem:[#allocation13 + $0x5] ss:$0 sm:$0xff] }
 0x162   :  { %v205_v32 = vpop.f32.mrb[2].mxu0 }
 0x163   :  { %v6913_v33 = vpop.f32.mrb[3].mxu0  ;;  %v216_v57 = vsub.f32 %v203_v53, %v6717_v56 }
 0x165   :  { %v223_v59 = vmul.f32 %v222_v58, %v216_v57 }
 0x167   :  { %v228_v62 = vmul.f32 %v6718_v61, %v223_v59 }
 0x168   :  { %v6940_v35 = vpop.f32.mrb[4].mxu0 }
 0x169   :  { %v8103_v36 = vadd.f32 %v6940_v35, %v8100_v34  ;;  %v8105_v37 = vpop.f32.mrb[5].mxu0  ;;  %v233_v9 = vadd.f32 %v6719_v7, %v228_v62 }
 0x16a   :  { %v6941_v38 = vpop.f32.mrb[6].mxu0 }
 0x16b   :  { %v8108_v39 = vadd.f32 %v6941_v38, %v8100_v34  ;;  %v572_v40 = vpop.f32.mrb[7].mxu0  ;;  %235 = vst.msk [vmem:[#allocation17] sm:$0xf] %vm234_vm6, %v233_v9  ;;  %vm2730_vm6 = vcmask 523712  }
 0x16c   :  { %v8111_v42 = vadd.f32 %v572_v40, %v8100_v34 }
 0x170   :  { %v372_v43 = vpop.f32.mrb[0].mxu1 }
 0x171   :  { %v8113_v44 = vadd.f32 %v372_v43, %v244_v41  ;;  %v6920_v45 = vpop.f32.mrb[1].mxu1 }
 0x172   :  { %v375_v46 = vpop.f32.mrb[2].mxu1 }
 0x173   :  { %v6921_v47 = vpop.f32.mrb[3].mxu1  ;;  %6739 = vmatmul.mubr.msk.f32.vlgmr.msra.gmra.mrb[8].mxu0 %vm258_vm1, %v8113_v44 }
 0x174   :  { %6943 = vmatpush3.bf16.msra.mxu0 %v8015_v3  ;;  %6944 = vmatprep.mubr.msk.bf16.mxu0 %vm7800_vm0, %v9695_v0 }
 0x175   :  { %6954 = vmatprep.subr.bf16.mxu0 %v9695_v0 }
 0x178   :  { %v6928_v63 = vpop.f32.mrb[4].mxu1 }
 0x179   :  { %v460_v1 = vpop.f32.mrb[5].mxu1  ;;  %v8163_v38 = vadd.f32 %v6928_v63, %v245_v26 }
 0x17a   :  { %v6929_v2 = vpop.f32.mrb[6].mxu1  ;;  %v8157_v30 = vadd.f32 %v460_v1, %v245_v26 }
 0x17b   :  { %v463_v8 = vpop.f32.mrb[7].mxu1  ;;  %v8165_v40 = vadd.f32 %v6929_v2, %v245_v26 }
 0x17c   :  { %v8159_v31 = vadd.f32 %v463_v8, %v245_v26 }
 0x180   :  { %v6932_v10 = vpop.f32.mrb[8].mxu1 }
 0x181   :  { %v476_v11 = vpop.f32.mrb[9].mxu1  ;;  %v8175_v49 = vadd.f32 %v6932_v10, %v245_v26 }
 0x182   :  { %v6933_v12 = vpop.f32.mrb[10].mxu1  ;;  %v8167_v41 = vadd.f32 %v476_v11, %v245_v26 }
 0x183   :  { %v479_v13 = vpop.f32.mrb[11].mxu1  ;;  %v8181_v59 = vadd.f32 %v6933_v12, %v245_v26 }
 0x184   :  { %v8169_v43 = vadd.f32 %v479_v13, %v245_v26 }
 0x246   :  { %v679_v22 = vpop.f32.mrb[8].mxu0 }
 0x247   :  { %v8150_v23 = vadd.f32 %v679_v22, %v8144_v20  ;;  %v8152_v24 = vpop.f32.mrb[9].mxu0 }
 0x249   :  { %v697_v27 = vrot.slane %v8150_v23, %v8147_v21 }
 0x24b   :  { %v698_v28 = vcombine.high %v697_v27, %v697_v27  ;;  %v705_v29 = vrot.slane %v697_v27, %v8147_v21 }
 0x24d   :  { %v718_v32 = vrot.slane %v705_v29, %v8128_v54  ;;  %v712_v33 = vrot.slane %v698_v28, %v8147_v21  ;;  %v713_v35 = vcombine.high %v705_v29, %v705_v29 }
 0x24f   :  { %v735_v45 = vadd.f32 %v718_v32, %v8157_v30  ;;  %v722_v46 = vrot.slane %v712_v33, %v8128_v54  ;;  %v736_v47 = vadd.f32 %v718_v32, %v8159_v31  ;;  %v726_v48 = vrot.slane %v713_v35, %v8128_v54 }
 0x250   :  { %v714_v53 = vcombine.high %v712_v33, %v712_v33 }
 0x251   :  { %v743_v55 = vmax.f32 %v735_v45, 0.0  ;;  %v737_v56 = vadd.f32 %v722_v46, %v8163_v38  ;;  %v744_v57 = vmax.f32 %v736_v47, 0.0  ;;  %v738_v58 = vadd.f32 %v722_v46, %v8165_v40 }
 0x252   :  { %v739_v61 = vadd.f32 %v726_v48, %v8167_v41  ;;  %v730_v62 = vrot.slane %v714_v53, %v8128_v54  ;;  %v740_v7 = vadd.f32 %v726_v48, %v8169_v43 }
 0x253   :  { %v751_v63 = vmul.f32 %v743_v55, %v8177_v52  ;;  %v745_v1 = vmax.f32 %v737_v56, 0.0  ;;  %v746_v2 = vmax.f32 %v738_v58, 0.0  ;;  %v752_v8 = vmul.f32 %v744_v57, %v8177_v52 }
 0x254   :  { %v747_v11 = vmax.f32 %v739_v61, 0.0  ;;  %v741_v12 = vadd.f32 %v730_v62, %v8175_v49  ;;  %v748_v17 = vmax.f32 %v740_v7, 0.0  ;;  %v742_v19 = vadd.f32 %v730_v62, %v8181_v59 }
 0x255   :  { %v759_v9 = vsel %vm258_vm1, %v751_v63, 0.0  ;;  %v753_v10 = vmul.f32 %v745_v1, %v8177_v52  ;;  %v754_v15 = vmul.f32 %v746_v2, %v8177_v52  ;;  %v762_v22 = vsel %vm258_vm1, %v752_v8, 0.0 }
 0x256   :  { %760 = vadd.xlane.f32.xlu0 %v759_v9  ;;  %v755_v26 = vmul.f32 %v747_v11, %v8177_v52  ;;  %v749_v27 = vmax.f32 %v741_v12, 0.0  ;;  %v756_v29 = vmul.f32 %v748_v17, %v8177_v52  ;;  %v750_v32 = vmax.f32 %v742_v19, 0.0 }
 0x257   :  { %v765_v13 = vsel %vm258_vm1, %v753_v10, 0.0  ;;  %v768_v28 = vsel %vm258_vm1, %v754_v15, 0.0  ;;  %v8207_v55 = vand.u32 127, %v219_v50 }
 0x258   :  { %766 = vadd.xlane.f32.xlu1 %v765_v13  ;;  %v771_v33 = vsel %vm258_vm1, %v755_v26, 0.0  ;;  %v757_v35 = vmul.f32 %v749_v27, %v8177_v52  ;;  %v774_v45 = vsel %vm258_vm1, %v756_v29, 0.0  ;;  %v758_v46 = vmul.f32 %v750_v32, %v8177_v52 }
 0x259   :  { %9737 = vst [vmem:[#allocation24_spill] sm:$0xff] %v8207_v55  ;;  %v797_v57 = vadd.s32 4294967288, %v8207_v55  ;;  %v8215_v1 = vsub.s32 %v8207_v55, %v8125_v51 }
 0x25a   :  { %763 = vadd.xlane.f32.xlu0 %v762_v22  ;;  %v777_v47 = vsel %vm258_vm1, %v757_v35, 0.0  ;;  %v780_v48 = vsel %vm258_vm1, %v758_v46, 0.0  ;;  %v7802_v35 = vmov 0  }
 0x25b   :  { %v8211_v62 = vsub.s32 %v797_v57, %v8125_v51  ;;  %7319 = vset.pattern.permute.xlu0 %v7802_v35  ;;  %7318 = vset.pattern.permute.xlu1 %v7802_v35  ;;  %v8239_v57 = vsub.s32 2, %v8125_v51 }
 0x25c   :  { %769 = vadd.xlane.f32.xlu1 %v768_v28 }
 0x25e   :  { %772 = vadd.xlane.f32.xlu0 %v771_v33 }
 0x260   :  { %775 = vadd.xlane.f32.xlu1 %v774_v45  ;;  %v8234_v45 = vsub.s32 1, %v8125_v51 }
 0x262   :  { %778 = vadd.xlane.f32.xlu0 %v777_v47 }
 0x264   :  { %781 = vadd.xlane.f32.xlu1 %v780_v48 }
 0x2e3   :  { %v761_v53 = vpop.xlane.xlu0 %760 }
 0x2e4   :  { %v796_v12 = vrot.slane %v761_v53, %v8215_v1 }
 0x2e5   :  { %v767_v56 = vpop.xlane.xlu1 %766 }
 0x2e6   :  { %v807_v8 = vrot.slane %v767_v56, %v8215_v1 }
 0x2e7   :  { %v764_v58 = vpop.xlane.xlu0 %763 }
 0x2e8   :  { %v801_v50 = vrot.slane %v764_v58, %v8211_v62 }
 0x2e9   :  { %v770_v61 = vpop.xlane.xlu1 %769 }
 0x2ea   :  { %v811_v2 = vrot.slane %v770_v61, %v8211_v62  ;;  %v803_v19 = vsel %vm802_vm8, %v801_v50, %v796_v12 }
 0x2eb   :  { %v773_v63 = vpop.xlane.xlu0 %772 }
 0x2ec   :  { %v816_v10 = vrot.slane %v773_v63, %v8215_v1  ;;  %v812_v13 = vsel %vm802_vm8, %v811_v2, %v807_v8 }
 0x2ed   :  { %v776_v7 = vpop.xlane.xlu1 %775  ;;  %v831_v27 = vsel %vm316_vm3, %v812_v13, %v803_v19  ;;  %v8243_v19 = vsub.s32 3, %v8125_v51 }
 0x2ee   :  { %v820_v9 = vrot.slane %v776_v7, %v8211_v62 }
 0x2ef   :  { %v779_v11 = vpop.xlane.xlu0 %778 }
 0x2f0   :  { %v821_v17 = vsel %vm802_vm8, %v820_v9, %v816_v10  ;;  %v825_v22 = vrot.slane %v779_v11, %v8215_v1 }
 0x2f1   :  { %v782_v15 = vpop.xlane.xlu1 %781  ;;  %v832_v29 = vsel %vm318_vm4, %v821_v17, %v831_v27 }
 0x2f2   :  { %v829_v26 = vrot.slane %v782_v15, %v8211_v62 }
 0x2f4   :  { %v830_v28 = vsel %vm802_vm8, %v829_v26, %v825_v22 }
 0x2f5   :  { %v833_v32 = vsel %vm320_vm5, %v830_v28, %v832_v29 }
 0x2f6   :  { %v835_v33 = vsel %vm589_vm7, %v833_v32, -inf }
 0x2f7   :  { %836 = vmax.xlane.f32.xlu0 %v835_v33 }
 0x384   :  { %v837_v46 = vpop.xlane.xlu0 %836 }
 0x385   :  { %v842_v47 = vrot.slane %v837_v46, %v8128_v54  ;;  %v846_v48 = vrot.slane %v837_v46, %v8234_v45  ;;  %v850_v12 = vrot.slane %v837_v46, %v8239_v57  ;;  %v854_v27 = vrot.slane %v837_v46, %v8243_v19 }
 0x387   :  { %v859_v2 = vsub.f32 %v761_v53, %v842_v47  ;;  %v860_v8 = vsub.f32 %v764_v58, %v842_v47  ;;  %v861_v50 = vsub.f32 %v767_v56, %v846_v48  ;;  %v862_v13 = vsub.f32 %v770_v61, %v846_v48 }
 0x388   :  { %v863_v22 = vsub.f32 %v773_v63, %v850_v12  ;;  %v864_v28 = vsub.f32 %v776_v7, %v850_v12  ;;  %v865_v29 = vsub.f32 %v779_v11, %v854_v27  ;;  %v866_v33 = vsub.f32 %v782_v15, %v854_v27 }
 0x389   :  { %v867_v9 = vmul.f32 1.442695, %v859_v2  ;;  %v869_v10 = vmul.f32 1.442695, %v860_v8  ;;  %v871_v17 = vmul.f32 1.442695, %v861_v50 }
 0x38a   :  { %v873_v26 = vmul.f32 1.442695, %v862_v13  ;;  %v875_v53 = vmul.f32 1.442695, %v863_v22  ;;  %v877_v61 = vmul.f32 1.442695, %v864_v28 }
 0x38b   :  { %7341 = vpow2.f32 %v867_v9  ;;  %v879_v35 = vmul.f32 1.442695, %v865_v29  ;;  %v881_v47 = vmul.f32 1.442695, %v866_v33 }
 0x38c   :  { %7343 = vpow2.f32 %v869_v10 }
 0x38d   :  { %7345 = vpow2.f32 %v871_v17 }
 0x38e   :  { %7347 = vpow2.f32 %v873_v26 }
 0x38f   :  { %7349 = vpow2.f32 %v875_v53 }
 0x390   :  { %7351 = vpow2.f32 %v877_v61 }
 0x391   :  { %7353 = vpow2.f32 %v879_v35 }
 0x392   :  { %7355 = vpow2.f32 %v881_v47 }
 0x395   :  { %v7342_v56 = vpop.eup %7341 }
 0x396   :  { %v7344_v58 = vpop.eup %7343  ;;  %892 = vperm.xlu1 %7318, %v7342_v56  }
 0x397   :  { %895 = vperm.xlu0 %7319, %v7344_v58   ;;  %v7346_v32 = vpop.eup %7345 }
 0x398   :  { %v7348_v63 = vpop.eup %7347 }
 0x399   :  { %v7350_v46 = vpop.eup %7349 }
 0x39a   :  { %898 = vperm.xlu1 %7318, %v7346_v32   ;;  %v7352_v7 = vpop.eup %7351 }
 0x39b   :  { %v7354_v48 = vpop.eup %7353 }
 0x39c   :  { %v7356_v11 = vpop.eup %7355 }
 0x39e   :  { %901 = vperm.xlu1 %7318, %v7348_v63  }
 0x3a2   :  { %904 = vperm.xlu1 %7318, %v7350_v46  }
 0x3a6   :  { %907 = vperm.xlu1 %7318, %v7352_v7  }
 0x3aa   :  { %910 = vperm.xlu1 %7318, %v7354_v48  }
 0x3ae   :  { %913 = vperm.xlu1 %7318, %v7356_v11  }
 0x415   :  { %v893_v2 = vpop.permute.xlu1 %892 }
 0x416   :  { %v896_v10 = vpop.permute.xlu0 %895  ;;  %v918_v26 = vrot.slane %v893_v2, %v8215_v1 }
 0x417   :  { %v922_v22 = vrot.slane %v896_v10, %v8211_v62 }
 0x419   :  { %v899_v8 = vpop.permute.xlu1 %898  ;;  %v923_v33 = vsel %vm802_vm8, %v922_v22, %v918_v26 }
 0x41a   :  { %v927_v27 = vrot.slane %v899_v8, %v8215_v1 }
 0x41d   :  { %v902_v50 = vpop.permute.xlu1 %901 }
 0x41e   :  { %v931_v12 = vrot.slane %v902_v50, %v8211_v62 }
 0x420   :  { %v932_v53 = vsel %vm802_vm8, %v931_v12, %v927_v27 }
 0x421   :  { %v905_v9 = vpop.permute.xlu1 %904  ;;  %v951_v50 = vsel %vm316_vm3, %v932_v53, %v923_v33 }
 0x422   :  { %v936_v28 = vrot.slane %v905_v9, %v8215_v1 }
 0x425   :  { %v908_v15 = vpop.permute.xlu1 %907 }
 0x426   :  { %v940_v13 = vrot.slane %v908_v15, %v8211_v62 }
 0x428   :  { %v941_v61 = vsel %vm802_vm8, %v940_v13, %v936_v28 }
 0x429   :  { %v911_v17 = vpop.permute.xlu1 %910  ;;  %v952_v2 = vsel %vm318_vm4, %v941_v61, %v951_v50 }
 0x42a   :  { %v945_v35 = vrot.slane %v911_v17, %v8215_v1 }
 0x42d   :  { %v914_v29 = vpop.permute.xlu1 %913 }
 0x42e   :  { %v949_v47 = vrot.slane %v914_v29, %v8211_v62 }
 0x430   :  { %v950_v15 = vsel %vm802_vm8, %v949_v47, %v945_v35 }
 0x431   :  { %v953_v8 = vsel %vm320_vm5, %v950_v15, %v952_v2 }
 0x432   :  { %v955_v9 = vsel %vm589_vm7, %v953_v8, 0.0 }
 0x433   :  { %956 = vadd.xlane.f32.xlu1 %v955_v9 }
 0x4c0   :  { %v957_v10 = vpop.xlane.xlu1 %956 }
 0x4c1   :  { %7357 = vrcp.f32 %v957_v10 }
 0x4cb   :  { %v7358_v12 = vpop.eup %7357 }
 0x4cc   :  { %v963_v13 = vrot.slane %v7358_v12, %v8128_v54  ;;  %v967_v26 = vrot.slane %v7358_v12, %v8234_v45 }
 0x4ce   :  { %v8263_v22 = vmul.f32 %v7342_v56, %v963_v13  ;;  %v8265_v17 = vmul.f32 %v7344_v58, %v963_v13  ;;  %v8270_v53 = vmul.f32 %v7346_v32, %v967_v26  ;;  %v8272_v29 = vmul.f32 %v7348_v63, %v967_v26 }
 0x4cf   :  { %v971_v56 = vrot.slane %v7358_v12, %v8239_v57  ;;  %v975_v63 = vrot.slane %v7358_v12, %v8243_v19 }
 0x4d0   :  { %9738 = vst [vmem:[#allocation25_spill] sm:$0xff] %v8265_v17  ;;  %v1065_v27 = vpack.c.bf16 %v8265_v17, %v8263_v22  ;;  %9739 = vst [vmem:[#allocation26_spill] sm:$0xff] %v8270_v53  ;;  %v1066_v33 = vpack.c.bf16 %v8272_v29, %v8270_v53 }
 0x4d1   :  { %9740 = vst [vmem:[#allocation27_spill] sm:$0xff] %v8272_v29  ;;  %v8277_v35 = vmul.f32 %v7350_v46, %v971_v56  ;;  %v8279_v47 = vmul.f32 %v7352_v7, %v971_v56  ;;  %v8284_v2 = vmul.f32 %v7354_v48, %v975_v63  ;;  %v8286_v8 = vmul.f32 %v7356_v11, %v975_v63 }
 0x4d2   :  { %v1070_v28 = vunpack.c.l.b16 %v1065_v27  ;;  %v1071_v61 = vunpack.c.h.b16 %v1065_v27  ;;  %v1134_v58 = vunpack.c.l.b16 %v1066_v33  ;;  %v1135_v50 = vunpack.c.h.b16 %v1066_v33 }
 0x4d3   :  { %9741 = vst [vmem:[#allocation28_spill] sm:$0xff] %v8277_v35  ;;  %9742 = vst [vmem:[#allocation29_spill] sm:$0xff] %v8279_v47  ;;  %v1067_v32 = vpack.c.bf16 %v8279_v47, %v8277_v35  ;;  %v1068_v46 = vpack.c.bf16 %v8286_v8, %v8284_v2 }
 0x4d4   :  { %1073 = vperm.xlu0 %7319, %v1070_v28   ;;  %9743 = vst [vmem:[#allocation30_spill] sm:$0xff] %v8284_v2  ;;  %9744 = vst [vmem:[#allocation31_spill] sm:$0xff] %v8286_v8 }
 0x4d5   :  { %v1197_v15 = vunpack.c.l.b16 %v1067_v32  ;;  %v1198_v9 = vunpack.c.h.b16 %v1067_v32  ;;  %v1260_v7 = vunpack.c.l.b16 %v1068_v46  ;;  %v1261_v10 = vunpack.c.h.b16 %v1068_v46 }
 0x4d8   :  { %1076 = vperm.xlu0 %7319, %v1071_v61  }
 0x4dc   :  { %1137 = vperm.xlu0 %7319, %v1134_v58  }
 0x4e0   :  { %1140 = vperm.xlu0 %7319, %v1135_v50  }
 0x4e4   :  { %1200 = vperm.xlu0 %7319, %v1197_v15  }
 0x4e8   :  { %1203 = vperm.xlu0 %7319, %v1198_v9  }
 0x4ec   :  { %1263 = vperm.xlu0 %7319, %v1260_v7  }
 0x4f0   :  { %1266 = vperm.xlu0 %7319, %v1261_v10  }
 0x553   :  { %v1074_v13 = vpop.permute.xlu0 %1073 }
 0x554   :  { %v1081_v12 = vrot.slane %v1074_v13, %v8215_v1 }
 0x557   :  { %v1077_v26 = vpop.permute.xlu0 %1076 }
 0x558   :  { %v1085_v27 = vrot.slane %v1077_v26, %v8211_v62 }
 0x55a   :  { %v1086_v48 = vsel %vm802_vm8, %v1085_v27, %v1081_v12 }
 0x55b   :  { %v1087_v11 = vpack.c.b16 %v1086_v48, %v1086_v48  ;;  %v1138_v28 = vpop.permute.xlu0 %1137 }
 0x55c   :  { %v1145_v33 = vrot.slane %v1138_v28, %v8215_v1 }
 0x55d   :  { %6945 = vmatmul.mubr.msk.bf16.vlgmr.msra.gmra.mrb[12].mxu0 %vm1089_vm9, %v1087_v11 }
 0x55e   :  { %6955 = vmatpush3.bf16.msra.mxu0 %v8025_v5  ;;  %6956 = vmatprep.mubr.msk.bf16.mxu0 %vm7800_vm0, %v9695_v0 }
 0x55f   :  { %v1141_v61 = vpop.permute.xlu0 %1140 }
 0x560   :  { %v1149_v56 = vrot.slane %v1141_v61, %v8211_v62 }
 0x562   :  { %v1150_v58 = vsel %vm802_vm8, %v1149_v56, %v1145_v33 }
 0x563   :  { %v1151_v50 = vpack.c.b16 %v1150_v58, %v1150_v58  ;;  %v1201_v32 = vpop.permute.xlu0 %1200 }
 0x564   :  { %v1208_v15 = vrot.slane %v1201_v32, %v8215_v1 }
 0x565   :  { %6951 = vmatmul.mubr.msk.bf16.vlgmr.msra.gmra.mrb[12].mxu1 %vm1089_vm9, %v1151_v50 }
 0x566   :  { %6961 = vmatpush3.bf16.msra.mxu1 %v8031_v6  ;;  %6962 = vmatprep.mubr.msk.bf16.mxu1 %vm7800_vm0, %v9695_v0 }
 0x567   :  { %v1204_v63 = vpop.permute.xlu0 %1203  ;;  %7202 = vmatprep.subr.bf16.mxu1 %v8067_v60 }
 0x568   :  { %v1212_v9 = vrot.slane %v1204_v63, %v8211_v62 }
 0x56a   :  { %v1213_v46 = vsel %vm802_vm8, %v1212_v9, %v1208_v15 }
 0x56b   :  { %v1214_v7 = vpack.c.b16 %v1213_v46, %v1213_v46  ;;  %v1264_v10 = vpop.permute.xlu0 %1263 }
 0x56c   :  { %v1271_v26 = vrot.slane %v1264_v10, %v8215_v1 }
 0x56d   :  { %6957 = vmatmul.mubr.msk.bf16.vlgmr.msra.gmra.mrb[16].mxu0 %vm1089_vm9, %v1214_v7 }
 0x56e   :  { %6974 = vmatprep.mubr.msk.f32.mxu0 %vm7800_vm0, %v9695_v0 }
 0x56f   :  { %v1267_v13 = vpop.permute.xlu0 %1266 }
 0x570   :  { %v1275_v12 = vrot.slane %v1267_v13, %v8211_v62 }
 0x572   :  { %v1276_v60 = vsel %vm802_vm8, %v1275_v12, %v1271_v26  ;;  %v1336_v26 = vld [vmem:[#allocation10] sm:$0xff]  ;;  %v1337_v12 = vld [vmem:[#allocation10 + $0x8] sm:$0xff] }
 0x573   :  { %v1277_v27 = vpack.c.b16 %v1276_v60, %v1276_v60  ;;  %v1338_v60 = vld [vmem:[#allocation10 + $0x10] sm:$0xff] }
 0x575   :  { %6963 = vmatmul.mubr.msk.bf16.vlgmr.msra.gmra.mrb[16].mxu1 %vm1089_vm9, %v1277_v27 }
 0x576   :  { %7204 = vmatpush1.bf16.msra.mxu1 %v8069_v14  ;;  %1526 = vmatprep.mubr.f32.mxu1 %v9695_v0 }
 0x577   :  { %7206 = vmatprep.subr.bf16.mxu1 %v8072_v16 }
 0x57a   :  { %7208 = vmatpush1.bf16.msra.mxu1 %v8077_v25 }
 0x57b   :  { %6983 = vmatprep.subr.bf16.mxu1 %v9695_v0 }
 0x630   :  { %v1127_v48 = vpop.f32.mrb[12].mxu0 }
 0x631   :  { %v6946_v11 = vpop.f32.mrb[13].mxu0 }
 0x632   :  { %v1130_v28 = vpop.f32.mrb[14].mxu0  ;;  %v9693_v11 = vmov 0.0|0.0  }
 0x633   :  { %v6947_v61 = vpop.f32.mrb[15].mxu0  ;;  %7195 = vmatprep.subr.bf16.mxu0 %v9693_v11  ;;  %v8323_v28 = vpack.c.bf16 %v1337_v12, %v1336_v26 }
 0x635   :  { %7197 = vmatpush3.bf16.msra.mxu0 %v8323_v28 }
 0x636   :  { %7198 = vmatprep.subr.bf16.mxu0 %v9693_v11 }
 0x638   :  { %v1190_v33 = vpop.f32.mrb[12].mxu1 }
 0x639   :  { %v1326_v56 = vrot.slane %v1190_v33, 7  ;;  %v6952_v58 = vpop.f32.mrb[13].mxu1 }
 0x63a   :  { %v1193_v50 = vpop.f32.mrb[14].mxu1  ;;  %v6740_v58 = vmul.f32 -1.442695, %v8150_v23 }
 0x63b   :  { %v1327_v32 = vsel %vm316_vm3, %v1326_v56, %v1127_v48  ;;  %v6953_v63 = vpop.f32.mrb[15].mxu1  ;;  %v1339_v48 = vld [vmem:[#allocation10 + $0x18] sm:$0xff] }
 0x63c   :  { %v8328_v56 = vpack.c.bf16 %v1339_v48, %v1338_v60  ;;  %7359 = vpow2.f32 %v6740_v58 }
 0x63e   :  { %7200 = vmatpush3.bf16.msra.mxu0 %v8328_v56 }
 0x63f   :  { %6977 = vmatprep.subr.bf16.mxu0 %v9695_v0 }
 0x640   :  { %v1253_v14 = vpop.f32.mrb[16].mxu0 }
 0x641   :  { %v1328_v15 = vrot.slane %v1253_v14, 6  ;;  %v6958_v9 = vpop.f32.mrb[17].mxu0 }
 0x642   :  { %v1256_v46 = vpop.f32.mrb[18].mxu0  ;;  %v8337_v9 = vrot.slane %v8140_v18, %v8234_v45 }
 0x643   :  { %v6959_v16 = vpop.f32.mrb[19].mxu0  ;;  %v1329_v25 = vsel %vm318_vm4, %v1328_v15, %v1327_v32 }
 0x644   :  { %v682_v46 = vadd.f32 %v8152_v24, %v8337_v9 }
 0x646   :  { %v7360_v50 = vpop.eup %7359 }
 0x647   :  { %v687_v32 = vadd.f32 1.0, %v7360_v50 }
 0x648   :  { %v1316_v7 = vpop.f32.mrb[16].mxu1 }
 0x649   :  { %v1330_v10 = vrot.slane %v1316_v7, 5  ;;  %v6964_v13 = vpop.f32.mrb[17].mxu1  ;;  %7361 = vrcp.f32 %v687_v32 }
 0x64a   :  { %v1319_v27 = vpop.f32.mrb[18].mxu1 }
 0x64b   :  { %v6965_v61 = vpop.f32.mrb[19].mxu1  ;;  %v1331_v33 = vsel %vm320_vm5, %v1330_v10, %v1329_v25  ;;  %v8351_v25 = vadd.f32 %v8105_v37, %v8100_v34 }
 0x64c   :  { %1332 = vrot.lane.b32.xlu1 %v1331_v33, %s7804_s11 }
 0x653   :  { %v7362_v63 = vpop.eup %7361 }
 0x6be   :  { %v1333_v14 = vpop.permute.xlu1 %1332 }
 0x6bf   :  { %v1335_v15 = vmul.f32 %v7362_v63, %v1333_v14 }
 0x6c1   :  { %1341 = vrot.lane.b32.xlu0 %v1335_v15, %s7805_s17 }
 0x6c5   :  { %1417 = vrot.lane.b32.xlu0 %v8150_v23, %s7792_s16 }
 0x6c9   :  { %1419 = vrot.lane.b32.xlu0 %v682_v46, %s7792_s16 }
 0x733   :  { %v1342_v16 = vpop.permute.xlu0 %1341 }
 0x734   :  { %6975 = vmatmul.mubr.msk.f32.vlgmr.msra.gmra.mrb[10].mxu0 %vm258_vm1, %v1342_v16 }
 0x735   :  { %6978 = vmatpush3.bf16.msra.mxu0 %v8015_v3  ;;  %6979 = vmatprep.mubr.msk.bf16.mxu0 %vm7800_vm0, %v9695_v0 }
 0x736   :  { %6989 = vmatprep.subr.bf16.mxu0 %v9695_v0 }
 0x737   :  { %v1418_v18 = vpop.permute.xlu0 %1417 }
 0x73b   :  { %v1420_v23 = vpop.permute.xlu0 %1419 }
 0x73c   :  { %v1422_v13 = vsel %vm1421_vm10, %v1418_v18, %v1420_v23 }
 0x807   :  { %v1411_v24 = vpop.f32.mrb[10].mxu0 }
 0x808   :  { %v1415_v7 = vadd.f32 %v1411_v24, %v8351_v25  ;;  %v6976_v10 = vpop.f32.mrb[11].mxu0 }
 0x80a   :  { %v1424_v26 = vadd.f32 %v1422_v13, %v1415_v7 }
 0x80c   :  { %7363 = vtanh.f32 %v1424_v26  ;;  %v6746_v60 = vmul.f32 -1.442695, %v1424_v26 }
 0x80e   :  { %7365 = vpow2.f32 %v6746_v60 }
 0x816   :  { %v7364_v12 = vpop.eup %7363 }
 0x817   :  { %1434 = vrot.lane.b32.xlu0 %v7364_v12, %s7792_s16 }
 0x818   :  { %v7366_v27 = vpop.eup %7365 }
 0x819   :  { %v1428_v48 = vadd.f32 1.0, %v7366_v27 }
 0x81b   :  { %7367 = vrcp.f32 %v1428_v48 }
 0x825   :  { %v7368_v34 = vpop.eup %7367 }
 0x826   :  { %v1432_v33 = vmul.f32 %v7368_v34, %v8113_v44  ;;  %v586_v44 = vld [vmem:[#allocation5] sm:$0xf] }
 0x827   :  { %588 = vst.msk [vmem:[#allocation14] sm:$0xf] %vm587_vm11, %v586_v44 }
 0x889   :  { %v1435_v37 = vpop.permute.xlu0 %1434 }
 0x88a   :  { %v1437_v61 = vmul.f32 %v7368_v34, %v1435_v37 }
 0x88c   :  { %1439 = vrot.lane.b32.xlu1 %v1437_v61, %s7804_s11 }
 0x8fe   :  { %v1440_v58 = vpop.permute.xlu1 %1439 }
 0x8ff   :  { %v8358_v50 = vadd.f32 %v1440_v58, %v1432_v33 }
 0x901   :  { %7369 = vtanh.f32 %v8358_v50 }
 0x90b   :  { %v7370_v32 = vpop.eup %7369 }
 0x90c   :  { %1445 = vrot.lane.b32.xlu0 %v7370_v32, %s7792_s16 }
 0x97e   :  { %v1446_v63 = vpop.permute.xlu0 %1445 }
 0x97f   :  { %v1448_v14 = vmul.f32 %v7368_v34, %v1446_v63 }
 0x981   :  { %1458 = vrot.lane.b32.xlu1 %v1448_v14, %s7804_s11 }
 0x9f3   :  { %v1459_v15 = vpop.permute.xlu1 %1458 }
 0x9f4   :  { %6747 = vmatmul.mubr.msk.f32.vlgmr.msra.gmra.mrb[20].mxu1 %vm258_vm1, %v1459_v15 }
 0x9f5   :  { %6984 = vmatpush3.bf16.msra.mxu1 %v8020_v4  ;;  %6985 = vmatprep.mubr.msk.bf16.mxu1 %vm7800_vm0, %v9695_v0 }
 0x9f6   :  { %6995 = vmatprep.subr.bf16.mxu1 %v9695_v0 }
 0xac7   :  { %v1528_v46 = vpop.f32.mrb[20].mxu1 }
 0xac8   :  { %v8370_v16 = vadd.f32 %v1528_v46, %v8144_v20  ;;  %v1530_v18 = vpop.f32.mrb[21].mxu1 }
 0xac9   :  { %v8373_v23 = vadd.f32 %v1530_v18, %v8337_v9 }
 0xaca   :  { %v1548_v24 = vrot.slane %v8370_v16, %v8147_v21 }
 0xacb   :  { %1534 = vst.msk [vmem:[#allocation14] sm:$0xf] %vm1533_vm12, %v8373_v23 }
 0xacc   :  { %v1549_v7 = vcombine.high %v1548_v24, %v1548_v24  ;;  %v1556_v10 = vrot.slane %v1548_v24, %v8147_v21 }
 0xace   :  { %v1569_v13 = vrot.slane %v1556_v10, %v8128_v54  ;;  %v1564_v26 = vcombine.high %v1556_v10, %v1556_v10  ;;  %v1563_v12 = vrot.slane %v1549_v7, %v8147_v21 }
 0xad0   :  { %v1587_v60 = vadd.f32 %v1569_v13, %v8159_v31  ;;  %v1586_v27 = vadd.f32 %v1569_v13, %v8157_v30  ;;  %v1577_v48 = vrot.slane %v1564_v26, %v8128_v54  ;;  %v1573_v34 = vrot.slane %v1563_v12, %v8128_v54 }
 0xad1   :  { %v1565_v37 = vcombine.high %v1563_v12, %v1563_v12 }
 0xad2   :  { %v1595_v61 = vmax.f32 %v1587_v60, 0.0  ;;  %v1594_v33 = vmax.f32 %v1586_v27, 0.0  ;;  %v1590_v58 = vadd.f32 %v1577_v48, %v8167_v41  ;;  %v1588_v32 = vadd.f32 %v1573_v34, %v8163_v38 }
 0xad3   :  { %v1589_v63 = vadd.f32 %v1573_v34, %v8165_v40  ;;  %v1581_v14 = vrot.slane %v1565_v37, %v8128_v54  ;;  %v1591_v10 = vadd.f32 %v1577_v48, %v8169_v43 }
 0xad4   :  { %v1603_v15 = vmul.f32 %v1595_v61, %v8177_v52  ;;  %v1602_v44 = vmul.f32 %v1594_v33, %v8177_v52  ;;  %v1598_v46 = vmax.f32 %v1590_v58, 0.0  ;;  %v1596_v18 = vmax.f32 %v1588_v32, 0.0 }
 0xad5   :  { %v1597_v24 = vmax.f32 %v1589_v63, 0.0  ;;  %v1592_v7 = vadd.f32 %v1581_v14, %v8175_v49  ;;  %v1599_v34 = vmax.f32 %v1591_v10, 0.0  ;;  %v1593_v37 = vadd.f32 %v1581_v14, %v8181_v59 }
 0xad6   :  { %v1613_v13 = vsel %vm258_vm1, %v1603_v15, 0.0  ;;  %v1610_v26 = vsel %vm258_vm1, %v1602_v44, 0.0  ;;  %v1606_v12 = vmul.f32 %v1598_v46, %v8177_v52  ;;  %v1604_v60 = vmul.f32 %v1596_v18, %v8177_v52 }
 0xad7   :  { %1614 = vadd.xlane.f32.xlu1 %v1613_v13  ;;  %1611 = vadd.xlane.f32.xlu0 %v1610_v26  ;;  %v1600_v27 = vmax.f32 %v1592_v7, 0.0  ;;  %v1605_v48 = vmul.f32 %v1597_v24, %v8177_v52  ;;  %v1607_v15 = vmul.f32 %v1599_v34, %v8177_v52  ;;  %v1601_v44 = vmax.f32 %v1593_v37, 0.0 }
 0xad8   :  { %v1622_v61 = vsel %vm258_vm1, %v1606_v12, 0.0  ;;  %v1616_v33 = vsel %vm258_vm1, %v1604_v60, 0.0 }
 0xad9   :  { %v1608_v58 = vmul.f32 %v1600_v27, %v8177_v52  ;;  %v1619_v32 = vsel %vm258_vm1, %v1605_v48, 0.0  ;;  %v1625_v14 = vsel %vm258_vm1, %v1607_v15, 0.0  ;;  %v1609_v46 = vmul.f32 %v1601_v44, %v8177_v52 }
 0xadb   :  { %1623 = vadd.xlane.f32.xlu1 %v1622_v61  ;;  %1617 = vadd.xlane.f32.xlu0 %v1616_v33  ;;  %v1628_v63 = vsel %vm258_vm1, %v1608_v58, 0.0  ;;  %v1631_v18 = vsel %vm258_vm1, %v1609_v46, 0.0 }
 0xadf   :  { %1620 = vadd.xlane.f32.xlu0 %v1619_v32  ;;  %1629 = vadd.xlane.f32.xlu1 %v1628_v63 }
 0xae3   :  { %1626 = vadd.xlane.f32.xlu0 %v1625_v14 }
 0xae7   :  { %1632 = vadd.xlane.f32.xlu0 %v1631_v18 }
 0xb64   :  { %v1612_v24 = vpop.xlane.xlu0 %1611  ;;  %v1615_v7 = vpop.xlane.xlu1 %1614 }
 0xb65   :  { %v1649_v27 = vrot.slane %v1615_v7, %v8211_v62  ;;  %v1645_v34 = vrot.slane %v1612_v24, %v8215_v1 }
 0xb67   :  { %v1650_v63 = vsel %vm802_vm8, %v1649_v27, %v1645_v34 }
 0xb68   :  { %v1618_v10 = vpop.xlane.xlu0 %1617  ;;  %v1624_v13 = vpop.xlane.xlu1 %1623 }
 0xb69   :  { %v1654_v37 = vrot.slane %v1618_v10, %v8215_v1  ;;  %v1663_v61 = vrot.slane %v1624_v13, %v8215_v1 }
 0xb6c   :  { %v1621_v26 = vpop.xlane.xlu0 %1620  ;;  %v1630_v33 = vpop.xlane.xlu1 %1629 }
 0xb6d   :  { %v1658_v12 = vrot.slane %v1621_v26, %v8211_v62  ;;  %v1672_v15 = vrot.slane %v1630_v33, %v8215_v1 }
 0xb6f   :  { %v1659_v48 = vsel %vm802_vm8, %v1658_v12, %v1654_v37 }
 0xb70   :  { %v1627_v60 = vpop.xlane.xlu0 %1626  ;;  %v1678_v14 = vsel %vm316_vm3, %v1659_v48, %v1650_v63 }
 0xb71   :  { %v1667_v52 = vrot.slane %v1627_v60, %v8211_v62 }
 0xb73   :  { %v1668_v32 = vsel %vm802_vm8, %v1667_v52, %v1663_v61 }
 0xb74   :  { %v1633_v58 = vpop.xlane.xlu0 %1632  ;;  %v1679_v18 = vsel %vm318_vm4, %v1668_v32, %v1678_v14 }
 0xb75   :  { %v1676_v44 = vrot.slane %v1633_v58, %v8211_v62 }
 0xb77   :  { %v1677_v46 = vsel %vm802_vm8, %v1676_v44, %v1672_v15 }
 0xb78   :  { %v1680_v11 = vsel %vm320_vm5, %v1677_v46, %v1679_v18 }
 0xb79   :  { %v1682_v0 = vsel %vm589_vm7, %v1680_v11, -inf }
 0xb7a   :  { %1683 = vmax.xlane.f32.xlu1 %v1682_v0 }
 0xc07   :  { %v1684_v12 = vpop.xlane.xlu1 %1683 }
 0xc08   :  { %v1689_v37 = vrot.slane %v1684_v12, %v8128_v54  ;;  %v1693_v27 = vrot.slane %v1684_v12, %v8234_v45  ;;  %v1697_v34 = vrot.slane %v1684_v12, %v8239_v57  ;;  %v1701_v32 = vrot.slane %v1684_v12, %v8243_v19 }
 0xc0a   :  { %v1706_v52 = vsub.f32 %v1612_v24, %v1689_v37  ;;  %v1707_v61 = vsub.f32 %v1615_v7, %v1689_v37  ;;  %v1709_v55 = vsub.f32 %v1621_v26, %v1693_v27  ;;  %v1708_v48 = vsub.f32 %v1618_v10, %v1693_v27 }
 0xc0b   :  { %v1711_v44 = vsub.f32 %v1627_v60, %v1697_v34  ;;  %v1710_v11 = vsub.f32 %v1624_v13, %v1697_v34  ;;  %v1713_v46 = vsub.f32 %v1633_v58, %v1701_v32  ;;  %v1712_v8 = vsub.f32 %v1630_v33, %v1701_v32 }
 0xc0c   :  { %v1714_v63 = vmul.f32 1.442695, %v1706_v52  ;;  %v1716_v15 = vmul.f32 1.442695, %v1707_v61  ;;  %v1720_v14 = vmul.f32 1.442695, %v1709_v55 }
 0xc0d   :  { %v1718_v0 = vmul.f32 1.442695, %v1708_v48  ;;  %v1724_v18 = vmul.f32 1.442695, %v1711_v44  ;;  %v1722_v47 = vmul.f32 1.442695, %v1710_v11 }
 0xc0e   :  { %7371 = vpow2.f32 %v1714_v63  ;;  %v1728_v24 = vmul.f32 1.442695, %v1713_v46  ;;  %v1726_v7 = vmul.f32 1.442695, %v1712_v8 }
 0xc0f   :  { %7373 = vpow2.f32 %v1716_v15 }
 0xc10   :  { %7375 = vpow2.f32 %v1720_v14 }
 0xc11   :  { %7377 = vpow2.f32 %v1718_v0 }
 0xc12   :  { %7379 = vpow2.f32 %v1724_v18 }
 0xc13   :  { %7381 = vpow2.f32 %v1722_v47 }
 0xc14   :  { %7383 = vpow2.f32 %v1728_v24 }
 0xc15   :  { %7385 = vpow2.f32 %v1726_v7 }
 0xc18   :  { %v7372_v10 = vpop.eup %7371 }
 0xc19   :  { %v7374_v26 = vpop.eup %7373  ;;  %1739 = vperm.xlu0 %7319, %v7372_v10  }
 0xc1a   :  { %1742 = vperm.xlu1 %7318, %v7374_v26   ;;  %v7376_v55 = vpop.eup %7375 }
 0xc1b   :  { %v7378_v13 = vpop.eup %7377 }
 0xc1c   :  { %v7380_v60 = vpop.eup %7379 }
 0xc1d   :  { %1748 = vperm.xlu0 %7319, %v7376_v55   ;;  %v7382_v58 = vpop.eup %7381 }
 0xc1e   :  { %1745 = vperm.xlu1 %7318, %v7378_v13   ;;  %v7384_v33 = vpop.eup %7383 }
 0xc1f   :  { %v7386_v12 = vpop.eup %7385 }
 0xc21   :  { %1754 = vperm.xlu0 %7319, %v7380_v60  }
 0xc22   :  { %1751 = vperm.xlu1 %7318, %v7382_v58  }
 0xc25   :  { %1760 = vperm.xlu0 %7319, %v7384_v33  }
 0xc26   :  { %1757 = vperm.xlu1 %7318, %v7386_v12  }
 0xc98   :  { %v1740_v47 = vpop.permute.xlu0 %1739 }
 0xc99   :  { %v1743_v8 = vpop.permute.xlu1 %1742  ;;  %v1765_v32 = vrot.slane %v1740_v47, %v8215_v1 }
 0xc9a   :  { %v1769_v15 = vrot.slane %v1743_v8, %v8211_v62 }
 0xc9c   :  { %v1749_v37 = vpop.permute.xlu0 %1748  ;;  %v1770_v24 = vsel %vm802_vm8, %v1769_v15, %v1765_v32 }
 0xc9d   :  { %v1746_v27 = vpop.permute.xlu1 %1745  ;;  %v1778_v52 = vrot.slane %v1749_v37, %v8211_v62 }
 0xc9e   :  { %v1774_v34 = vrot.slane %v1746_v27, %v8215_v1 }
 0xca0   :  { %v1755_v61 = vpop.permute.xlu0 %1754  ;;  %v1779_v14 = vsel %vm802_vm8, %v1778_v52, %v1774_v34 }
 0xca1   :  { %v1752_v48 = vpop.permute.xlu1 %1751  ;;  %v1787_v63 = vrot.slane %v1755_v61, %v8211_v62  ;;  %v1798_v37 = vsel %vm316_vm3, %v1779_v14, %v1770_v24 }
 0xca2   :  { %v1783_v44 = vrot.slane %v1752_v48, %v8215_v1 }
 0xca4   :  { %v1761_v11 = vpop.permute.xlu0 %1760  ;;  %v1788_v18 = vsel %vm802_vm8, %v1787_v63, %v1783_v44 }
 0xca5   :  { %v1758_v0 = vpop.permute.xlu1 %1757  ;;  %v1796_v46 = vrot.slane %v1761_v11, %v8211_v62  ;;  %v1799_v47 = vsel %vm318_vm4, %v1788_v18, %v1798_v37 }
 0xca6   :  { %v1792_v7 = vrot.slane %v1758_v0, %v8215_v1 }
 0xca8   :  { %v1797_v8 = vsel %vm802_vm8, %v1796_v46, %v1792_v7 }
 0xca9   :  { %v1800_v27 = vsel %vm320_vm5, %v1797_v8, %v1799_v47 }
 0xcaa   :  { %v1802_v34 = vsel %vm589_vm7, %v1800_v27, 0.0 }
 0xcab   :  { %1803 = vadd.xlane.f32.xlu1 %v1802_v34 }
 0xd38   :  { %v1804_v52 = vpop.xlane.xlu1 %1803 }
 0xd39   :  { %7387 = vrcp.f32 %v1804_v52 }
 0xd43   :  { %v7388_v61 = vpop.eup %7387 }
 0xd44   :  { %v1810_v48 = vrot.slane %v7388_v61, %v8128_v54  ;;  %v1814_v32 = vrot.slane %v7388_v61, %v8234_v45 }
 0xd46   :  { %v8446_v63 = vmul.f32 %v7372_v10, %v1810_v48  ;;  %v8448_v15 = vmul.f32 %v7374_v26, %v1810_v48  ;;  %v8453_v11 = vmul.f32 %v7378_v13, %v1814_v32  ;;  %v8455_v0 = vmul.f32 %v7376_v55, %v1814_v32 }
 0xd47   :  { %v1818_v10 = vrot.slane %v7388_v61, %v8239_v57  ;;  %v1822_v55 = vrot.slane %v7388_v61, %v8243_v19 }
 0xd48   :  { %9745 = vst [vmem:[#allocation32_spill] sm:$0xff] %v8446_v63  ;;  %9746 = vst [vmem:[#allocation33_spill] sm:$0xff] %v8448_v15  ;;  %v1912_v44 = vpack.c.bf16 %v8448_v15, %v8446_v63  ;;  %v1913_v18 = vpack.c.bf16 %v8455_v0, %v8453_v11 }
 0xd49   :  { %9747 = vst [vmem:[#allocation34_spill] sm:$0xff] %v8453_v11  ;;  %9748 = vst [vmem:[#allocation35_spill] sm:$0xff] %v8455_v0  ;;  %v8460_v24 = vmul.f32 %v7382_v58, %v1818_v10  ;;  %v8462_v7 = vmul.f32 %v7380_v60, %v1818_v10  ;;  %v8467_v47 = vmul.f32 %v7386_v12, %v1822_v55  ;;  %v9754_v10 = vmov 0.0|0.0  }
 0xd4a   :  { %v1917_v14 = vunpack.c.l.b16 %v1912_v44  ;;  %v1918_v46 = vunpack.c.h.b16 %v1912_v44  ;;  %v1979_v26 = vunpack.c.l.b16 %v1913_v18  ;;  %v1980_v37 = vunpack.c.h.b16 %v1913_v18 }
 0xd4b   :  { %9749 = vst [vmem:[#allocation36_spill] sm:$0xff] %v8460_v24  ;;  %9750 = vst [vmem:[#allocation37_spill] sm:$0xff] %v8462_v7  ;;  %v1914_v13 = vpack.c.bf16 %v8462_v7, %v8460_v24  ;;  %v8469_v27 = vmul.f32 %v7384_v33, %v1822_v55 }
 0xd4c   :  { %1920 = vperm.xlu0 %7319, %v1917_v14   ;;  %9751 = vst [vmem:[#allocation38_spill] sm:$0xff] %v8467_v47 }
 0xd4d   :  { %v2041_v8 = vunpack.c.l.b16 %v1914_v13  ;;  %9752 = vst [vmem:[#allocation39_spill] sm:$0xff] %v8469_v27  ;;  %v2042_v34 = vunpack.c.h.b16 %v1914_v13  ;;  %v1915_v58 = vpack.c.bf16 %v8469_v27, %v8467_v47 }
 0xd4f   :  { %v2103_v60 = vunpack.c.l.b16 %v1915_v58  ;;  %v2104_v52 = vunpack.c.h.b16 %v1915_v58 }
 0xd50   :  { %1923 = vperm.xlu0 %7319, %v1918_v46   ;;  %v9753_v46 = vmov 0.0  }
 0xd54   :  { %1982 = vperm.xlu0 %7319, %v1979_v26  }
 0xd58   :  { %1985 = vperm.xlu0 %7319, %v1980_v37  }
 0xd5c   :  { %2044 = vperm.xlu0 %7319, %v2041_v8  }
 0xd60   :  { %2047 = vperm.xlu0 %7319, %v2042_v34  }
 0xd64   :  { %2106 = vperm.xlu0 %7319, %v2103_v60  }
 0xd68   :  { %2109 = vperm.xlu0 %7319, %v2104_v52  }
 0xdcb   :  { %v1921_v48 = vpop.permute.xlu0 %1920 }
 0xdcc   :  { %v1928_v61 = vrot.slane %v1921_v48, %v8215_v1 }
 0xdcf   :  { %v1924_v32 = vpop.permute.xlu0 %1923 }
 0xdd0   :  { %v1932_v44 = vrot.slane %v1924_v32, %v8211_v62 }
 0xdd2   :  { %v1933_v12 = vsel %vm802_vm8, %v1932_v44, %v1928_v61 }
 0xdd3   :  { %v1934_v33 = vpack.c.b16 %v1933_v12, %v1933_v12  ;;  %v1983_v14 = vpop.permute.xlu0 %1982 }
 0xdd4   :  { %v1990_v26 = vrot.slane %v1983_v14, %v8215_v1 }
 0xdd5   :  { %6980 = vmatmul.mubr.msk.bf16.vlgmr.msra.gmra.mrb[20].mxu0 %vm1089_vm9, %v1934_v33 }
 0xdd6   :  { %6990 = vmatpush3.bf16.msra.mxu0 %v8025_v5  ;;  %6991 = vmatprep.mubr.msk.bf16.mxu0 %vm7800_vm0, %v9753_v46 }
 0xdd7   :  { %v1986_v18 = vpop.permute.xlu0 %1985  ;;  %7209 = vmatprep.subr.bf16.mxu0 %v9754_v10 }
 0xdd8   :  { %v1994_v37 = vrot.slane %v1986_v18, %v8211_v62 }
 0xdda   :  { %v1995_v13 = vsel %vm802_vm8, %v1994_v37, %v1990_v26 }
 0xddb   :  { %v1996_v55 = vpack.c.b16 %v1995_v13, %v1995_v13  ;;  %v2045_v8 = vpop.permute.xlu0 %2044 }
 0xddc   :  { %v2052_v58 = vrot.slane %v2045_v8, %v8215_v1 }
 0xddd   :  { %6986 = vmatmul.mubr.msk.bf16.vlgmr.msra.gmra.mrb[24].mxu1 %vm1089_vm9, %v1996_v55 }
 0xdde   :  { %6996 = vmatpush3.bf16.msra.mxu1 %v8031_v6  ;;  %6997 = vmatprep.mubr.msk.bf16.mxu1 %vm7800_vm0, %v9753_v46 }
 0xddf   :  { %v2048_v34 = vpop.permute.xlu0 %2047 }
 0xde0   :  { %v2056_v60 = vrot.slane %v2048_v34, %v8211_v62 }
 0xde2   :  { %v2057_v52 = vsel %vm802_vm8, %v2056_v60, %v2052_v58 }
 0xde3   :  { %v2058_v48 = vpack.c.b16 %v2057_v52, %v2057_v52  ;;  %v2107_v32 = vpop.permute.xlu0 %2106 }
 0xde4   :  { %v2114_v44 = vrot.slane %v2107_v32, %v8215_v1 }
 0xde5   :  { %6992 = vmatmul.mubr.msk.bf16.vlgmr.msra.gmra.mrb[24].mxu0 %vm1089_vm9, %v2058_v48 }
 0xde6   :  { %7211 = vmatpush3.bf16.msra.mxu0 %v8323_v28  ;;  %7009 = vmatprep.mubr.msk.f32.mxu0 %vm7800_vm0, %v9753_v46 }
 0xde7   :  { %v2110_v61 = vpop.permute.xlu0 %2109  ;;  %7212 = vmatprep.subr.bf16.mxu0 %v9754_v10 }
 0xde8   :  { %v2118_v12 = vrot.slane %v2110_v61, %v8211_v62 }
 0xdea   :  { %v2119_v33 = vsel %vm802_vm8, %v2118_v12, %v2114_v44  ;;  %7214 = vmatpush3.bf16.msra.mxu0 %v8328_v56 }
 0xdeb   :  { %v2120_v14 = vpack.c.b16 %v2119_v33, %v2119_v33  ;;  %7012 = vmatprep.subr.bf16.mxu0 %v9753_v46 }
 0xded   :  { %6998 = vmatmul.mubr.msk.bf16.vlgmr.msra.gmra.mrb[28].mxu1 %vm1089_vm9, %v2120_v14 }
 0xdee   :  { %2376 = vmatprep.mubr.f32.mxu1 %v9753_v46 }
 0xea8   :  { %v1972_v28 = vpop.f32.mrb[20].mxu0 }
 0xea9   :  { %v6981_v18 = vpop.f32.mrb[21].mxu0 }
 0xeaa   :  { %v1975_v26 = vpop.f32.mrb[22].mxu0 }
 0xeab   :  { %v6982_v37 = vpop.f32.mrb[23].mxu0 }
 0xeb0   :  { %v2034_v13 = vpop.f32.mrb[24].mxu1 }
 0xeb1   :  { %v2168_v55 = vrot.slane %v2034_v13, 7  ;;  %v6987_v8 = vpop.f32.mrb[25].mxu1  ;;  %v2262_v13 = vrot.slane %v8370_v16, 4 }
 0xeb2   :  { %v2037_v34 = vpop.f32.mrb[26].mxu1 }
 0xeb3   :  { %v2169_v58 = vsel %vm316_vm3, %v2168_v55, %v1972_v28  ;;  %v6988_v60 = vpop.f32.mrb[27].mxu1  ;;  %v2263_v28 = vrot.slane %v8373_v23, 4  ;;  %v6748_v55 = vmul.f32 -1.442695, %v8370_v16 }
 0xeb5   :  { %7389 = vpow2.f32 %v6748_v55 }
 0xeb8   :  { %v2096_v52 = vpop.f32.mrb[24].mxu0 }
 0xeb9   :  { %v2170_v56 = vrot.slane %v2096_v52, 6  ;;  %v6993_v48 = vpop.f32.mrb[25].mxu0 }
 0xeba   :  { %v2099_v32 = vpop.f32.mrb[26].mxu0 }
 0xebb   :  { %v6994_v61 = vpop.f32.mrb[27].mxu0  ;;  %v2171_v44 = vsel %vm318_vm4, %v2170_v56, %v2169_v58 }
 0xebf   :  { %v7390_v8 = vpop.eup %7389 }
 0xec0   :  { %v2158_v12 = vpop.f32.mrb[28].mxu1  ;;  %v1538_v34 = vadd.f32 1.0, %v7390_v8  ;;  %v2279_v8 = vrot.slane %v8358_v50, 4  ;;  %v2304_v50 = vld [vmem:[#allocation8 + $0x30] sm:$0xff] }
 0xec1   :  { %v2172_v33 = vrot.slane %v2158_v12, 5  ;;  %v6999_v14 = vpop.f32.mrb[29].mxu1 }
 0xec2   :  { %v2161_v18 = vpop.f32.mrb[30].mxu1  ;;  %7391 = vrcp.f32 %v1538_v34 }
 0xec3   :  { %v7000_v26 = vpop.f32.mrb[31].mxu1  ;;  %v2173_v37 = vsel %vm320_vm5, %v2172_v33, %v2171_v44 }
 0xec4   :  { %2174 = vrot.lane.b32.xlu0 %v2173_v37, %s7804_s11 }
 0xec8   :  { %2264 = vrot.lane.b32.xlu0 %v2262_v13, %s7792_s16 }
 0xecc   :  { %2266 = vrot.lane.b32.xlu0 %v2263_v28, %s7792_s16  ;;  %v7392_v58 = vpop.eup %7391 }
 0xf36   :  { %v2175_v60 = vpop.permute.xlu0 %2174 }
 0xf37   :  { %v2177_v52 = vmul.f32 %v7392_v58, %v2175_v60  ;;  %v2299_v60 = vld [vmem:[#allocation8 + $0x8] sm:$0xff] }
 0xf39   :  { %2183 = vrot.lane.b32.xlu1 %v2177_v52, %s7805_s17  ;;  %v2301_v52 = vld [vmem:[#allocation8 + $0x18] sm:$0xff] }
 0xf3a   :  { %v2265_v16 = vpop.permute.xlu0 %2264 }
 0xf3e   :  { %v2267_v48 = vpop.permute.xlu0 %2266 }
 0xf3f   :  { %v2268_v12 = vsel %vm1421_vm10, %v2265_v16, %v2267_v48  ;;  %v8526_v16 = vpack.c.bf16 %v2301_v52, %v2299_v60  ;;  %v2303_v48 = vld [vmem:[#allocation8 + $0x28] sm:$0xff] }
 0xf41   :  { %7216 = vmatprep.subr.bf16.mxu1 %v8526_v16 }
 0xfab   :  { %v2184_v56 = vpop.permute.xlu1 %2183 }
 0xfac   :  { %7010 = vmatmul.mubr.msk.f32.vlgmr.msra.gmra.mrb[28].mxu0 %vm258_vm1, %v2184_v56  ;;  %v2298_v56 = vld [vmem:[#allocation8] sm:$0xff] }
 0xfad   :  { %7013 = vmatpush3.bf16.msra.mxu0 %v8015_v3  ;;  %7014 = vmatprep.mubr.msk.bf16.mxu0 %vm7800_vm0, %v9753_v46 }
 0xfae   :  { %7024 = vmatprep.subr.bf16.mxu0 %v9753_v46 }
0x107f   :  { %v2253_v23 = vpop.f32.mrb[28].mxu0 }
0x1080   :  { %v2258_v32 = vrot.slane %v2253_v23, 4  ;;  %v7011_v61 = vpop.f32.mrb[29].mxu0  ;;  %v2300_v23 = vld [vmem:[#allocation8 + $0x10] sm:$0xff] }
0x1081   :  { %v8528_v61 = vpack.c.bf16 %v2300_v23, %v2298_v56 }
0x1082   :  { %v2260_v44 = vadd.f32 %v2258_v32, %v8351_v25  ;;  %v2305_v32 = vld [vmem:[#allocation8 + $0x38] sm:$0xff] }
0x1083   :  { %7218 = vmatpush1.bf16.msra.mxu1 %v8528_v61 }
0x1084   :  { %v2270_v33 = vadd.f32 %v2268_v12, %v2260_v44  ;;  %v8530_v44 = vpack.c.bf16 %v2305_v32, %v2303_v48  ;;  %v2302_v12 = vld [vmem:[#allocation8 + $0x20] sm:$0xff] }
0x1086   :  { %7393 = vtanh.f32 %v2270_v33  ;;  %v6754_v18 = vmul.f32 -1.442695, %v2270_v33  ;;  %v8534_v33 = vpack.c.bf16 %v2304_v50, %v2302_v12  ;;  %7220 = vmatprep.subr.bf16.mxu1 %v8530_v44 }
0x1088   :  { %7395 = vpow2.f32 %v6754_v18  ;;  %7222 = vmatpush1.bf16.msra.mxu1 %v8534_v33 }
0x1089   :  { %7018 = vmatprep.subr.bf16.mxu1 %v9753_v46 }
0x1090   :  { %v7394_v14 = vpop.eup %7393 }
0x1091   :  { %2283 = vrot.lane.b32.xlu0 %v7394_v14, %s7792_s16 }
0x1092   :  { %v7396_v26 = vpop.eup %7395 }
0x1093   :  { %v2274_v37 = vadd.f32 1.0, %v7396_v26 }
0x1095   :  { %7397 = vrcp.f32 %v2274_v37 }
0x109f   :  { %v7398_v13 = vpop.eup %7397 }
0x10a0   :  { %v2281_v25 = vmul.f32 %v7398_v13, %v2279_v8 }
0x1103   :  { %v2284_v28 = vpop.permute.xlu0 %2283 }
0x1104   :  { %v2286_v55 = vmul.f32 %v7398_v13, %v2284_v28 }
0x1106   :  { %2288 = vrot.lane.b32.xlu0 %v2286_v55, %s7804_s11 }
0x1178   :  { %v2289_v34 = vpop.permute.xlu0 %2288 }
0x1179   :  { %v8523_v58 = vadd.f32 %v2289_v34, %v2281_v25 }
0x117b   :  { %7399 = vtanh.f32 %v8523_v58 }
0x1185   :  { %v7400_v14 = vpop.eup %7399 }
0x1186   :  { %2294 = vrot.lane.b32.xlu1 %v7400_v14, %s7792_s16 }
0x11f8   :  { %v2295_v18 = vpop.permute.xlu1 %2294 }
0x11f9   :  { %v2297_v26 = vmul.f32 %v7398_v13, %v2295_v18 }
0x11fb   :  { %v2307_v37 = vrot.slane %v2297_v26, 4 }
0x11fd   :  { %2308 = vrot.lane.b32.xlu0 %v2307_v37, %s7804_s11 }
0x126f   :  { %v2309_v28 = vpop.permute.xlu0 %2308 }
0x1270   :  { %6755 = vmatmul.mubr.msk.f32.vlgmr.msra.gmra.mrb[22].mxu1 %vm258_vm1, %v2309_v28 }
0x1271   :  { %7019 = vmatpush3.bf16.msra.mxu1 %v8020_v4  ;;  %7020 = vmatprep.mubr.msk.bf16.mxu1 %vm7800_vm0, %v9753_v46 }
0x1272   :  { %7030 = vmatprep.subr.bf16.mxu1 %v9753_v46 }
0x1343   :  { %v2378_v55 = vpop.f32.mrb[22].mxu1 }
0x1344   :  { %v8547_v8 = vadd.f32 %v2378_v55, %v8144_v20  ;;  %v8549_v25 = vpop.f32.mrb[23].mxu1 }
0x1346   :  { %v2401_v13 = vrot.slane %v8547_v8, %v8147_v21 }
0x1348   :  { %v2402_v34 = vcombine.high %v2401_v13, %v2401_v13  ;;  %v2409_v60 = vrot.slane %v2401_v13, %v8147_v21 }
0x134a   :  { %v2422_v52 = vrot.slane %v2409_v60, %v8128_v54  ;;  %v2417_v56 = vcombine.high %v2409_v60, %v2409_v60  ;;  %v2416_v23 = vrot.slane %v2402_v34, %v8147_v21  ;;  %v8564_v34 = vld [vmem:[#allocation13 + $0x5] ss:$0 sm:$0xff] }
0x134c   :  { %v2440_v48 = vadd.f32 %v2422_v52, %v8159_v31  ;;  %v2439_v32 = vadd.f32 %v2422_v52, %v8157_v30  ;;  %v2430_v12 = vrot.slane %v2417_v56, %v8128_v54  ;;  %v2426_v50 = vrot.slane %v2416_v23, %v8128_v54 }
0x134d   :  { %v2418_v14 = vcombine.high %v2416_v23, %v2416_v23 }
0x134e   :  { %v2448_v18 = vmax.f32 %v2440_v48, 0.0  ;;  %v2447_v26 = vmax.f32 %v2439_v32, 0.0  ;;  %v2443_v37 = vadd.f32 %v2430_v12, %v8167_v41  ;;  %v2441_v28 = vadd.f32 %v2426_v50, %v8163_v38 }
0x134f   :  { %v2442_v55 = vadd.f32 %v2426_v50, %v8165_v40  ;;  %v2434_v13 = vrot.slane %v2418_v14, %v8128_v54  ;;  %v2444_v48 = vadd.f32 %v2430_v12, %v8169_v43 }
0x1350   :  { %v2456_v60 = vmul.f32 %v8564_v34, %v2448_v18  ;;  %v2455_v52 = vmul.f32 %v8564_v34, %v2447_v26  ;;  %v2451_v56 = vmax.f32 %v2443_v37, 0.0  ;;  %v2449_v27 = vmax.f32 %v2441_v28, 0.0 }
0x1351   :  { %v2450_v7 = vmax.f32 %v2442_v55, 0.0  ;;  %v2445_v23 = vadd.f32 %v2434_v13, %v8175_v49  ;;  %v2452_v15 = vmax.f32 %v2444_v48, 0.0  ;;  %v2446_v26 = vadd.f32 %v2434_v13, %v8181_v59 }
0x1352   :  { %v2466_v32 = vsel %vm258_vm1, %v2456_v60, 0.0  ;;  %v2463_v0 = vsel %vm258_vm1, %v2455_v52, 0.0  ;;  %v2459_v50 = vmul.f32 %v8564_v34, %v2451_v56  ;;  %v2457_v14 = vmul.f32 %v8564_v34, %v2449_v27 }
0x1353   :  { %2467 = vadd.xlane.f32.xlu0 %v2466_v32  ;;  %2464 = vadd.xlane.f32.xlu1 %v2463_v0  ;;  %v2453_v18 = vmax.f32 %v2445_v23, 0.0  ;;  %v2458_v12 = vmul.f32 %v8564_v34, %v2450_v7  ;;  %v2460_v0 = vmul.f32 %v8564_v34, %v2452_v15  ;;  %v2454_v52 = vmax.f32 %v2446_v26, 0.0 }
0x1354   :  { %v2475_v37 = vsel %vm258_vm1, %v2459_v50, 0.0  ;;  %v2469_v28 = vsel %vm258_vm1, %v2457_v14, 0.0 }
0x1355   :  { %v2461_v55 = vmul.f32 %v8564_v34, %v2453_v18  ;;  %v2472_v60 = vsel %vm258_vm1, %v2458_v12, 0.0  ;;  %v2478_v13 = vsel %vm258_vm1, %v2460_v0, 0.0  ;;  %v2462_v56 = vmul.f32 %v8564_v34, %v2454_v52 }
0x1357   :  { %2476 = vadd.xlane.f32.xlu1 %v2475_v37  ;;  %2470 = vadd.xlane.f32.xlu0 %v2469_v28  ;;  %v2481_v27 = vsel %vm258_vm1, %v2461_v55, 0.0  ;;  %v2484_v7 = vsel %vm258_vm1, %v2462_v56, 0.0 }
0x135b   :  { %2473 = vadd.xlane.f32.xlu0 %v2472_v60  ;;  %2482 = vadd.xlane.f32.xlu1 %v2481_v27 }
0x135f   :  { %2479 = vadd.xlane.f32.xlu0 %v2478_v13 }
0x1363   :  { %2485 = vadd.xlane.f32.xlu0 %v2484_v7 }
0x13e0   :  { %v2468_v23 = vpop.xlane.xlu0 %2467  ;;  %v2465_v48 = vpop.xlane.xlu1 %2464 }
0x13e1   :  { %v2502_v15 = vrot.slane %v2468_v23, %v8211_v62  ;;  %v2498_v26 = vrot.slane %v2465_v48, %v8215_v1 }
0x13e3   :  { %v2503_v13 = vsel %vm802_vm8, %v2502_v15, %v2498_v26 }
0x13e4   :  { %v2471_v32 = vpop.xlane.xlu0 %2470  ;;  %v2477_v50 = vpop.xlane.xlu1 %2476 }
0x13e5   :  { %v2507_v28 = vrot.slane %v2471_v32, %v8215_v1  ;;  %v2516_v55 = vrot.slane %v2477_v50, %v8215_v1 }
0x13e8   :  { %v2474_v14 = vpop.xlane.xlu0 %2473  ;;  %v2483_v60 = vpop.xlane.xlu1 %2482 }
0x13e9   :  { %v2511_v18 = vrot.slane %v2474_v14, %v8211_v62  ;;  %v2525_v56 = vrot.slane %v2483_v60, %v8215_v1 }
0x13eb   :  { %v2512_v27 = vsel %vm802_vm8, %v2511_v18, %v2507_v28 }
0x13ec   :  { %v2480_v37 = vpop.xlane.xlu0 %2479  ;;  %v2531_v29 = vsel %vm316_vm3, %v2512_v27, %v2503_v13 }
0x13ed   :  { %v2520_v12 = vrot.slane %v2480_v37, %v8211_v62 }
0x13ef   :  { %v2521_v52 = vsel %vm802_vm8, %v2520_v12, %v2516_v55 }
0x13f0   :  { %v2486_v0 = vpop.xlane.xlu0 %2485  ;;  %v2532_v47 = vsel %vm318_vm4, %v2521_v52, %v2531_v29 }
0x13f1   :  { %v2529_v7 = vrot.slane %v2486_v0, %v8211_v62 }
0x13f3   :  { %v2530_v17 = vsel %vm802_vm8, %v2529_v7, %v2525_v56 }
0x13f4   :  { %v2533_v24 = vsel %vm320_vm5, %v2530_v17, %v2532_v47 }
0x13f5   :  { %v2535_v11 = vsel %vm589_vm7, %v2533_v24, -inf }
0x13f6   :  { %2536 = vmax.xlane.f32.xlu1 %v2535_v11 }
0x1483   :  { %v2537_v18 = vpop.xlane.xlu1 %2536 }
0x1484   :  { %v2542_v28 = vrot.slane %v2537_v18, %v8128_v54  ;;  %v2546_v15 = vrot.slane %v2537_v18, %v8234_v45  ;;  %v2550_v26 = vrot.slane %v2537_v18, %v8239_v57  ;;  %v2554_v12 = vrot.slane %v2537_v18, %v8243_v19 }
0x1486   :  { %v2559_v55 = vsub.f32 %v2465_v48, %v2542_v28  ;;  %v2560_v27 = vsub.f32 %v2468_v23, %v2542_v28  ;;  %v2561_v13 = vsub.f32 %v2471_v32, %v2546_v15  ;;  %v2563_v56 = vsub.f32 %v2477_v50, %v2550_v26 }
0x1487   :  { %v2565_v52 = vsub.f32 %v2483_v60, %v2554_v12  ;;  %v2562_v24 = vsub.f32 %v2474_v14, %v2546_v15  ;;  %v2564_v63 = vsub.f32 %v2480_v37, %v2550_v26  ;;  %v2566_v35 = vsub.f32 %v2486_v0, %v2554_v12 }
0x1488   :  { %v2567_v7 = vmul.f32 1.442695, %v2559_v55  ;;  %v2569_v29 = vmul.f32 1.442695, %v2560_v27  ;;  %v2575_v17 = vmul.f32 1.442695, %v2563_v56 }
0x1489   :  { %v2571_v11 = vmul.f32 1.442695, %v2561_v13  ;;  %v2579_v47 = vmul.f32 1.442695, %v2565_v52  ;;  %v2573_v2 = vmul.f32 1.442695, %v2562_v24 }
0x148a   :  { %7401 = vpow2.f32 %v2567_v7  ;;  %v2577_v48 = vmul.f32 1.442695, %v2564_v63  ;;  %v2581_v50 = vmul.f32 1.442695, %v2566_v35 }
0x148b   :  { %7403 = vpow2.f32 %v2569_v29 }
0x148c   :  { %7405 = vpow2.f32 %v2575_v17 }
0x148d   :  { %7407 = vpow2.f32 %v2571_v11 }
0x148e   :  { %7409 = vpow2.f32 %v2579_v47 }
0x148f   :  { %7411 = vpow2.f32 %v2573_v2 }
0x1490   :  { %7413 = vpow2.f32 %v2577_v48 }
0x1491   :  { %7415 = vpow2.f32 %v2581_v50 }
0x1494   :  { %v7402_v23 = vpop.eup %7401 }
0x1495   :  { %v7404_v32 = vpop.eup %7403  ;;  %2592 = vperm.xlu0 %7319, %v7402_v23  }
0x1496   :  { %2595 = vperm.xlu1 %7318, %v7404_v32   ;;  %v7406_v60 = vpop.eup %7405 }
0x1497   :  { %v7408_v18 = vpop.eup %7407 }
0x1498   :  { %v7410_v14 = vpop.eup %7409 }
0x1499   :  { %2604 = vperm.xlu0 %7319, %v7406_v60   ;;  %v7412_v28 = vpop.eup %7411 }
0x149a   :  { %2598 = vperm.xlu1 %7318, %v7408_v18   ;;  %v7414_v37 = vpop.eup %7413 }
0x149b   :  { %v7416_v0 = vpop.eup %7415 }
0x149d   :  { %2610 = vperm.xlu0 %7319, %v7410_v14  }
0x149e   :  { %2601 = vperm.xlu1 %7318, %v7412_v28  }
0x14a2   :  { %2607 = vperm.xlu1 %7318, %v7414_v37  }
0x14a6   :  { %2613 = vperm.xlu1 %7318, %v7416_v0  }
0x1514   :  { %v2593_v63 = vpop.permute.xlu0 %2592 }
0x1515   :  { %v2596_v2 = vpop.permute.xlu1 %2595  ;;  %v2618_v13 = vrot.slane %v2593_v63, %v8215_v1 }
0x1516   :  { %v2622_v27 = vrot.slane %v2596_v2, %v8211_v62 }
0x1518   :  { %v2605_v26 = vpop.permute.xlu0 %2604  ;;  %v2623_v47 = vsel %vm802_vm8, %v2622_v27, %v2618_v13 }
0x1519   :  { %v2599_v15 = vpop.permute.xlu1 %2598  ;;  %v2636_v29 = vrot.slane %v2605_v26, %v8215_v1 }
0x151a   :  { %v2627_v56 = vrot.slane %v2599_v15, %v8215_v1 }
0x151c   :  { %v2611_v52 = vpop.permute.xlu0 %2610 }
0x151d   :  { %v2602_v12 = vpop.permute.xlu1 %2601  ;;  %v2645_v48 = vrot.slane %v2611_v52, %v8215_v1 }
0x151e   :  { %v2631_v35 = vrot.slane %v2602_v12, %v8211_v62 }
0x1520   :  { %v2632_v17 = vsel %vm802_vm8, %v2631_v35, %v2627_v56 }
0x1521   :  { %v2608_v55 = vpop.permute.xlu1 %2607  ;;  %v2651_v2 = vsel %vm316_vm3, %v2632_v17, %v2623_v47 }
0x1522   :  { %v2640_v7 = vrot.slane %v2608_v55, %v8211_v62 }
0x1524   :  { %v2641_v24 = vsel %vm802_vm8, %v2640_v7, %v2636_v29 }
0x1525   :  { %v2614_v11 = vpop.permute.xlu1 %2613  ;;  %v2652_v15 = vsel %vm318_vm4, %v2641_v24, %v2651_v2 }
0x1526   :  { %v2649_v50 = vrot.slane %v2614_v11, %v8211_v62 }
0x1528   :  { %v2650_v63 = vsel %vm802_vm8, %v2649_v50, %v2645_v48 }
0x1529   :  { %v2653_v26 = vsel %vm320_vm5, %v2650_v63, %v2652_v15 }
0x152a   :  { %v2655_v12 = vsel %vm589_vm7, %v2653_v26, 0.0 }
0x152b   :  { %2656 = vadd.xlane.f32.xlu0 %v2655_v12 }
0x15b8   :  { %v2657_v35 = vpop.xlane.xlu0 %2656 }
0x15b9   :  { %7417 = vrcp.f32 %v2657_v35 }
0x15c3   :  { %v7418_v55 = vpop.eup %7417 }
0x15c4   :  { %v2675_v27 = vrot.slane %v7418_v55, %v8243_v19  ;;  %v2663_v13 = vrot.slane %v7418_v55, %v8128_v54  ;;  %v2667_v56 = vrot.slane %v7418_v55, %v8234_v45 }
0x15c6   :  { %v8624_v7 = vmul.f32 %v7410_v14, %v2675_v27  ;;  %v8626_v29 = vmul.f32 %v7416_v0, %v2675_v27  ;;  %v8628_v52 = vmul.f32 %v7402_v23, %v2663_v13  ;;  %v8630_v17 = vmul.f32 %v7404_v32, %v2663_v13 }
0x15c7   :  { %v8636_v50 = vmul.f32 %v7408_v18, %v2667_v56  ;;  %v8638_v2 = vmul.f32 %v7412_v28, %v2667_v56  ;;  %v2671_v32 = vrot.slane %v7418_v55, %v8239_v57 }
0x15c8   :  { %9755 = vst [vmem:[#allocation40_spill] sm:$0xff] %v8624_v7  ;;  %9756 = vst [vmem:[#allocation41_spill] sm:$0xff] %v8626_v29  ;;  %v2768_v24 = vpack.c.bf16 %v8626_v29, %v8624_v7  ;;  %v2765_v11 = vpack.c.bf16 %v8630_v17, %v8628_v52 }
0x15c9   :  { %9757 = vst [vmem:[#allocation42_spill] sm:$0xff] %v8628_v52  ;;  %9758 = vst [vmem:[#allocation43_spill] sm:$0xff] %v8630_v17  ;;  %v2766_v23 = vpack.c.bf16 %v8638_v2, %v8636_v50  ;;  %v8643_v63 = vmul.f32 %v7406_v60, %v2671_v32  ;;  %v8645_v15 = vmul.f32 %v7414_v37, %v2671_v32 }
0x15ca   :  { %v2957_v47 = vunpack.c.h.b16 %v2768_v24  ;;  %v2770_v48 = vunpack.c.l.b16 %v2765_v11  ;;  %9759 = vst [vmem:[#allocation44_spill] sm:$0xff] %v8636_v50  ;;  %9760 = vst [vmem:[#allocation45_spill] sm:$0xff] %v8638_v2  ;;  %v2771_v14 = vunpack.c.h.b16 %v2765_v11  ;;  %v2956_v35 = vunpack.c.l.b16 %v2768_v24 }
0x15cb   :  { %v2832_v0 = vunpack.c.l.b16 %v2766_v23  ;;  %9761 = vst [vmem:[#allocation46_spill] sm:$0xff] %v8643_v63  ;;  %9762 = vst [vmem:[#allocation47_spill] sm:$0xff] %v8645_v15  ;;  %v2833_v26 = vunpack.c.h.b16 %v2766_v23  ;;  %v2767_v18 = vpack.c.bf16 %v8645_v15, %v8643_v63 }
0x15cc   :  { %2962 = vperm.xlu0 %7319, %v2957_v47   ;;  %2773 = vperm.xlu1 %7318, %v2770_v48  }
0x15cd   :  { %v2894_v28 = vunpack.c.l.b16 %v2767_v18  ;;  %v2895_v12 = vunpack.c.h.b16 %v2767_v18 }
0x15d0   :  { %2776 = vperm.xlu1 %7318, %v2771_v14  }
0x15d4   :  { %2835 = vperm.xlu1 %7318, %v2832_v0  }
0x15d8   :  { %2838 = vperm.xlu1 %7318, %v2833_v26  }
0x15dc   :  { %2897 = vperm.xlu1 %7318, %v2894_v28  }
0x15e0   :  { %2900 = vperm.xlu1 %7318, %v2895_v12  }
0x15e4   :  { %2959 = vperm.xlu1 %7318, %v2956_v35  }
0x164b   :  { %v2774_v27 = vpop.permute.xlu1 %2773  ;;  %v2963_v28 = vpop.permute.xlu0 %2962 }
0x164c   :  { %v2781_v13 = vrot.slane %v2774_v27, %v8215_v1 }
0x164f   :  { %v2777_v55 = vpop.permute.xlu1 %2776 }
0x1650   :  { %v2785_v60 = vrot.slane %v2777_v55, %v8211_v62  ;;  %v2971_v55 = vrot.slane %v2963_v28, %v8211_v62 }
0x1652   :  { %v2786_v37 = vsel %vm802_vm8, %v2785_v60, %v2781_v13 }
0x1653   :  { %v2787_v56 = vpack.c.b16 %v2786_v37, %v2786_v37  ;;  %v2836_v11 = vpop.permute.xlu1 %2835 }
0x1654   :  { %v2843_v24 = vrot.slane %v2836_v11, %v8215_v1 }
0x1655   :  { %7015 = vmatmul.mubr.msk.bf16.vlgmr.msra.gmra.mrb[32].mxu0 %vm1089_vm9, %v2787_v56 }
0x1656   :  { %7025 = vmatpush3.bf16.msra.mxu0 %v8025_v5  ;;  %7026 = vmatprep.mubr.msk.bf16.mxu0 %vm7800_vm0, %v9753_v46 }
0x1657   :  { %v2839_v47 = vpop.permute.xlu1 %2838  ;;  %7223 = vmatprep.subr.bf16.mxu0 %v9754_v10 }
0x1658   :  { %v2847_v48 = vrot.slane %v2839_v47, %v8211_v62 }
0x165a   :  { %v2848_v14 = vsel %vm802_vm8, %v2847_v48, %v2843_v24 }
0x165b   :  { %v2849_v23 = vpack.c.b16 %v2848_v14, %v2848_v14  ;;  %v2898_v32 = vpop.permute.xlu1 %2897 }
0x165c   :  { %v2905_v26 = vrot.slane %v2898_v32, %v8215_v1 }
0x165d   :  { %7021 = vmatmul.mubr.msk.bf16.vlgmr.msra.gmra.mrb[32].mxu1 %vm1089_vm9, %v2849_v23 }
0x165e   :  { %7031 = vmatpush3.bf16.msra.mxu1 %v8031_v6  ;;  %7032 = vmatprep.mubr.msk.bf16.mxu1 %vm7800_vm0, %v9753_v46 }
0x165f   :  { %v2901_v0 = vpop.permute.xlu1 %2900  ;;  %7230 = vmatprep.subr.bf16.mxu1 %v8526_v16 }
0x1660   :  { %v2909_v18 = vrot.slane %v2901_v0, %v8211_v62 }
0x1662   :  { %v2910_v12 = vsel %vm802_vm8, %v2909_v18, %v2905_v26 }
0x1663   :  { %v2911_v35 = vpack.c.b16 %v2910_v12, %v2910_v12  ;;  %v2960_v27 = vpop.permute.xlu1 %2959 }
0x1664   :  { %v2967_v13 = vrot.slane %v2960_v27, %v8215_v1 }
0x1665   :  { %7027 = vmatmul.mubr.msk.bf16.vlgmr.msra.gmra.mrb[36].mxu0 %vm1089_vm9, %v2911_v35 }
0x1666   :  { %v2972_v60 = vsel %vm802_vm8, %v2971_v55, %v2967_v13  ;;  %7044 = vmatprep.mubr.msk.f32.mxu0 %vm7800_vm0, %v9753_v46  ;;  %v3031_v55 = vld [vmem:[#allocation10] sm:$0xff]  ;;  %v3032_v13 = vld [vmem:[#allocation10 + $0x8] sm:$0xff] }
0x1667   :  { %v2973_v16 = vpack.c.b16 %v2972_v60, %v2972_v60  ;;  %v3033_v60 = vld [vmem:[#allocation10 + $0x10] sm:$0xff] }
0x1669   :  { %7033 = vmatmul.mubr.msk.bf16.vlgmr.msra.gmra.mrb[36].mxu1 %vm1089_vm9, %v2973_v16 }
0x166a   :  { %7232 = vmatpush1.bf16.msra.mxu1 %v8528_v61  ;;  %3220 = vmatprep.mubr.f32.mxu1 %v9753_v46 }
0x166b   :  { %7234 = vmatprep.subr.bf16.mxu1 %v8530_v44 }
0x166e   :  { %7236 = vmatpush1.bf16.msra.mxu1 %v8534_v33 }
0x166f   :  { %7053 = vmatprep.subr.bf16.mxu1 %v9753_v46 }
0x1728   :  { %v2825_v37 = vpop.f32.mrb[32].mxu0 }
0x1729   :  { %v7016_v56 = vpop.f32.mrb[33].mxu0 }
0x172a   :  { %v2828_v11 = vpop.f32.mrb[34].mxu0  ;;  %v8682_v56 = vpack.c.bf16 %v3032_v13, %v3031_v55 }
0x172b   :  { %v7017_v47 = vpop.f32.mrb[35].mxu0  ;;  %v3034_v11 = vld [vmem:[#allocation10 + $0x18] sm:$0xff] }
0x172c   :  { %7225 = vmatpush3.bf16.msra.mxu0 %v8682_v56 }
0x172d   :  { %7226 = vmatprep.subr.bf16.mxu0 %v9754_v10 }
0x1730   :  { %v2887_v24 = vpop.f32.mrb[32].mxu1 }
0x1731   :  { %v3021_v48 = vrot.slane %v2887_v24, 7  ;;  %v7022_v14 = vpop.f32.mrb[33].mxu1  ;;  %v8687_v24 = vpack.c.bf16 %v3034_v11, %v3033_v60 }
0x1732   :  { %v2890_v23 = vpop.f32.mrb[34].mxu1 }
0x1733   :  { %v3022_v32 = vsel %vm316_vm3, %v3021_v48, %v2825_v37  ;;  %v7023_v0 = vpop.f32.mrb[35].mxu1  ;;  %7228 = vmatpush3.bf16.msra.mxu0 %v8687_v24  ;;  %v6756_v48 = vmul.f32 -1.442695, %v8547_v8 }
0x1734   :  { %7047 = vmatprep.subr.bf16.mxu0 %v9753_v46 }
0x1735   :  { %7419 = vpow2.f32 %v6756_v48 }
0x1738   :  { %v2949_v61 = vpop.f32.mrb[36].mxu0 }
0x1739   :  { %v3023_v26 = vrot.slane %v2949_v61, 6  ;;  %v7028_v18 = vpop.f32.mrb[37].mxu0 }
0x173a   :  { %v2952_v28 = vpop.f32.mrb[38].mxu0 }
0x173b   :  { %v7029_v44 = vpop.f32.mrb[39].mxu0  ;;  %v3024_v33 = vsel %vm318_vm4, %v3023_v26, %v3022_v32  ;;  %v2381_v26 = vadd.f32 %v8549_v25, %v8337_v9 }
0x173c   :  { %v3011_v12 = vpop.f32.mrb[36].mxu1 }
0x173d   :  { %v3025_v35 = vrot.slane %v3011_v12, 5  ;;  %v7034_v27 = vpop.f32.mrb[37].mxu1 }
0x173e   :  { %v3014_v16 = vpop.f32.mrb[38].mxu1 }
0x173f   :  { %v7035_v47 = vpop.f32.mrb[39].mxu1  ;;  %v3026_v37 = vsel %vm320_vm5, %v3025_v35, %v3024_v33  ;;  %v7420_v14 = vpop.eup %7419 }
0x1740   :  { %3027 = vrot.lane.b32.xlu1 %v3026_v37, %s7804_s11  ;;  %v2391_v23 = vadd.f32 1.0, %v7420_v14  ;;  %v3124_v37 = vrot.slane %v8523_v58, 4 }
0x1742   :  { %7421 = vrcp.f32 %v2391_v23 }
0x174c   :  { %v7422_v32 = vpop.eup %7421 }
0x17b2   :  { %v3028_v0 = vpop.permute.xlu1 %3027 }
0x17b3   :  { %v3030_v61 = vmul.f32 %v7422_v32, %v3028_v0 }
0x17b5   :  { %3036 = vrot.lane.b32.xlu1 %v3030_v61, %s7805_s17 }
0x17b9   :  { %2384 = vrot.lane.b32.xlu1 %v2381_v26, %s7792_s16 }
0x17bd   :  { %3111 = vrot.lane.b32.xlu1 %v8547_v8, %s7792_s16 }
0x1827   :  { %v3037_v18 = vpop.permute.xlu1 %3036 }
0x1828   :  { %7045 = vmatmul.mubr.msk.f32.vlgmr.msra.gmra.mrb[30].mxu0 %vm258_vm1, %v3037_v18 }
0x1829   :  { %7048 = vmatpush3.bf16.msra.mxu0 %v8015_v3  ;;  %7049 = vmatprep.mubr.msk.bf16.mxu0 %vm7800_vm0, %v9753_v46 }
0x182a   :  { %7059 = vmatprep.subr.bf16.mxu0 %v9753_v46 }
0x182b   :  { %v2385_v28 = vpop.permute.xlu1 %2384 }
0x182c   :  { %2387 = vst.msk [vmem:[#allocation14 + $0x4] sm:$0xf] %vm587_vm11, %v2385_v28 }
0x182f   :  { %v3112_v44 = vpop.permute.xlu1 %3111 }
0x1830   :  { %v3113_v8 = vsel %vm1421_vm10, %v3112_v44, %v2385_v28 }
0x18fb   :  { %v3106_v25 = vpop.f32.mrb[30].mxu0 }
0x18fc   :  { %v3110_v33 = vadd.f32 %v3106_v25, %v8111_v42  ;;  %v7046_v12 = vpop.f32.mrb[31].mxu0 }
0x18fe   :  { %v3115_v35 = vadd.f32 %v3113_v8, %v3110_v33 }
0x1900   :  { %7423 = vtanh.f32 %v3115_v35  ;;  %v6762_v55 = vmul.f32 -1.442695, %v3115_v35 }
0x1902   :  { %7425 = vpow2.f32 %v6762_v55 }
0x190a   :  { %v7424_v27 = vpop.eup %7423 }
0x190b   :  { %3128 = vrot.lane.b32.xlu1 %v7424_v27, %s7792_s16 }
0x190c   :  { %v7426_v13 = vpop.eup %7425 }
0x190d   :  { %v3119_v60 = vadd.f32 1.0, %v7426_v13 }
0x190f   :  { %7427 = vrcp.f32 %v3119_v60 }
0x1919   :  { %v7428_v16 = vpop.eup %7427 }
0x191a   :  { %v3126_v48 = vmul.f32 %v7428_v16, %v3124_v37 }
0x197d   :  { %v3129_v11 = vpop.permute.xlu1 %3128 }
0x197e   :  { %v3131_v47 = vmul.f32 %v7428_v16, %v3129_v11 }
0x1980   :  { %3133 = vrot.lane.b32.xlu1 %v3131_v47, %s7804_s11 }
0x19f2   :  { %v3134_v14 = vpop.permute.xlu1 %3133 }
0x19f3   :  { %v8710_v23 = vadd.f32 %v3134_v14, %v3126_v48 }
0x19f5   :  { %7429 = vtanh.f32 %v8710_v23 }
0x19ff   :  { %v7430_v32 = vpop.eup %7429 }
0x1a00   :  { %3139 = vrot.lane.b32.xlu0 %v7430_v32, %s7792_s16 }
0x1a72   :  { %v3140_v0 = vpop.permute.xlu0 %3139 }
0x1a73   :  { %v8714_v61 = vmul.f32 %v7428_v16, %v3140_v0 }
0x1a75   :  { %3152 = vrot.lane.b32.xlu1 %v8714_v61, %s7804_s11 }
0x1ae7   :  { %v8718_v26 = vpop.permute.xlu1 %3152 }
0x1ae8   :  { %6763 = vmatmul.mubr.msk.f32.vlgmr.msra.gmra.mrb[40].mxu1 %vm258_vm1, %v8718_v26 }
0x1ae9   :  { %7054 = vmatpush3.bf16.msra.mxu1 %v8020_v4  ;;  %7055 = vmatprep.mubr.msk.bf16.mxu1 %vm7800_vm0, %v9753_v46 }
0x1aea   :  { %7065 = vmatprep.subr.bf16.mxu1 %v9753_v46 }
0x1bbb   :  { %v3222_v58 = vpop.f32.mrb[40].mxu1 }
0x1bbc   :  { %v8727_v18 = vadd.f32 %v3222_v58, %v8144_v20  ;;  %v3224_v28 = vpop.f32.mrb[41].mxu1 }
0x1bbd   :  { %v8730_v44 = vadd.f32 %v3224_v28, %v8337_v9 }
0x1bbe   :  { %v3241_v25 = vrot.slane %v8727_v18, %v8147_v21 }
0x1bbf   :  { %3227 = vst.msk [vmem:[#allocation14 + $0x4] sm:$0xf] %vm1533_vm12, %v8730_v44 }
0x1bc0   :  { %v3242_v33 = vcombine.high %v3241_v25, %v3241_v25  ;;  %v3249_v12 = vrot.slane %v3241_v25, %v8147_v21 }
0x1bc2   :  { %v3256_v8 = vrot.slane %v3242_v33, %v8147_v21  ;;  %v3257_v35 = vcombine.high %v3249_v12, %v3249_v12  ;;  %v3262_v27 = vrot.slane %v3249_v12, %v8128_v54 }
0x1bc4   :  { %v3280_v55 = vadd.f32 %v3262_v27, %v8159_v31  ;;  %v3279_v13 = vadd.f32 %v3262_v27, %v8157_v30  ;;  %v3270_v60 = vrot.slane %v3257_v35, %v8128_v54  ;;  %v3266_v16 = vrot.slane %v3256_v8, %v8128_v54 }
0x1bc5   :  { %v3258_v11 = vcombine.high %v3256_v8, %v3256_v8 }
0x1bc6   :  { %v3288_v47 = vmax.f32 %v3280_v55, 0.0  ;;  %v3287_v37 = vmax.f32 %v3279_v13, 0.0  ;;  %v3283_v48 = vadd.f32 %v3270_v60, %v8167_v41  ;;  %v3281_v14 = vadd.f32 %v3266_v16, %v8163_v38 }
0x1bc7   :  { %v3282_v32 = vadd.f32 %v3266_v16, %v8165_v40  ;;  %v3274_v0 = vrot.slane %v3258_v11, %v8128_v54  ;;  %v3284_v8 = vadd.f32 %v3270_v60, %v8169_v43 }
0x1bc8   :  { %v3296_v58 = vmul.f32 %v8564_v34, %v3288_v47  ;;  %v3295_v28 = vmul.f32 %v8564_v34, %v3287_v37  ;;  %v3291_v25 = vmax.f32 %v3283_v48, 0.0  ;;  %v3289_v33 = vmax.f32 %v3281_v14, 0.0 }
0x1bc9   :  { %v3290_v12 = vmax.f32 %v3282_v32, 0.0  ;;  %v3285_v35 = vadd.f32 %v3274_v0, %v8175_v49  ;;  %v3292_v47 = vmax.f32 %v3284_v8, 0.0  ;;  %v3286_v37 = vadd.f32 %v3274_v0, %v8181_v59 }
0x1bca   :  { %v3306_v27 = vsel %vm258_vm1, %v3296_v58, 0.0  ;;  %v3303_v55 = vsel %vm258_vm1, %v3295_v28, 0.0  ;;  %v3299_v13 = vmul.f32 %v8564_v34, %v3291_v25  ;;  %v3297_v16 = vmul.f32 %v8564_v34, %v3289_v33 }
0x1bcb   :  { %3307 = vadd.xlane.f32.xlu1 %v3306_v27  ;;  %3304 = vadd.xlane.f32.xlu0 %v3303_v55  ;;  %v3293_v11 = vmax.f32 %v3285_v35, 0.0  ;;  %v3298_v60 = vmul.f32 %v8564_v34, %v3290_v12  ;;  %v3300_v25 = vmul.f32 %v8564_v34, %v3292_v47  ;;  %v3294_v33 = vmax.f32 %v3286_v37, 0.0 }
0x1bcc   :  { %v3315_v48 = vsel %vm258_vm1, %v3299_v13, 0.0  ;;  %v3309_v14 = vsel %vm258_vm1, %v3297_v16, 0.0 }
0x1bcd   :  { %v3301_v32 = vmul.f32 %v8564_v34, %v3293_v11  ;;  %v3312_v58 = vsel %vm258_vm1, %v3298_v60, 0.0  ;;  %v3318_v0 = vsel %vm258_vm1, %v3300_v25, 0.0  ;;  %v3302_v35 = vmul.f32 %v8564_v34, %v3294_v33 }
0x1bcf   :  { %3316 = vadd.xlane.f32.xlu1 %v3315_v48  ;;  %3310 = vadd.xlane.f32.xlu0 %v3309_v14  ;;  %v3321_v28 = vsel %vm258_vm1, %v3301_v32, 0.0  ;;  %v3324_v12 = vsel %vm258_vm1, %v3302_v35, 0.0 }
0x1bd3   :  { %3313 = vadd.xlane.f32.xlu0 %v3312_v58  ;;  %3322 = vadd.xlane.f32.xlu1 %v3321_v28 }
0x1bd7   :  { %3319 = vadd.xlane.f32.xlu0 %v3318_v0 }
0x1bdb   :  { %3325 = vadd.xlane.f32.xlu0 %v3324_v12 }
0x1c58   :  { %v3305_v8 = vpop.xlane.xlu0 %3304  ;;  %v3308_v27 = vpop.xlane.xlu1 %3307 }
0x1c59   :  { %v3342_v47 = vrot.slane %v3308_v27, %v8211_v62  ;;  %v3338_v37 = vrot.slane %v3305_v8, %v8215_v1 }
0x1c5b   :  { %v3343_v33 = vsel %vm802_vm8, %v3342_v47, %v3338_v37 }
0x1c5c   :  { %v3311_v55 = vpop.xlane.xlu0 %3310  ;;  %v3317_v13 = vpop.xlane.xlu1 %3316 }
0x1c5d   :  { %v3347_v14 = vrot.slane %v3311_v55, %v8215_v1  ;;  %v3356_v60 = vrot.slane %v3317_v13, %v8215_v1 }
0x1c60   :  { %v3314_v16 = vpop.xlane.xlu0 %3313  ;;  %v3323_v32 = vpop.xlane.xlu1 %3322 }
0x1c61   :  { %v3351_v11 = vrot.slane %v3314_v16, %v8211_v62  ;;  %v3365_v0 = vrot.slane %v3323_v32, %v8215_v1 }
0x1c63   :  { %v3352_v58 = vsel %vm802_vm8, %v3351_v11, %v3347_v14 }
0x1c64   :  { %v3320_v48 = vpop.xlane.xlu0 %3319  ;;  %v3371_v12 = vsel %vm316_vm3, %v3352_v58, %v3343_v33 }
0x1c65   :  { %v3360_v34 = vrot.slane %v3320_v48, %v8211_v62 }
0x1c67   :  { %v3361_v25 = vsel %vm802_vm8, %v3360_v34, %v3356_v60 }
0x1c68   :  { %v3326_v28 = vpop.xlane.xlu0 %3325  ;;  %v3372_v15 = vsel %vm318_vm4, %v3361_v25, %v3371_v12 }
0x1c69   :  { %v3369_v35 = vrot.slane %v3326_v28, %v8211_v62 }
0x1c6b   :  { %v3370_v29 = vsel %vm802_vm8, %v3369_v35, %v3365_v0 }
0x1c6c   :  { %v3373_v2 = vsel %vm320_vm5, %v3370_v29, %v3372_v15 }
0x1c6d   :  { %v3375_v17 = vsel %vm589_vm7, %v3373_v2, -inf }
0x1c6e   :  { %3376 = vmax.xlane.f32.xlu1 %v3375_v17 }
0x1cfb   :  { %v3377_v11 = vpop.xlane.xlu1 %3376 }
0x1cfc   :  { %v3382_v14 = vrot.slane %v3377_v11, %v8128_v54  ;;  %v3386_v47 = vrot.slane %v3377_v11, %v8234_v45  ;;  %v3390_v37 = vrot.slane %v3377_v11, %v8239_v57  ;;  %v3394_v25 = vrot.slane %v3377_v11, %v8243_v19 }
0x1cfe   :  { %v3399_v34 = vsub.f32 %v3305_v8, %v3382_v14  ;;  %v3400_v60 = vsub.f32 %v3308_v27, %v3382_v14  ;;  %v3402_v7 = vsub.f32 %v3314_v16, %v3386_v47  ;;  %v3401_v58 = vsub.f32 %v3311_v55, %v3386_v47 }
0x1cff   :  { %v3404_v35 = vsub.f32 %v3320_v48, %v3390_v37  ;;  %v3403_v2 = vsub.f32 %v3317_v13, %v3390_v37  ;;  %v3406_v15 = vsub.f32 %v3326_v28, %v3394_v25  ;;  %v3405_v63 = vsub.f32 %v3323_v32, %v3394_v25 }
0x1d00   :  { %v3407_v33 = vmul.f32 1.442695, %v3399_v34  ;;  %v3409_v0 = vmul.f32 1.442695, %v3400_v60  ;;  %v3413_v29 = vmul.f32 1.442695, %v3402_v7 }
0x1d01   :  { %v3411_v17 = vmul.f32 1.442695, %v3401_v58  ;;  %v3417_v12 = vmul.f32 1.442695, %v3404_v35  ;;  %v3415_v50 = vmul.f32 1.442695, %v3403_v2 }
0x1d02   :  { %7431 = vpow2.f32 %v3407_v33  ;;  %v3421_v8 = vmul.f32 1.442695, %v3406_v15  ;;  %v3419_v27 = vmul.f32 1.442695, %v3405_v63 }
0x1d03   :  { %7433 = vpow2.f32 %v3409_v0 }
0x1d04   :  { %7435 = vpow2.f32 %v3413_v29 }
0x1d05   :  { %7437 = vpow2.f32 %v3411_v17 }
0x1d06   :  { %7439 = vpow2.f32 %v3417_v12 }
0x1d07   :  { %7441 = vpow2.f32 %v3415_v50 }
0x1d08   :  { %7443 = vpow2.f32 %v3421_v8 }
0x1d09   :  { %7445 = vpow2.f32 %v3419_v27 }
0x1d0c   :  { %v7432_v55 = vpop.eup %7431 }
0x1d0d   :  { %v7434_v16 = vpop.eup %7433  ;;  %3432 = vperm.xlu0 %7319, %v7432_v55  }
0x1d0e   :  { %3435 = vperm.xlu1 %7318, %v7434_v16   ;;  %v7436_v7 = vpop.eup %7435 }
0x1d0f   :  { %v7438_v13 = vpop.eup %7437 }
0x1d10   :  { %v7440_v48 = vpop.eup %7439 }
0x1d11   :  { %3441 = vperm.xlu0 %7319, %v7436_v7   ;;  %v7442_v28 = vpop.eup %7441 }
0x1d12   :  { %3438 = vperm.xlu1 %7318, %v7438_v13   ;;  %v7444_v32 = vpop.eup %7443 }
0x1d13   :  { %v7446_v11 = vpop.eup %7445 }
0x1d15   :  { %3447 = vperm.xlu0 %7319, %v7440_v48  }
0x1d16   :  { %3444 = vperm.xlu1 %7318, %v7442_v28  }
0x1d19   :  { %3453 = vperm.xlu0 %7319, %v7444_v32  }
0x1d1a   :  { %3450 = vperm.xlu1 %7318, %v7446_v11  }
0x1d8c   :  { %v3433_v50 = vpop.permute.xlu0 %3432 }
0x1d8d   :  { %v3436_v63 = vpop.permute.xlu1 %3435  ;;  %v3458_v25 = vrot.slane %v3433_v50, %v8215_v1 }
0x1d8e   :  { %v3462_v0 = vrot.slane %v3436_v63, %v8211_v62 }
0x1d90   :  { %v3442_v14 = vpop.permute.xlu0 %3441  ;;  %v3463_v8 = vsel %vm802_vm8, %v3462_v0, %v3458_v25 }
0x1d91   :  { %v3439_v47 = vpop.permute.xlu1 %3438  ;;  %v3471_v34 = vrot.slane %v3442_v14, %v8211_v62 }
0x1d92   :  { %v3467_v37 = vrot.slane %v3439_v47, %v8215_v1 }
0x1d94   :  { %v3448_v60 = vpop.permute.xlu0 %3447  ;;  %v3472_v29 = vsel %vm802_vm8, %v3471_v34, %v3467_v37 }
0x1d95   :  { %v3445_v58 = vpop.permute.xlu1 %3444  ;;  %v3480_v33 = vrot.slane %v3448_v60, %v8211_v62  ;;  %v3491_v14 = vsel %vm316_vm3, %v3472_v29, %v3463_v8 }
0x1d96   :  { %v3476_v35 = vrot.slane %v3445_v58, %v8215_v1 }
0x1d98   :  { %v3454_v2 = vpop.permute.xlu0 %3453  ;;  %v3481_v17 = vsel %vm802_vm8, %v3480_v33, %v3476_v35 }
0x1d99   :  { %v3451_v15 = vpop.permute.xlu1 %3450  ;;  %v3489_v12 = vrot.slane %v3454_v2, %v8211_v62  ;;  %v3492_v50 = vsel %vm318_vm4, %v3481_v17, %v3491_v14 }
0x1d9a   :  { %v3485_v27 = vrot.slane %v3451_v15, %v8215_v1 }
0x1d9c   :  { %v3490_v63 = vsel %vm802_vm8, %v3489_v12, %v3485_v27 }
0x1d9d   :  { %v3493_v47 = vsel %vm320_vm5, %v3490_v63, %v3492_v50 }
0x1d9e   :  { %v3495_v37 = vsel %vm589_vm7, %v3493_v47, 0.0 }
0x1d9f   :  { %3496 = vadd.xlane.f32.xlu1 %v3495_v37 }
0x1e2c   :  { %v3497_v34 = vpop.xlane.xlu1 %3496 }
0x1e2d   :  { %7447 = vrcp.f32 %v3497_v34 }
0x1e37   :  { %v7448_v60 = vpop.eup %7447 }
0x1e38   :  { %v3503_v58 = vrot.slane %v7448_v60, %v8128_v54  ;;  %v3507_v25 = vrot.slane %v7448_v60, %v8234_v45 }
0x1e3a   :  { %v8803_v33 = vmul.f32 %v7432_v55, %v3503_v58  ;;  %v8805_v0 = vmul.f32 %v7434_v16, %v3503_v58  ;;  %v8810_v2 = vmul.f32 %v7438_v13, %v3507_v25  ;;  %v8812_v17 = vmul.f32 %v7436_v7, %v3507_v25 }
0x1e3b   :  { %v3511_v55 = vrot.slane %v7448_v60, %v8239_v57  ;;  %v3515_v7 = vrot.slane %v7448_v60, %v8243_v19 }
0x1e3c   :  { %9763 = vst [vmem:[#allocation48_spill] sm:$0xff] %v8803_v33  ;;  %9764 = vst [vmem:[#allocation49_spill] sm:$0xff] %v8805_v0  ;;  %v3610_v35 = vpack.c.bf16 %v8805_v0, %v8803_v33  ;;  %v3611_v12 = vpack.c.bf16 %v8812_v17, %v8810_v2 }
0x1e3d   :  { %9765 = vst [vmem:[#allocation50_spill] sm:$0xff] %v8810_v2  ;;  %9766 = vst [vmem:[#allocation51_spill] sm:$0xff] %v8812_v17  ;;  %v8817_v8 = vmul.f32 %v7442_v28, %v3511_v55  ;;  %v8819_v27 = vmul.f32 %v7440_v48, %v3511_v55  ;;  %v8824_v50 = vmul.f32 %v7446_v11, %v3515_v7 }
0x1e3e   :  { %v3615_v29 = vunpack.c.l.b16 %v3610_v35  ;;  %v3616_v15 = vunpack.c.h.b16 %v3610_v35  ;;  %v3677_v16 = vunpack.c.l.b16 %v3611_v12  ;;  %v3678_v14 = vunpack.c.h.b16 %v3611_v12 }
0x1e3f   :  { %9767 = vst [vmem:[#allocation52_spill] sm:$0xff] %v8817_v8  ;;  %9768 = vst [vmem:[#allocation53_spill] sm:$0xff] %v8819_v27  ;;  %v3612_v13 = vpack.c.bf16 %v8819_v27, %v8817_v8  ;;  %v8826_v47 = vmul.f32 %v7444_v32, %v3515_v7 }
0x1e40   :  { %3618 = vperm.xlu0 %7319, %v3615_v29   ;;  %9769 = vst [vmem:[#allocation54_spill] sm:$0xff] %v8824_v50 }
0x1e41   :  { %v3739_v63 = vunpack.c.l.b16 %v3612_v13  ;;  %9770 = vst [vmem:[#allocation55_spill] sm:$0xff] %v8826_v47  ;;  %v3740_v37 = vunpack.c.h.b16 %v3612_v13  ;;  %v3613_v28 = vpack.c.bf16 %v8826_v47, %v8824_v50 }
0x1e43   :  { %v3801_v48 = vunpack.c.l.b16 %v3613_v28  ;;  %v3802_v34 = vunpack.c.h.b16 %v3613_v28 }
0x1e44   :  { %3621 = vperm.xlu0 %7319, %v3616_v15  }
0x1e48   :  { %3680 = vperm.xlu0 %7319, %v3677_v16  }
0x1e4c   :  { %3683 = vperm.xlu0 %7319, %v3678_v14  }
0x1e50   :  { %3742 = vperm.xlu0 %7319, %v3739_v63  }
0x1e54   :  { %3745 = vperm.xlu0 %7319, %v3740_v37  }
0x1e58   :  { %3804 = vperm.xlu0 %7319, %v3801_v48  }
0x1e5c   :  { %3807 = vperm.xlu0 %7319, %v3802_v34  }
0x1ebf   :  { %v3619_v58 = vpop.permute.xlu0 %3618 }
0x1ec0   :  { %v3626_v60 = vrot.slane %v3619_v58, %v8215_v1 }
0x1ec3   :  { %v3622_v25 = vpop.permute.xlu0 %3621 }
0x1ec4   :  { %v3630_v35 = vrot.slane %v3622_v25, %v8211_v62 }
0x1ec6   :  { %v3631_v11 = vsel %vm802_vm8, %v3630_v35, %v3626_v60 }
0x1ec7   :  { %v3632_v32 = vpack.c.b16 %v3631_v11, %v3631_v11  ;;  %v3681_v29 = vpop.permute.xlu0 %3680 }
0x1ec8   :  { %v3688_v12 = vrot.slane %v3681_v29, %v8215_v1 }
0x1ec9   :  { %7050 = vmatmul.mubr.msk.bf16.vlgmr.msra.gmra.mrb[40].mxu0 %vm1089_vm9, %v3632_v32 }
0x1eca   :  { %7060 = vmatpush3.bf16.msra.mxu0 %v8025_v5  ;;  %7061 = vmatprep.mubr.msk.bf16.mxu0 %vm7800_vm0, %v9753_v46 }
0x1ecb   :  { %v3684_v15 = vpop.permute.xlu0 %3683  ;;  %7237 = vmatprep.subr.bf16.mxu0 %v9754_v10 }
0x1ecc   :  { %v3692_v55 = vrot.slane %v3684_v15, %v8211_v62 }
0x1ece   :  { %v3693_v16 = vsel %vm802_vm8, %v3692_v55, %v3688_v12 }
0x1ecf   :  { %v3694_v14 = vpack.c.b16 %v3693_v16, %v3693_v16  ;;  %v3743_v13 = vpop.permute.xlu0 %3742 }
0x1ed0   :  { %v3750_v63 = vrot.slane %v3743_v13, %v8215_v1 }
0x1ed1   :  { %7056 = vmatmul.mubr.msk.bf16.vlgmr.msra.gmra.mrb[44].mxu1 %vm1089_vm9, %v3694_v14 }
0x1ed2   :  { %7066 = vmatpush3.bf16.msra.mxu1 %v8031_v6  ;;  %7067 = vmatprep.mubr.msk.bf16.mxu1 %vm7800_vm0, %v9753_v46 }
0x1ed3   :  { %v3746_v7 = vpop.permute.xlu0 %3745 }
0x1ed4   :  { %v3754_v37 = vrot.slane %v3746_v7, %v8211_v62 }
0x1ed6   :  { %v3755_v28 = vsel %vm802_vm8, %v3754_v37, %v3750_v63 }
0x1ed7   :  { %v3756_v48 = vpack.c.b16 %v3755_v28, %v3755_v28  ;;  %v3805_v34 = vpop.permute.xlu0 %3804 }
0x1ed8   :  { %v3812_v25 = vrot.slane %v3805_v34, %v8215_v1 }
0x1ed9   :  { %7062 = vmatmul.mubr.msk.bf16.vlgmr.msra.gmra.mrb[44].mxu0 %vm1089_vm9, %v3756_v48 }
0x1eda   :  { %7239 = vmatpush3.bf16.msra.mxu0 %v8682_v56  ;;  %7079 = vmatprep.mubr.msk.f32.mxu0 %vm7800_vm0, %v9753_v46 }
0x1edb   :  { %v3808_v58 = vpop.permute.xlu0 %3807  ;;  %7240 = vmatprep.subr.bf16.mxu0 %v9754_v10 }
0x1edc   :  { %v3816_v60 = vrot.slane %v3808_v58, %v8211_v62 }
0x1ede   :  { %v3817_v35 = vsel %vm802_vm8, %v3816_v60, %v3812_v25  ;;  %7242 = vmatpush3.bf16.msra.mxu0 %v8687_v24 }
0x1edf   :  { %v3818_v11 = vpack.c.b16 %v3817_v35, %v3817_v35  ;;  %7082 = vmatprep.subr.bf16.mxu0 %v9753_v46 }
0x1ee1   :  { %7068 = vmatmul.mubr.msk.bf16.vlgmr.msra.gmra.mrb[48].mxu1 %vm1089_vm9, %v3818_v11 }
0x1ee2   :  { %4087 = vmatprep.mubr.f32.mxu1 %v9753_v46 }
0x1f9c   :  { %v3670_v56 = vpop.f32.mrb[40].mxu0 }
0x1f9d   :  { %v7051_v32 = vpop.f32.mrb[41].mxu0 }
0x1f9e   :  { %v3673_v29 = vpop.f32.mrb[42].mxu0 }
0x1f9f   :  { %v7052_v15 = vpop.f32.mrb[43].mxu0  ;;  %v3960_v29 = vrot.slane %v8727_v18, 4 }
0x1fa0   :  { %v6764_v15 = vmul.f32 -1.442695, %v8727_v18 }
0x1fa2   :  { %7449 = vpow2.f32 %v6764_v15 }
0x1fa4   :  { %v3732_v12 = vpop.f32.mrb[44].mxu1 }
0x1fa5   :  { %v3866_v55 = vrot.slane %v3732_v12, 7  ;;  %v7057_v16 = vpop.f32.mrb[45].mxu1 }
0x1fa6   :  { %v3735_v14 = vpop.f32.mrb[46].mxu1 }
0x1fa7   :  { %v3867_v13 = vsel %vm316_vm3, %v3866_v55, %v3670_v56  ;;  %v7058_v7 = vpop.f32.mrb[47].mxu1  ;;  %v3961_v56 = vrot.slane %v8730_v44, 4 }
0x1fac   :  { %v3794_v63 = vpop.f32.mrb[44].mxu0  ;;  %v7450_v12 = vpop.eup %7449 }
0x1fad   :  { %v3868_v24 = vrot.slane %v3794_v63, 6  ;;  %v7063_v37 = vpop.f32.mrb[45].mxu0  ;;  %v3231_v55 = vadd.f32 1.0, %v7450_v12 }
0x1fae   :  { %v3797_v28 = vpop.f32.mrb[46].mxu0 }
0x1faf   :  { %v3869_v48 = vsel %vm318_vm4, %v3868_v24, %v3867_v13  ;;  %v7064_v34 = vpop.f32.mrb[47].mxu0  ;;  %7451 = vrcp.f32 %v3231_v55  ;;  %v4013_v55 = vld [vmem:[#allocation8 + $0x8] sm:$0xff] }
0x1fb4   :  { %v3856_v58 = vpop.f32.mrb[48].mxu1 }
0x1fb5   :  { %v3870_v25 = vrot.slane %v3856_v58, 5  ;;  %v7069_v60 = vpop.f32.mrb[49].mxu1 }
0x1fb6   :  { %v3859_v35 = vpop.f32.mrb[50].mxu1 }
0x1fb7   :  { %v7070_v11 = vpop.f32.mrb[51].mxu1  ;;  %v3871_v32 = vsel %vm320_vm5, %v3870_v25, %v3869_v48 }
0x1fb8   :  { %3872 = vrot.lane.b32.xlu0 %v3871_v32, %s7804_s11 }
0x1fb9   :  { %v7452_v16 = vpop.eup %7451 }
0x1fbc   :  { %3962 = vrot.lane.b32.xlu0 %v3960_v29, %s7792_s16 }
0x1fc0   :  { %3964 = vrot.lane.b32.xlu0 %v3961_v56, %s7792_s16  ;;  %v3977_v56 = vrot.slane %v8710_v23, 4 }
0x202a   :  { %v3873_v14 = vpop.permute.xlu0 %3872 }
0x202b   :  { %v3875_v13 = vmul.f32 %v7452_v16, %v3873_v14  ;;  %v4015_v16 = vld [vmem:[#allocation8 + $0x18] sm:$0xff]  ;;  %v4012_v14 = vld [vmem:[#allocation8] sm:$0xff] }
0x202d   :  { %3881 = vrot.lane.b32.xlu1 %v3875_v13, %s7805_s17  ;;  %v8883_v13 = vpack.c.bf16 %v4015_v16, %v4013_v55 }
0x202e   :  { %v3963_v18 = vpop.permute.xlu0 %3962 }
0x202f   :  { %7244 = vmatprep.subr.bf16.mxu1 %v8883_v13 }
0x2032   :  { %v3965_v63 = vpop.permute.xlu0 %3964 }
0x2033   :  { %v3966_v48 = vsel %vm1421_vm10, %v3963_v18, %v3965_v63  ;;  %v4017_v18 = vld [vmem:[#allocation8 + $0x28] sm:$0xff] }
0x209f   :  { %v3882_v7 = vpop.permute.xlu1 %3881 }
0x20a0   :  { %7080 = vmatmul.mubr.msk.f32.vlgmr.msra.gmra.mrb[48].mxu0 %vm258_vm1, %v3882_v7  ;;  %v4014_v7 = vld [vmem:[#allocation8 + $0x10] sm:$0xff] }
0x20a1   :  { %7083 = vmatpush3.bf16.msra.mxu0 %v8015_v3  ;;  %7084 = vmatprep.mubr.msk.bf16.mxu0 %vm7800_vm0, %v9753_v46  ;;  %v8885_v63 = vpack.c.bf16 %v4014_v7, %v4012_v14 }
0x20a2   :  { %7094 = vmatprep.subr.bf16.mxu0 %v9753_v46 }
0x20a3   :  { %7246 = vmatpush1.bf16.msra.mxu1 %v8885_v63 }
0x2173   :  { %v3951_v44 = vpop.f32.mrb[48].mxu0 }
0x2174   :  { %v3956_v24 = vrot.slane %v3951_v44, 4  ;;  %v7081_v37 = vpop.f32.mrb[49].mxu0  ;;  %v4019_v44 = vld [vmem:[#allocation8 + $0x38] sm:$0xff] }
0x2175   :  { %v4016_v37 = vld [vmem:[#allocation8 + $0x20] sm:$0xff] }
0x2176   :  { %v3958_v28 = vadd.f32 %v3956_v24, %v8111_v42  ;;  %v8887_v24 = vpack.c.bf16 %v4019_v44, %v4017_v18 }
0x2178   :  { %v3968_v34 = vadd.f32 %v3966_v48, %v3958_v28  ;;  %v4018_v28 = vld [vmem:[#allocation8 + $0x30] sm:$0xff]  ;;  %7248 = vmatprep.subr.bf16.mxu1 %v8887_v24 }
0x2179   :  { %v8891_v48 = vpack.c.bf16 %v4018_v28, %v4016_v37 }
0x217a   :  { %7453 = vtanh.f32 %v3968_v34  ;;  %v6770_v25 = vmul.f32 -1.442695, %v3968_v34 }
0x217b   :  { %7250 = vmatpush1.bf16.msra.mxu1 %v8891_v48 }
0x217c   :  { %7455 = vpow2.f32 %v6770_v25  ;;  %7088 = vmatprep.subr.bf16.mxu1 %v9753_v46 }
0x2184   :  { %v7454_v58 = vpop.eup %7453 }
0x2185   :  { %3981 = vrot.lane.b32.xlu0 %v7454_v58, %s7792_s16 }
0x2186   :  { %v7456_v60 = vpop.eup %7455 }
0x2187   :  { %v3972_v35 = vadd.f32 1.0, %v7456_v60 }
0x2189   :  { %7457 = vrcp.f32 %v3972_v35 }
0x2193   :  { %v7458_v11 = vpop.eup %7457 }
0x2194   :  { %v3979_v42 = vmul.f32 %v7458_v11, %v3977_v56 }
0x21f7   :  { %v3982_v32 = vpop.permute.xlu0 %3981 }
0x21f8   :  { %v3984_v29 = vmul.f32 %v7458_v11, %v3982_v32 }
0x21fa   :  { %3986 = vrot.lane.b32.xlu0 %v3984_v29, %s7804_s11 }
0x226c   :  { %v3987_v15 = vpop.permute.xlu0 %3986 }
0x226d   :  { %v8880_v12 = vadd.f32 %v3987_v15, %v3979_v42 }
0x226f   :  { %7459 = vtanh.f32 %v8880_v12 }
0x2279   :  { %v7460_v34 = vpop.eup %7459 }
0x227a   :  { %3992 = vrot.lane.b32.xlu1 %v7460_v34, %s7792_s16 }
0x22ec   :  { %v3993_v58 = vpop.permute.xlu1 %3992 }
0x22ed   :  { %v3995_v25 = vmul.f32 %v7458_v11, %v3993_v58 }
0x22ef   :  { %v3997_v60 = vrot.slane %v3995_v25, 4 }
0x22f1   :  { %3998 = vrot.lane.b32.xlu0 %v3997_v60, %s7804_s11 }
0x2363   :  { %v3999_v35 = vpop.permute.xlu0 %3998 }
0x2364   :  { %v4002_v32 = vsel %vm3528_vm13, %v3999_v35, %v8718_v26 }
0x2365   :  { %6771 = vmatmul.mubr.msk.f32.vlgmr.msra.gmra.mrb[42].mxu1 %vm258_vm1, %v4002_v32 }
0x2366   :  { %7089 = vmatpush3.bf16.msra.mxu1 %v8020_v4  ;;  %7090 = vmatprep.mubr.msk.bf16.mxu1 %vm7800_vm0, %v9753_v46 }
0x2367   :  { %7100 = vmatprep.subr.bf16.mxu1 %v9753_v46 }
0x2438   :  { %v4089_v11 = vpop.f32.mrb[42].mxu1 }
0x2439   :  { %v8908_v29 = vadd.f32 %v4089_v11, %v8144_v20  ;;  %v8910_v56 = vpop.f32.mrb[43].mxu1  ;;  %v8925_v11 = vld [vmem:[#allocation13 + $0x5] ss:$0 sm:$0xff] }
0x243b   :  { %v4113_v42 = vrot.slane %v8908_v29, %v8147_v21 }
0x243d   :  { %v4114_v15 = vcombine.high %v4113_v42, %v4113_v42  ;;  %v4121_v26 = vrot.slane %v4113_v42, %v8147_v21 }
0x243f   :  { %v4128_v55 = vrot.slane %v4114_v15, %v8147_v21  ;;  %v4129_v16 = vcombine.high %v4121_v26, %v4121_v26  ;;  %v4134_v14 = vrot.slane %v4121_v26, %v8128_v54 }
0x2441   :  { %v4152_v7 = vadd.f32 %v4134_v14, %v8159_v31  ;;  %v4151_v18 = vadd.f32 %v4134_v14, %v8157_v30  ;;  %v4142_v44 = vrot.slane %v4129_v16, %v8128_v54  ;;  %v4138_v37 = vrot.slane %v4128_v55, %v8128_v54 }
0x2442   :  { %v4130_v28 = vcombine.high %v4128_v55, %v4128_v55 }
0x2443   :  { %v4160_v34 = vmax.f32 %v4152_v7, 0.0  ;;  %v4159_v58 = vmax.f32 %v4151_v18, 0.0  ;;  %v4155_v25 = vadd.f32 %v4142_v44, %v8167_v41  ;;  %v4153_v60 = vadd.f32 %v4138_v37, %v8163_v38 }
0x2444   :  { %v4154_v35 = vadd.f32 %v4138_v37, %v8165_v40  ;;  %v4146_v32 = vrot.slane %v4130_v28, %v8128_v54  ;;  %v4156_v7 = vadd.f32 %v4142_v44, %v8169_v43 }
0x2445   :  { %v4168_v42 = vmul.f32 %v8925_v11, %v4160_v34  ;;  %v4167_v15 = vmul.f32 %v8925_v11, %v4159_v58  ;;  %v4163_v26 = vmax.f32 %v4155_v25, 0.0  ;;  %v4161_v16 = vmax.f32 %v4153_v60, 0.0 }
0x2446   :  { %v4162_v14 = vmax.f32 %v4154_v35, 0.0  ;;  %v4157_v55 = vadd.f32 %v4146_v32, %v8175_v49  ;;  %v4164_v27 = vmax.f32 %v4156_v7, 0.0  ;;  %v4158_v58 = vadd.f32 %v4146_v32, %v8181_v59 }
0x2447   :  { %v4178_v18 = vsel %vm258_vm1, %v4168_v42, 0.0  ;;  %v4175_v47 = vsel %vm258_vm1, %v4167_v15, 0.0  ;;  %v4171_v37 = vmul.f32 %v8925_v11, %v4163_v26  ;;  %v4169_v28 = vmul.f32 %v8925_v11, %v4161_v16 }
0x2448   :  { %4179 = vadd.xlane.f32.xlu0 %v4178_v18  ;;  %4176 = vadd.xlane.f32.xlu1 %v4175_v47  ;;  %v4165_v34 = vmax.f32 %v4157_v55, 0.0  ;;  %v4170_v44 = vmul.f32 %v8925_v11, %v4162_v14  ;;  %v4172_v47 = vmul.f32 %v8925_v11, %v4164_v27  ;;  %v4166_v26 = vmax.f32 %v4158_v58, 0.0 }
0x2449   :  { %v4187_v25 = vsel %vm258_vm1, %v4171_v37, 0.0  ;;  %v4181_v60 = vsel %vm258_vm1, %v4169_v28, 0.0 }
0x244a   :  { %v4173_v35 = vmul.f32 %v8925_v11, %v4165_v34  ;;  %v4184_v42 = vsel %vm258_vm1, %v4170_v44, 0.0  ;;  %v4190_v32 = vsel %vm258_vm1, %v4172_v47, 0.0  ;;  %v4174_v16 = vmul.f32 %v8925_v11, %v4166_v26 }
0x244c   :  { %4188 = vadd.xlane.f32.xlu1 %v4187_v25  ;;  %4182 = vadd.xlane.f32.xlu0 %v4181_v60  ;;  %v4193_v15 = vsel %vm258_vm1, %v4173_v35, 0.0  ;;  %v4196_v14 = vsel %vm258_vm1, %v4174_v16, 0.0 }
0x2450   :  { %4185 = vadd.xlane.f32.xlu0 %v4184_v42  ;;  %4194 = vadd.xlane.f32.xlu1 %v4193_v15 }
0x2454   :  { %4191 = vadd.xlane.f32.xlu0 %v4190_v32 }
0x2458   :  { %4197 = vadd.xlane.f32.xlu0 %v4196_v14 }
0x24d5   :  { %v4180_v55 = vpop.xlane.xlu0 %4179  ;;  %v4177_v7 = vpop.xlane.xlu1 %4176 }
0x24d6   :  { %v4214_v27 = vrot.slane %v4180_v55, %v8211_v62  ;;  %v4210_v58 = vrot.slane %v4177_v7, %v8215_v1 }
0x24d8   :  { %v4215_v32 = vsel %vm802_vm8, %v4214_v27, %v4210_v58 }
0x24d9   :  { %v4183_v18 = vpop.xlane.xlu0 %4182  ;;  %v4189_v37 = vpop.xlane.xlu1 %4188 }
0x24da   :  { %v4219_v60 = vrot.slane %v4183_v18, %v8215_v1  ;;  %v4228_v35 = vrot.slane %v4189_v37, %v8215_v1 }
0x24dd   :  { %v4186_v28 = vpop.xlane.xlu0 %4185  ;;  %v4195_v42 = vpop.xlane.xlu1 %4194 }
0x24de   :  { %v4223_v34 = vrot.slane %v4186_v28, %v8211_v62  ;;  %v4237_v16 = vrot.slane %v4195_v42, %v8215_v1 }
0x24e0   :  { %v4224_v15 = vsel %vm802_vm8, %v4223_v34, %v4219_v60 }
0x24e1   :  { %v4192_v25 = vpop.xlane.xlu0 %4191  ;;  %v4243_v17 = vsel %vm316_vm3, %v4224_v15, %v4215_v32 }
0x24e2   :  { %v4232_v44 = vrot.slane %v4192_v25, %v8211_v62 }
0x24e4   :  { %v4233_v26 = vsel %vm802_vm8, %v4232_v44, %v4228_v35 }
0x24e5   :  { %v4198_v47 = vpop.xlane.xlu0 %4197  ;;  %v4244_v50 = vsel %vm318_vm4, %v4233_v26, %v4243_v17 }
0x24e6   :  { %v4241_v14 = vrot.slane %v4198_v47, %v8211_v62 }
0x24e8   :  { %v4242_v0 = vsel %vm802_vm8, %v4241_v14, %v4237_v16 }
0x24e9   :  { %v4245_v8 = vsel %vm320_vm5, %v4242_v0, %v4244_v50 }
0x24ea   :  { %v4247_v2 = vsel %vm589_vm7, %v4245_v8, -inf }
0x24eb   :  { %4248 = vmax.xlane.f32.xlu1 %v4247_v2 }
0x2578   :  { %v4249_v34 = vpop.xlane.xlu1 %4248 }
0x2579   :  { %v4254_v60 = vrot.slane %v4249_v34, %v8128_v54  ;;  %v4258_v27 = vrot.slane %v4249_v34, %v8234_v45  ;;  %v4262_v58 = vrot.slane %v4249_v34, %v8239_v57  ;;  %v4266_v44 = vrot.slane %v4249_v34, %v8243_v19 }
0x257b   :  { %v4271_v35 = vsub.f32 %v4177_v7, %v4254_v60  ;;  %v4272_v15 = vsub.f32 %v4180_v55, %v4254_v60  ;;  %v4273_v32 = vsub.f32 %v4183_v18, %v4258_v27  ;;  %v4275_v16 = vsub.f32 %v4189_v37, %v4262_v58 }
0x257c   :  { %v4277_v26 = vsub.f32 %v4195_v42, %v4266_v44  ;;  %v4274_v8 = vsub.f32 %v4186_v28, %v4258_v27  ;;  %v4276_v33 = vsub.f32 %v4192_v25, %v4262_v58  ;;  %v4278_v53 = vsub.f32 %v4198_v47, %v4266_v44 }
0x257d   :  { %v4279_v14 = vmul.f32 1.442695, %v4271_v35  ;;  %v4281_v17 = vmul.f32 1.442695, %v4272_v15  ;;  %v4287_v0 = vmul.f32 1.442695, %v4275_v16 }
0x257e   :  { %v4283_v2 = vmul.f32 1.442695, %v4273_v32  ;;  %v4291_v50 = vmul.f32 1.442695, %v4277_v26  ;;  %v4285_v52 = vmul.f32 1.442695, %v4274_v8 }
0x257f   :  { %7461 = vpow2.f32 %v4279_v14  ;;  %v4289_v7 = vmul.f32 1.442695, %v4276_v33  ;;  %v4293_v37 = vmul.f32 1.442695, %v4278_v53 }
0x2580   :  { %7463 = vpow2.f32 %v4281_v17 }
0x2581   :  { %7465 = vpow2.f32 %v4287_v0 }
0x2582   :  { %7467 = vpow2.f32 %v4283_v2 }
0x2583   :  { %7469 = vpow2.f32 %v4291_v50 }
0x2584   :  { %7471 = vpow2.f32 %v4285_v52 }
0x2585   :  { %7473 = vpow2.f32 %v4289_v7 }
0x2586   :  { %7475 = vpow2.f32 %v4293_v37 }
0x2589   :  { %v7462_v55 = vpop.eup %7461 }
0x258a   :  { %v7464_v18 = vpop.eup %7463  ;;  %4304 = vperm.xlu0 %7319, %v7462_v55  }
0x258b   :  { %4307 = vperm.xlu1 %7318, %v7464_v18   ;;  %v7466_v42 = vpop.eup %7465 }
0x258c   :  { %v7468_v34 = vpop.eup %7467 }
0x258d   :  { %v7470_v28 = vpop.eup %7469 }
0x258e   :  { %4316 = vperm.xlu0 %7319, %v7466_v42   ;;  %v7472_v60 = vpop.eup %7471 }
0x258f   :  { %4310 = vperm.xlu1 %7318, %v7468_v34   ;;  %v7474_v25 = vpop.eup %7473 }
0x2590   :  { %v7476_v47 = vpop.eup %7475 }
0x2592   :  { %4322 = vperm.xlu0 %7319, %v7470_v28  }
0x2593   :  { %4313 = vperm.xlu1 %7318, %v7472_v60  }
0x2597   :  { %4319 = vperm.xlu1 %7318, %v7474_v25  }
0x259b   :  { %4325 = vperm.xlu1 %7318, %v7476_v47  }
0x2609   :  { %v4305_v33 = vpop.permute.xlu0 %4304 }
0x260a   :  { %v4308_v52 = vpop.permute.xlu1 %4307  ;;  %v4330_v32 = vrot.slane %v4305_v33, %v8215_v1 }
0x260b   :  { %v4334_v15 = vrot.slane %v4308_v52, %v8211_v62 }
0x260d   :  { %v4317_v58 = vpop.permute.xlu0 %4316  ;;  %v4335_v50 = vsel %vm802_vm8, %v4334_v15, %v4330_v32 }
0x260e   :  { %v4311_v27 = vpop.permute.xlu1 %4310  ;;  %v4348_v17 = vrot.slane %v4317_v58, %v8215_v1 }
0x260f   :  { %v4339_v16 = vrot.slane %v4311_v27, %v8215_v1 }
0x2611   :  { %v4323_v26 = vpop.permute.xlu0 %4322 }
0x2612   :  { %v4314_v44 = vpop.permute.xlu1 %4313  ;;  %v4357_v7 = vrot.slane %v4323_v26, %v8215_v1 }
0x2613   :  { %v4343_v53 = vrot.slane %v4314_v44, %v8211_v62 }
0x2615   :  { %v4344_v0 = vsel %vm802_vm8, %v4343_v53, %v4339_v16 }
0x2616   :  { %v4320_v35 = vpop.permute.xlu1 %4319  ;;  %v4363_v52 = vsel %vm316_vm3, %v4344_v0, %v4335_v50 }
0x2617   :  { %v4352_v14 = vrot.slane %v4320_v35, %v8211_v62 }
0x2619   :  { %v4353_v8 = vsel %vm802_vm8, %v4352_v14, %v4348_v17 }
0x261a   :  { %v4326_v2 = vpop.permute.xlu1 %4325  ;;  %v4364_v27 = vsel %vm318_vm4, %v4353_v8, %v4363_v52 }
0x261b   :  { %v4361_v37 = vrot.slane %v4326_v2, %v8211_v62 }
0x261d   :  { %v4362_v33 = vsel %vm802_vm8, %v4361_v37, %v4357_v7 }
0x261e   :  { %v4365_v58 = vsel %vm320_vm5, %v4362_v33, %v4364_v27 }
0x261f   :  { %v4367_v44 = vsel %vm589_vm7, %v4365_v58, 0.0 }
0x2620   :  { %4368 = vadd.xlane.f32.xlu0 %v4367_v44 }
0x26ad   :  { %v4369_v53 = vpop.xlane.xlu0 %4368 }
0x26ae   :  { %7477 = vrcp.f32 %v4369_v53 }
0x26b8   :  { %v7478_v35 = vpop.eup %7477 }
0x26b9   :  { %v4387_v15 = vrot.slane %v7478_v35, %v8243_v19  ;;  %v4375_v32 = vrot.slane %v7478_v35, %v8128_v54  ;;  %v4379_v16 = vrot.slane %v7478_v35, %v8234_v45 }
0x26bb   :  { %v8985_v14 = vmul.f32 %v7470_v28, %v4387_v15  ;;  %v8987_v17 = vmul.f32 %v7476_v47, %v4387_v15  ;;  %v8989_v26 = vmul.f32 %v7462_v55, %v4375_v32  ;;  %v8991_v0 = vmul.f32 %v7464_v18, %v4375_v32 }
0x26bc   :  { %v8997_v37 = vmul.f32 %v7468_v34, %v4379_v16  ;;  %v8999_v52 = vmul.f32 %v7472_v60, %v4379_v16  ;;  %v4383_v18 = vrot.slane %v7478_v35, %v8239_v57 }
0x26bd   :  { %9771 = vst [vmem:[#allocation56_spill] sm:$0xff] %v8985_v14  ;;  %9772 = vst [vmem:[#allocation57_spill] sm:$0xff] %v8987_v17  ;;  %v4482_v8 = vpack.c.bf16 %v8987_v17, %v8985_v14  ;;  %v4479_v2 = vpack.c.bf16 %v8991_v0, %v8989_v26 }
0x26be   :  { %9773 = vst [vmem:[#allocation58_spill] sm:$0xff] %v8991_v0  ;;  %9774 = vst [vmem:[#allocation59_spill] sm:$0xff] %v8999_v52  ;;  %v4480_v55 = vpack.c.bf16 %v8999_v52, %v8997_v37  ;;  %v9004_v33 = vmul.f32 %v7466_v42, %v4383_v18  ;;  %v9006_v27 = vmul.f32 %v7474_v25, %v4383_v18 }
0x26bf   :  { %v4671_v50 = vunpack.c.h.b16 %v4482_v8  ;;  %v4484_v7 = vunpack.c.l.b16 %v4479_v2  ;;  %v4485_v28 = vunpack.c.h.b16 %v4479_v2  ;;  %v4670_v53 = vunpack.c.l.b16 %v4482_v8 }
0x26c0   :  { %v4546_v47 = vunpack.c.l.b16 %v4480_v55  ;;  %9775 = vst [vmem:[#allocation60_spill] sm:$0xff] %v9006_v27  ;;  %v4547_v58 = vunpack.c.h.b16 %v4480_v55  ;;  %v4481_v34 = vpack.c.bf16 %v9006_v27, %v9004_v33 }
0x26c1   :  { %4676 = vperm.xlu0 %7319, %v4671_v50   ;;  %4487 = vperm.xlu1 %7318, %v4484_v7  }
0x26c2   :  { %v4608_v60 = vunpack.c.l.b16 %v4481_v34  ;;  %v4609_v44 = vunpack.c.h.b16 %v4481_v34 }
0x26c5   :  { %4490 = vperm.xlu1 %7318, %v4485_v28  }
0x26c9   :  { %4549 = vperm.xlu1 %7318, %v4546_v47  }
0x26cd   :  { %4552 = vperm.xlu1 %7318, %v4547_v58  }
0x26d1   :  { %4611 = vperm.xlu1 %7318, %v4608_v60  }
0x26d5   :  { %4614 = vperm.xlu1 %7318, %v4609_v44  }
0x26d9   :  { %4673 = vperm.xlu1 %7318, %v4670_v53  }
0x2740   :  { %v4488_v15 = vpop.permute.xlu1 %4487  ;;  %v4677_v60 = vpop.permute.xlu0 %4676 }
0x2741   :  { %v4495_v32 = vrot.slane %v4488_v15, %v8215_v1 }
0x2744   :  { %v4491_v35 = vpop.permute.xlu1 %4490 }
0x2745   :  { %v4499_v42 = vrot.slane %v4491_v35, %v8211_v62  ;;  %v4685_v35 = vrot.slane %v4677_v60, %v8211_v62 }
0x2747   :  { %v4500_v25 = vsel %vm802_vm8, %v4499_v42, %v4495_v32 }
0x2748   :  { %v4501_v16 = vpack.c.b16 %v4500_v25, %v4500_v25  ;;  %v4550_v2 = vpop.permute.xlu1 %4549 }
0x2749   :  { %v4557_v8 = vrot.slane %v4550_v2, %v8215_v1 }
0x274a   :  { %7085 = vmatmul.mubr.msk.bf16.vlgmr.msra.gmra.mrb[52].mxu0 %vm1089_vm9, %v4501_v16 }
0x274b   :  { %7095 = vmatpush3.bf16.msra.mxu0 %v8025_v5  ;;  %7096 = vmatprep.mubr.msk.bf16.mxu0 %vm7800_vm0, %v9753_v46 }
0x274c   :  { %v4553_v50 = vpop.permute.xlu1 %4552  ;;  %7251 = vmatprep.subr.bf16.mxu0 %v9754_v10 }
0x274d   :  { %v4561_v7 = vrot.slane %v4553_v50, %v8211_v62 }
0x274f   :  { %v4562_v28 = vsel %vm802_vm8, %v4561_v7, %v4557_v8 }
0x2750   :  { %v4563_v55 = vpack.c.b16 %v4562_v28, %v4562_v28  ;;  %v4612_v18 = vpop.permute.xlu1 %4611 }
0x2751   :  { %v4619_v58 = vrot.slane %v4612_v18, %v8215_v1 }
0x2752   :  { %7091 = vmatmul.mubr.msk.bf16.vlgmr.msra.gmra.mrb[52].mxu1 %vm1089_vm9, %v4563_v55 }
0x2753   :  { %7101 = vmatpush3.bf16.msra.mxu1 %v8031_v6  ;;  %7102 = vmatprep.mubr.msk.bf16.mxu1 %vm7800_vm0, %v9753_v46 }
0x2754   :  { %v4615_v47 = vpop.permute.xlu1 %4614  ;;  %7258 = vmatprep.subr.bf16.mxu1 %v8883_v13 }
0x2755   :  { %v4623_v34 = vrot.slane %v4615_v47, %v8211_v62 }
0x2757   :  { %v4624_v44 = vsel %vm802_vm8, %v4623_v34, %v4619_v58 }
0x2758   :  { %v4625_v53 = vpack.c.b16 %v4624_v44, %v4624_v44  ;;  %v4674_v15 = vpop.permute.xlu1 %4673 }
0x2759   :  { %v4681_v32 = vrot.slane %v4674_v15, %v8215_v1 }
0x275a   :  { %7097 = vmatmul.mubr.msk.bf16.vlgmr.msra.gmra.mrb[56].mxu0 %vm1089_vm9, %v4625_v53 }
0x275b   :  { %v4686_v42 = vsel %vm802_vm8, %v4685_v35, %v4681_v32  ;;  %7114 = vmatprep.mubr.msk.f32.mxu0 %vm7800_vm0, %v9753_v46 }
0x275c   :  { %v4687_v13 = vpack.c.b16 %v4686_v42, %v4686_v42 }
0x275e   :  { %7103 = vmatmul.mubr.msk.bf16.vlgmr.msra.gmra.mrb[56].mxu1 %vm1089_vm9, %v4687_v13  ;;  %v4745_v13 = vld [vmem:[#allocation10] sm:$0xff] }
0x275f   :  { %7260 = vmatpush1.bf16.msra.mxu1 %v8885_v63  ;;  %4940 = vmatprep.mubr.f32.mxu1 %v9753_v46 }
0x2760   :  { %7262 = vmatprep.subr.bf16.mxu1 %v8887_v24 }
0x2763   :  { %7264 = vmatpush1.bf16.msra.mxu1 %v8891_v48 }
0x2764   :  { %7123 = vmatprep.subr.bf16.mxu1 %v9753_v46 }
0x281d   :  { %v4539_v25 = vpop.f32.mrb[52].mxu0 }
0x281e   :  { %v7086_v16 = vpop.f32.mrb[53].mxu0 }
0x281f   :  { %v4542_v2 = vpop.f32.mrb[54].mxu0  ;;  %v4746_v16 = vld [vmem:[#allocation10 + $0x8] sm:$0xff] }
0x2820   :  { %v7087_v50 = vpop.f32.mrb[55].mxu0  ;;  %v9045_v2 = vpack.c.bf16 %v4746_v16, %v4745_v13 }
0x2821   :  { %v4748_v50 = vld [vmem:[#allocation10 + $0x18] sm:$0xff] }
0x2822   :  { %7253 = vmatpush3.bf16.msra.mxu0 %v9045_v2 }
0x2823   :  { %7254 = vmatprep.subr.bf16.mxu0 %v9754_v10 }
0x2825   :  { %v4601_v8 = vpop.f32.mrb[52].mxu1 }
0x2826   :  { %v4735_v7 = vrot.slane %v4601_v8, 7  ;;  %v7092_v28 = vpop.f32.mrb[53].mxu1 }
0x2827   :  { %v4604_v55 = vpop.f32.mrb[54].mxu1 }
0x2828   :  { %v4736_v18 = vsel %vm316_vm3, %v4735_v7, %v4539_v25  ;;  %v7093_v47 = vpop.f32.mrb[55].mxu1  ;;  %v4747_v25 = vld [vmem:[#allocation10 + $0x10] sm:$0xff]  ;;  %v6772_v7 = vmul.f32 -1.442695, %v8908_v29 }
0x2829   :  { %v9048_v8 = vpack.c.bf16 %v4748_v50, %v4747_v25 }
0x282a   :  { %7479 = vpow2.f32 %v6772_v7 }
0x282b   :  { %7256 = vmatpush3.bf16.msra.mxu0 %v9048_v8 }
0x282c   :  { %7117 = vmatprep.subr.bf16.mxu0 %v9753_v46 }
0x282d   :  { %v4663_v63 = vpop.f32.mrb[56].mxu0 }
0x282e   :  { %v4737_v58 = vrot.slane %v4663_v63, 6  ;;  %v7098_v34 = vpop.f32.mrb[57].mxu0 }
0x282f   :  { %v4666_v60 = vpop.f32.mrb[58].mxu0  ;;  %v4004_v34 = vrot.slane %v8880_v12, 4 }
0x2830   :  { %v4738_v24 = vsel %vm318_vm4, %v4737_v58, %v4736_v18  ;;  %v7099_v48 = vpop.f32.mrb[59].mxu0  ;;  %v9059_v58 = vadd.f32 %v8910_v56, %v8337_v9 }
0x2831   :  { %v4725_v44 = vpop.f32.mrb[56].mxu1 }
0x2832   :  { %v4739_v53 = vrot.slane %v4725_v44, 5  ;;  %v7104_v15 = vpop.f32.mrb[57].mxu1  ;;  %9776 = vst [vmem:[#allocation61_spill] sm:$0xff] %v9059_v58 }
0x2833   :  { %v4728_v35 = vpop.f32.mrb[58].mxu1 }
0x2834   :  { %v7105_v32 = vpop.f32.mrb[59].mxu1  ;;  %v4740_v42 = vsel %vm320_vm5, %v4739_v53, %v4738_v24  ;;  %v7480_v28 = vpop.eup %7479 }
0x2835   :  { %4741 = vrot.lane.b32.xlu1 %v4740_v42, %s7804_s11  ;;  %v4103_v55 = vadd.f32 1.0, %v7480_v28 }
0x2837   :  { %7481 = vrcp.f32 %v4103_v55 }
0x2841   :  { %v7482_v18 = vpop.eup %7481 }
0x28a7   :  { %v4742_v47 = vpop.permute.xlu1 %4741 }
0x28a8   :  { %v4744_v63 = vmul.f32 %v7482_v18, %v4742_v47 }
0x28aa   :  { %4750 = vrot.lane.b32.xlu1 %v4744_v63, %s7805_s17 }
0x28ae   :  { %4826 = vrot.lane.b32.xlu1 %v8908_v29, %s7792_s16 }
0x28b2   :  { %4828 = vrot.lane.b32.xlu1 %v9059_v58, %s7792_s16 }
0x28b6   :  { %4005 = vrot.lane.b32.xlu1 %v4004_v34, %s7805_s17 }
0x28ba   :  { %4008 = vrot.lane.b32.xlu1 %v8710_v23, %s7805_s17 }
0x291c   :  { %v4751_v60 = vpop.permute.xlu1 %4750 }
0x291d   :  { %7115 = vmatmul.mubr.msk.f32.vlgmr.msra.gmra.mrb[50].mxu0 %vm258_vm1, %v4751_v60 }
0x291e   :  { %7118 = vmatpush3.bf16.msra.mxu0 %v8015_v3  ;;  %7119 = vmatprep.mubr.msk.bf16.mxu0 %vm7800_vm0, %v9753_v46 }
0x291f   :  { %7129 = vmatprep.subr.bf16.mxu0 %v9753_v46 }
0x2920   :  { %v4827_v29 = vpop.permute.xlu1 %4826 }
0x2924   :  { %v4829_v56 = vpop.permute.xlu1 %4828 }
0x2925   :  { %v4830_v35 = vsel %vm1421_vm10, %v4827_v29, %v4829_v56 }
0x2928   :  { %v4006_v24 = vpop.permute.xlu1 %4005 }
0x292c   :  { %v4009_v48 = vpop.permute.xlu1 %4008 }
0x292d   :  { %v4011_v12 = vsel %vm3528_vm13, %v4006_v24, %v4009_v48 }
0x292e   :  { %4841 = vrot.lane.b32.xlu1 %v4011_v12, %s7804_s11 }
0x29a0   :  { %v4842_v55 = vpop.permute.xlu1 %4841 }
0x29f0   :  { %v4820_v44 = vpop.f32.mrb[50].mxu0 }
0x29f1   :  { %v4824_v53 = vadd.f32 %v4820_v44, %v8103_v36  ;;  %v7116_v15 = vpop.f32.mrb[51].mxu0 }
0x29f3   :  { %v4832_v32 = vadd.f32 %v4830_v35, %v4824_v53 }
0x29f5   :  { %7483 = vtanh.f32 %v4832_v32  ;;  %v6778_v13 = vmul.f32 -1.442695, %v4832_v32 }
0x29f7   :  { %7485 = vpow2.f32 %v6778_v13 }
0x29ff   :  { %v7484_v42 = vpop.eup %7483 }
0x2a00   :  { %4846 = vrot.lane.b32.xlu0 %v7484_v42, %s7792_s16 }
0x2a01   :  { %v7486_v16 = vpop.eup %7485 }
0x2a02   :  { %v4836_v25 = vadd.f32 1.0, %v7486_v16 }
0x2a04   :  { %7487 = vrcp.f32 %v4836_v25 }
0x2a0e   :  { %v7488_v50 = vpop.eup %7487 }
0x2a0f   :  { %v4844_v18 = vmul.f32 %v7488_v50, %v4842_v55 }
0x2a72   :  { %v4847_v7 = vpop.permute.xlu0 %4846 }
0x2a73   :  { %v4849_v28 = vmul.f32 %v7488_v50, %v4847_v7 }
0x2a75   :  { %4851 = vrot.lane.b32.xlu0 %v4849_v28, %s7804_s11 }
0x2ae7   :  { %v4852_v47 = vpop.permute.xlu0 %4851 }
0x2ae8   :  { %v9079_v63 = vadd.f32 %v4852_v47, %v4844_v18 }
0x2aea   :  { %7489 = vtanh.f32 %v9079_v63 }
0x2af4   :  { %v7490_v34 = vpop.eup %7489 }
0x2af5   :  { %4857 = vrot.lane.b32.xlu1 %v7490_v34, %s7792_s16 }
0x2b67   :  { %v4858_v60 = vpop.permute.xlu1 %4857 }
0x2b68   :  { %v4860_v29 = vmul.f32 %v7488_v50, %v4858_v60 }
0x2b6a   :  { %v9086_v56 = vsel %vm3528_vm13, %v4860_v29, %v8714_v61 }
0x2b6b   :  { %9777 = vst [vmem:[#allocation62_spill] sm:$0xff] %v9086_v56  ;;  %4872 = vrot.lane.b32.xlu0 %v9086_v56, %s7804_s11 }
0x2bdd   :  { %v9090_v24 = vpop.permute.xlu0 %4872 }
0x2bde   :  { %6779 = vmatmul.mubr.msk.f32.vlgmr.msra.gmra.mrb[60].mxu1 %vm258_vm1, %v9090_v24 }
0x2bdf   :  { %7124 = vmatpush3.bf16.msra.mxu1 %v8020_v4  ;;  %7125 = vmatprep.mubr.msk.bf16.mxu1 %vm7800_vm0, %v9753_v46 }
0x2be0   :  { %7135 = vmatprep.subr.bf16.mxu1 %v9753_v46 }
0x2cb1   :  { %v4942_v48 = vpop.f32.mrb[60].mxu1 }
0x2cb2   :  { %v9099_v12 = vadd.f32 %v4942_v48, %v8144_v20  ;;  %v9101_v61 = vpop.f32.mrb[61].mxu1 }
0x2cb4   :  { %v4962_v44 = vrot.slane %v9099_v12, %v8147_v21 }
0x2cb6   :  { %v4963_v53 = vcombine.high %v4962_v44, %v4962_v44  ;;  %v4970_v15 = vrot.slane %v4962_v44, %v8147_v21 }
0x2cb8   :  { %v4977_v35 = vrot.slane %v4963_v53, %v8147_v21  ;;  %v4978_v32 = vcombine.high %v4970_v15, %v4970_v15  ;;  %v4983_v42 = vrot.slane %v4970_v15, %v8128_v54 }
0x2cba   :  { %v5001_v13 = vadd.f32 %v4983_v42, %v8159_v31  ;;  %v5000_v16 = vadd.f32 %v4983_v42, %v8157_v30  ;;  %v4987_v25 = vrot.slane %v4977_v35, %v8128_v54  ;;  %v4991_v50 = vrot.slane %v4978_v32, %v8128_v54 }
0x2cbb   :  { %v4979_v7 = vcombine.high %v4977_v35, %v4977_v35 }
0x2cbc   :  { %v5009_v28 = vmax.f32 %v5001_v13, 0.0  ;;  %v5008_v55 = vmax.f32 %v5000_v16, 0.0  ;;  %v5003_v18 = vadd.f32 %v4987_v25, %v8165_v40  ;;  %v5002_v47 = vadd.f32 %v4987_v25, %v8163_v38 }
0x2cbd   :  { %v5005_v34 = vadd.f32 %v4991_v50, %v8169_v43  ;;  %v5004_v60 = vadd.f32 %v4991_v50, %v8167_v41  ;;  %v4995_v29 = vrot.slane %v4979_v7, %v8128_v54 }
0x2cbe   :  { %v5017_v48 = vmul.f32 %v8925_v11, %v5009_v28  ;;  %v5016_v44 = vmul.f32 %v8925_v11, %v5008_v55  ;;  %v5011_v53 = vmax.f32 %v5003_v18, 0.0  ;;  %v5010_v15 = vmax.f32 %v5002_v47, 0.0 }
0x2cbf   :  { %v5013_v32 = vmax.f32 %v5005_v34, 0.0  ;;  %v5012_v35 = vmax.f32 %v5004_v60, 0.0  ;;  %v5007_v42 = vadd.f32 %v4995_v29, %v8181_v59  ;;  %v5006_v13 = vadd.f32 %v4995_v29, %v8175_v49 }
0x2cc0   :  { %v5027_v16 = vsel %vm258_vm1, %v5017_v48, 0.0  ;;  %v5024_v25 = vsel %vm258_vm1, %v5016_v44, 0.0  ;;  %v5019_v50 = vmul.f32 %v8925_v11, %v5011_v53  ;;  %v5018_v7 = vmul.f32 %v8925_v11, %v5010_v15 }
0x2cc1   :  { %5028 = vadd.xlane.f32.xlu0 %v5027_v16  ;;  %5025 = vadd.xlane.f32.xlu1 %v5024_v25  ;;  %v5021_v28 = vmul.f32 %v8925_v11, %v5013_v32  ;;  %v5020_v55 = vmul.f32 %v8925_v11, %v5012_v35  ;;  %v5015_v34 = vmax.f32 %v5007_v42, 0.0  ;;  %v5014_v60 = vmax.f32 %v5006_v13, 0.0 }
0x2cc2   :  { %v5033_v18 = vsel %vm258_vm1, %v5019_v50, 0.0  ;;  %v5030_v47 = vsel %vm258_vm1, %v5018_v7, 0.0 }
0x2cc3   :  { %v5039_v29 = vsel %vm258_vm1, %v5021_v28, 0.0  ;;  %v5036_v48 = vsel %vm258_vm1, %v5020_v55, 0.0  ;;  %v5023_v44 = vmul.f32 %v8925_v11, %v5015_v34  ;;  %v5022_v53 = vmul.f32 %v8925_v11, %v5014_v60 }
0x2cc5   :  { %5034 = vadd.xlane.f32.xlu1 %v5033_v18  ;;  %5031 = vadd.xlane.f32.xlu0 %v5030_v47  ;;  %v5045_v15 = vsel %vm258_vm1, %v5023_v44, 0.0  ;;  %v5042_v32 = vsel %vm258_vm1, %v5022_v53, 0.0 }
0x2cc9   :  { %5040 = vadd.xlane.f32.xlu1 %v5039_v29  ;;  %5037 = vadd.xlane.f32.xlu0 %v5036_v48 }
0x2ccd   :  { %5046 = vadd.xlane.f32.xlu1 %v5045_v15  ;;  %5043 = vadd.xlane.f32.xlu0 %v5042_v32 }
0x2d4e   :  { %v5029_v35 = vpop.xlane.xlu0 %5028  ;;  %v5026_v42 = vpop.xlane.xlu1 %5025 }
0x2d4f   :  { %v5063_v11 = vrot.slane %v5029_v35, %v8211_v62  ;;  %v5059_v55 = vrot.slane %v5026_v42, %v8215_v1 }
0x2d51   :  { %v5064_v44 = vsel %vm802_vm8, %v5063_v11, %v5059_v55 }
0x2d52   :  { %v5035_v13 = vpop.xlane.xlu1 %5034  ;;  %v5032_v16 = vpop.xlane.xlu0 %5031 }
0x2d53   :  { %v5072_v25 = vrot.slane %v5035_v13, %v8211_v62  ;;  %v5068_v50 = vrot.slane %v5032_v16, %v8215_v1 }
0x2d55   :  { %v5073_v34 = vsel %vm802_vm8, %v5072_v25, %v5068_v50 }
0x2d56   :  { %v5041_v7 = vpop.xlane.xlu1 %5040  ;;  %v5038_v28 = vpop.xlane.xlu0 %5037  ;;  %v5092_v32 = vsel %vm316_vm3, %v5073_v34, %v5064_v44 }
0x2d57   :  { %v5081_v18 = vrot.slane %v5041_v7, %v8211_v62  ;;  %v5077_v47 = vrot.slane %v5038_v28, %v8215_v1 }
0x2d59   :  { %v5082_v48 = vsel %vm802_vm8, %v5081_v18, %v5077_v47 }
0x2d5a   :  { %v5047_v60 = vpop.xlane.xlu1 %5046  ;;  %v5044_v29 = vpop.xlane.xlu0 %5043  ;;  %v5093_v17 = vsel %vm318_vm4, %v5082_v48, %v5092_v32 }
0x2d5b   :  { %v5090_v53 = vrot.slane %v5047_v60, %v8211_v62  ;;  %v5086_v15 = vrot.slane %v5044_v29, %v8215_v1 }
0x2d5d   :  { %v5091_v58 = vsel %vm802_vm8, %v5090_v53, %v5086_v15 }
0x2d5e   :  { %v5094_v27 = vsel %vm320_vm5, %v5091_v58, %v5093_v17 }
0x2d5f   :  { %v5096_v25 = vsel %vm589_vm7, %v5094_v27, -inf }
0x2d60   :  { %5097 = vmax.xlane.f32.xlu0 %v5096_v25 }
0x2ded   :  { %v5098_v50 = vpop.xlane.xlu0 %5097 }
0x2dee   :  { %v5103_v18 = vrot.slane %v5098_v50, %v8128_v54  ;;  %v5107_v11 = vrot.slane %v5098_v50, %v8234_v45  ;;  %v5111_v55 = vrot.slane %v5098_v50, %v8239_v57  ;;  %v5115_v34 = vrot.slane %v5098_v50, %v8243_v19 }
0x2df0   :  { %v5120_v47 = vsub.f32 %v5026_v42, %v5103_v18  ;;  %v5121_v52 = vsub.f32 %v5029_v35, %v5103_v18  ;;  %v5122_v0 = vsub.f32 %v5032_v16, %v5107_v11  ;;  %v5124_v44 = vsub.f32 %v5038_v28, %v5111_v55 }
0x2df1   :  { %v5123_v15 = vsub.f32 %v5035_v13, %v5107_v11  ;;  %v5126_v27 = vsub.f32 %v5044_v29, %v5115_v34  ;;  %v5125_v32 = vsub.f32 %v5041_v7, %v5111_v55  ;;  %v5127_v14 = vsub.f32 %v5047_v60, %v5115_v34 }
0x2df2   :  { %v5128_v53 = vmul.f32 1.442695, %v5120_v47  ;;  %v5130_v48 = vmul.f32 1.442695, %v5121_v52  ;;  %v5132_v17 = vmul.f32 1.442695, %v5122_v0 }
0x2df3   :  { %v5136_v58 = vmul.f32 1.442695, %v5124_v44  ;;  %v5134_v25 = vmul.f32 1.442695, %v5123_v15  ;;  %v5140_v56 = vmul.f32 1.442695, %v5126_v27 }
0x2df4   :  { %7491 = vpow2.f32 %v5128_v53  ;;  %v5138_v35 = vmul.f32 1.442695, %v5125_v32  ;;  %v5142_v52 = vmul.f32 1.442695, %v5127_v14 }
0x2df5   :  { %7493 = vpow2.f32 %v5130_v48 }
0x2df6   :  { %7495 = vpow2.f32 %v5132_v17 }
0x2df7   :  { %7497 = vpow2.f32 %v5136_v58 }
0x2df8   :  { %7499 = vpow2.f32 %v5134_v25 }
0x2df9   :  { %7501 = vpow2.f32 %v5140_v56 }
0x2dfa   :  { %7503 = vpow2.f32 %v5138_v35 }
0x2dfb   :  { %7505 = vpow2.f32 %v5142_v52 }
0x2dfe   :  { %v7492_v42 = vpop.eup %7491 }
0x2dff   :  { %v7494_v16 = vpop.eup %7493  ;;  %5153 = vperm.xlu1 %7318, %v7492_v42  }
0x2e00   :  { %5156 = vperm.xlu0 %7319, %v7494_v16   ;;  %v7496_v13 = vpop.eup %7495 }
0x2e01   :  { %v7498_v0 = vpop.eup %7497 }
0x2e02   :  { %v7500_v7 = vpop.eup %7499 }
0x2e03   :  { %5159 = vperm.xlu1 %7318, %v7496_v13   ;;  %v7502_v28 = vpop.eup %7501 }
0x2e04   :  { %5165 = vperm.xlu0 %7319, %v7498_v0   ;;  %v7504_v29 = vpop.eup %7503 }
0x2e05   :  { %v7506_v60 = vpop.eup %7505 }
0x2e07   :  { %5162 = vperm.xlu1 %7318, %v7500_v7  }
0x2e08   :  { %5171 = vperm.xlu0 %7319, %v7502_v28  }
0x2e0b   :  { %5168 = vperm.xlu1 %7318, %v7504_v29  }
0x2e0f   :  { %5174 = vperm.xlu1 %7318, %v7506_v60  }
0x2e7e   :  { %v5154_v56 = vpop.permute.xlu1 %5153 }
0x2e7f   :  { %v5157_v50 = vpop.permute.xlu0 %5156  ;;  %v5179_v44 = vrot.slane %v5154_v56, %v8215_v1 }
0x2e80   :  { %v5183_v34 = vrot.slane %v5157_v50, %v8211_v62 }
0x2e82   :  { %v5160_v18 = vpop.permute.xlu1 %5159  ;;  %v5184_v25 = vsel %vm802_vm8, %v5183_v34, %v5179_v44 }
0x2e83   :  { %v5166_v11 = vpop.permute.xlu0 %5165  ;;  %v5188_v53 = vrot.slane %v5160_v18, %v8215_v1 }
0x2e84   :  { %v5197_v15 = vrot.slane %v5166_v11, %v8215_v1 }
0x2e86   :  { %v5163_v55 = vpop.permute.xlu1 %5162 }
0x2e87   :  { %v5192_v14 = vrot.slane %v5163_v55, %v8211_v62  ;;  %v5172_v17 = vpop.permute.xlu0 %5171 }
0x2e88   :  { %v5206_v35 = vrot.slane %v5172_v17, %v8215_v1 }
0x2e89   :  { %v5193_v27 = vsel %vm802_vm8, %v5192_v14, %v5188_v53 }
0x2e8a   :  { %v5169_v47 = vpop.permute.xlu1 %5168  ;;  %v5212_v56 = vsel %vm316_vm3, %v5193_v27, %v5184_v25 }
0x2e8b   :  { %v5201_v48 = vrot.slane %v5169_v47, %v8211_v62 }
0x2e8d   :  { %v5202_v58 = vsel %vm802_vm8, %v5201_v48, %v5197_v15 }
0x2e8e   :  { %v5175_v32 = vpop.permute.xlu1 %5174  ;;  %v5213_v18 = vsel %vm318_vm4, %v5202_v58, %v5212_v56 }
0x2e8f   :  { %v5210_v52 = vrot.slane %v5175_v32, %v8211_v62 }
0x2e91   :  { %v5211_v50 = vsel %vm802_vm8, %v5210_v52, %v5206_v35 }
0x2e92   :  { %v5214_v11 = vsel %vm320_vm5, %v5211_v50, %v5213_v18 }
0x2e93   :  { %v5216_v55 = vsel %vm589_vm7, %v5214_v11, 0.0 }
0x2e94   :  { %5217 = vadd.xlane.f32.xlu0 %v5216_v55 }
0x2f21   :  { %v5218_v14 = vpop.xlane.xlu0 %5217 }
0x2f22   :  { %7507 = vrcp.f32 %v5218_v14 }
0x2f2c   :  { %v7508_v47 = vpop.eup %7507 }
0x2f2d   :  { %v5224_v34 = vrot.slane %v7508_v47, %v8128_v54  ;;  %v5228_v48 = vrot.slane %v7508_v47, %v8234_v45 }
0x2f2f   :  { %v9172_v44 = vmul.f32 %v7492_v42, %v5224_v34  ;;  %v9174_v53 = vmul.f32 %v7494_v16, %v5224_v34  ;;  %v9179_v27 = vmul.f32 %v7496_v13, %v5228_v48  ;;  %v9181_v58 = vmul.f32 %v7500_v7, %v5228_v48 }
0x2f30   :  { %v5232_v42 = vrot.slane %v7508_v47, %v8239_v57  ;;  %v5236_v7 = vrot.slane %v7508_v47, %v8243_v19 }
0x2f31   :  { %v5331_v15 = vpack.c.bf16 %v9174_v53, %v9172_v44  ;;  %v5332_v25 = vpack.c.bf16 %v9181_v58, %v9179_v27 }
0x2f32   :  { %v9186_v35 = vmul.f32 %v7498_v0, %v5232_v42  ;;  %v9188_v52 = vmul.f32 %v7504_v29, %v5232_v42  ;;  %v9193_v18 = vmul.f32 %v7502_v28, %v5236_v7  ;;  %v9195_v11 = vmul.f32 %v7506_v60, %v5236_v7 }
0x2f33   :  { %v5336_v17 = vunpack.c.l.b16 %v5331_v15  ;;  %v5337_v32 = vunpack.c.h.b16 %v5331_v15  ;;  %v5398_v16 = vunpack.c.l.b16 %v5332_v25  ;;  %v5399_v56 = vunpack.c.h.b16 %v5332_v25 }
0x2f34   :  { %v5333_v13 = vpack.c.bf16 %v9188_v52, %v9186_v35  ;;  %v5334_v0 = vpack.c.bf16 %v9195_v11, %v9193_v18 }
0x2f35   :  { %5339 = vperm.xlu1 %7318, %v5336_v17  }
0x2f36   :  { %v5460_v50 = vunpack.c.l.b16 %v5333_v13  ;;  %v5461_v55 = vunpack.c.h.b16 %v5333_v13  ;;  %v5522_v29 = vunpack.c.l.b16 %v5334_v0  ;;  %v5523_v14 = vunpack.c.h.b16 %v5334_v0 }
0x2f39   :  { %5342 = vperm.xlu1 %7318, %v5337_v32  }
0x2f3d   :  { %5401 = vperm.xlu1 %7318, %v5398_v16  }
0x2f41   :  { %5404 = vperm.xlu1 %7318, %v5399_v56  }
0x2f45   :  { %5463 = vperm.xlu1 %7318, %v5460_v50  }
0x2f49   :  { %5466 = vperm.xlu1 %7318, %v5461_v55  }
0x2f4d   :  { %5525 = vperm.xlu1 %7318, %v5522_v29  }
0x2f51   :  { %5528 = vperm.xlu1 %7318, %v5523_v14  }
0x2fb4   :  { %v5340_v34 = vpop.permute.xlu1 %5339 }
0x2fb5   :  { %v5347_v47 = vrot.slane %v5340_v34, %v8215_v1 }
0x2fb8   :  { %v5343_v48 = vpop.permute.xlu1 %5342 }
0x2fb9   :  { %v5351_v15 = vrot.slane %v5343_v48, %v8211_v62 }
0x2fbb   :  { %v5352_v28 = vsel %vm802_vm8, %v5351_v15, %v5347_v47 }
0x2fbc   :  { %v5353_v60 = vpack.c.b16 %v5352_v28, %v5352_v28  ;;  %v5402_v17 = vpop.permute.xlu1 %5401 }
0x2fbd   :  { %v5409_v25 = vrot.slane %v5402_v17, %v8215_v1 }
0x2fbe   :  { %7120 = vmatmul.mubr.msk.bf16.vlgmr.msra.gmra.mrb[60].mxu0 %vm1089_vm9, %v5353_v60 }
0x2fbf   :  { %7130 = vmatpush3.bf16.msra.mxu0 %v8025_v5  ;;  %7131 = vmatprep.mubr.msk.bf16.mxu0 %vm7800_vm0, %v9753_v46 }
0x2fc0   :  { %v5405_v32 = vpop.permute.xlu1 %5404  ;;  %7265 = vmatprep.subr.bf16.mxu0 %v9754_v10 }
0x2fc1   :  { %v5413_v42 = vrot.slane %v5405_v32, %v8211_v62 }
0x2fc3   :  { %v5414_v16 = vsel %vm802_vm8, %v5413_v42, %v5409_v25 }
0x2fc4   :  { %v5415_v56 = vpack.c.b16 %v5414_v16, %v5414_v16  ;;  %v5464_v13 = vpop.permute.xlu1 %5463 }
0x2fc5   :  { %v5471_v50 = vrot.slane %v5464_v13, %v8215_v1 }
0x2fc6   :  { %7126 = vmatmul.mubr.msk.bf16.vlgmr.msra.gmra.mrb[64].mxu1 %vm1089_vm9, %v5415_v56 }
0x2fc7   :  { %7136 = vmatpush3.bf16.msra.mxu1 %v8031_v6  ;;  %7137 = vmatprep.mubr.msk.bf16.mxu1 %vm7800_vm0, %v9753_v46 }
0x2fc8   :  { %v5467_v7 = vpop.permute.xlu1 %5466 }
0x2fc9   :  { %v5475_v55 = vrot.slane %v5467_v7, %v8211_v62 }
0x2fcb   :  { %v5476_v0 = vsel %vm802_vm8, %v5475_v55, %v5471_v50 }
0x2fcc   :  { %v5477_v29 = vpack.c.b16 %v5476_v0, %v5476_v0  ;;  %v5526_v14 = vpop.permute.xlu1 %5525 }
0x2fcd   :  { %v5533_v48 = vrot.slane %v5526_v14, %v8215_v1 }
0x2fce   :  { %7132 = vmatmul.mubr.msk.bf16.vlgmr.msra.gmra.mrb[64].mxu0 %vm1089_vm9, %v5477_v29 }
0x2fcf   :  { %7267 = vmatpush3.bf16.msra.mxu0 %v9045_v2  ;;  %7149 = vmatprep.mubr.msk.f32.mxu0 %vm7800_vm0, %v9753_v46 }
0x2fd0   :  { %v5529_v34 = vpop.permute.xlu1 %5528  ;;  %7268 = vmatprep.subr.bf16.mxu0 %v9754_v10 }
0x2fd1   :  { %v5537_v47 = vrot.slane %v5529_v34, %v8211_v62 }
0x2fd3   :  { %v5538_v15 = vsel %vm802_vm8, %v5537_v47, %v5533_v48  ;;  %7270 = vmatpush3.bf16.msra.mxu0 %v9048_v8 }
0x2fd4   :  { %v5539_v28 = vpack.c.b16 %v5538_v15, %v5538_v15  ;;  %7152 = vmatprep.subr.bf16.mxu0 %v9753_v46 }
0x2fd6   :  { %7138 = vmatmul.mubr.msk.bf16.vlgmr.msra.gmra.mrb[68].mxu1 %vm1089_vm9, %v5539_v28 }
0x2fd7   :  { %5808 = vmatprep.mubr.f32.mxu1 %v9753_v46 }
0x3091   :  { %v5391_v2 = vpop.f32.mrb[60].mxu0 }
0x3092   :  { %v7121_v60 = vpop.f32.mrb[61].mxu0 }
0x3093   :  { %v5394_v17 = vpop.f32.mrb[62].mxu0 }
0x3094   :  { %v7122_v32 = vpop.f32.mrb[63].mxu0  ;;  %v6780_v17 = vmul.f32 -1.442695, %v9099_v12 }
0x3096   :  { %7509 = vpow2.f32 %v6780_v17 }
0x3099   :  { %v5453_v25 = vpop.f32.mrb[64].mxu1 }
0x309a   :  { %v5587_v42 = vrot.slane %v5453_v25, 7  ;;  %v7127_v16 = vpop.f32.mrb[65].mxu1 }
0x309b   :  { %v5456_v56 = vpop.f32.mrb[66].mxu1 }
0x309c   :  { %v5588_v13 = vsel %vm316_vm3, %v5587_v42, %v5391_v2  ;;  %v7128_v7 = vpop.f32.mrb[67].mxu1  ;;  %v9237_v56 = vadd.f32 %v9101_v61, %v8337_v9 }
0x309e   :  { %v5682_v7 = vrot.slane %v9237_v56, 4 }
0x30a0   :  { %v7510_v2 = vpop.eup %7509 }
0x30a1   :  { %v5515_v50 = vpop.f32.mrb[64].mxu0  ;;  %v4952_v32 = vadd.f32 1.0, %v7510_v2 }
0x30a2   :  { %v5589_v8 = vrot.slane %v5515_v50, 6  ;;  %v7133_v55 = vpop.f32.mrb[65].mxu0 }
0x30a3   :  { %v5518_v0 = vpop.f32.mrb[66].mxu0  ;;  %7511 = vrcp.f32 %v4952_v32 }
0x30a4   :  { %v5590_v29 = vsel %vm318_vm4, %v5589_v8, %v5588_v13  ;;  %v7134_v14 = vpop.f32.mrb[67].mxu0  ;;  %v5681_v13 = vrot.slane %v9099_v12, 4 }
0x30a9   :  { %v5577_v34 = vpop.f32.mrb[68].mxu1 }
0x30aa   :  { %v5591_v48 = vrot.slane %v5577_v34, 5  ;;  %v7139_v47 = vpop.f32.mrb[69].mxu1 }
0x30ab   :  { %v5580_v15 = vpop.f32.mrb[70].mxu1 }
0x30ac   :  { %v7140_v28 = vpop.f32.mrb[71].mxu1  ;;  %v5592_v60 = vsel %vm320_vm5, %v5591_v48, %v5590_v29 }
0x30ad   :  { %5593 = vrot.lane.b32.xlu0 %v5592_v60, %s7804_s11  ;;  %v7512_v25 = vpop.eup %7511 }
0x311f   :  { %v5594_v42 = vpop.permute.xlu0 %5593 }
0x3120   :  { %v5596_v16 = vmul.f32 %v7512_v25, %v5594_v42 }
0x3122   :  { %5602 = vrot.lane.b32.xlu1 %v5596_v16, %s7805_s17  ;;  %v5734_v16 = vld [vmem:[#allocation8 + $0x8] sm:$0xff] }
0x3126   :  { %5683 = vrot.lane.b32.xlu1 %v5681_v13, %s7792_s16  ;;  %v5736_v13 = vld [vmem:[#allocation8 + $0x18] sm:$0xff] }
0x312a   :  { %5685 = vrot.lane.b32.xlu1 %v5682_v7, %s7792_s16  ;;  %v5733_v7 = vld [vmem:[#allocation8] sm:$0xff] }
0x3194   :  { %v5603_v50 = vpop.permute.xlu1 %5602 }
0x3195   :  { %7150 = vmatmul.mubr.msk.f32.vlgmr.msra.gmra.mrb[68].mxu0 %vm258_vm1, %v5603_v50  ;;  %v9262_v50 = vpack.c.bf16 %v5736_v13, %v5734_v16 }
0x3196   :  { %7153 = vmatpush3.bf16.msra.mxu0 %v8015_v3  ;;  %7154 = vmatprep.mubr.msk.bf16.mxu0 %vm7800_vm0, %v9753_v46 }
0x3197   :  { %7164 = vmatprep.subr.bf16.mxu0 %v9753_v46  ;;  %7272 = vmatprep.subr.bf16.mxu1 %v9262_v50 }
0x3198   :  { %v5684_v61 = vpop.permute.xlu1 %5683 }
0x319c   :  { %v5686_v55 = vpop.permute.xlu1 %5685 }
0x319d   :  { %v5687_v14 = vsel %vm1421_vm10, %v5684_v61, %v5686_v55  ;;  %v5735_v61 = vld [vmem:[#allocation8 + $0x10] sm:$0xff]  ;;  %v5740_v55 = vld [vmem:[#allocation8 + $0x38] sm:$0xff] }
0x3268   :  { %v5672_v8 = vpop.f32.mrb[68].mxu0 }
0x3269   :  { %v5677_v12 = vrot.slane %v5672_v8, 4  ;;  %v7151_v0 = vpop.f32.mrb[69].mxu0  ;;  %v5738_v8 = vld [vmem:[#allocation8 + $0x28] sm:$0xff] }
0x326a   :  { %v5739_v0 = vld [vmem:[#allocation8 + $0x30] sm:$0xff] }
0x326b   :  { %v5679_v29 = vadd.f32 %v5677_v12, %v8103_v36  ;;  %v9256_v36 = vsel %vm3528_vm13, %v9079_v63, %v8710_v23  ;;  %v9264_v12 = vpack.c.bf16 %v5735_v61, %v5733_v7  ;;  %v9266_v23 = vpack.c.bf16 %v5740_v55, %v5738_v8  ;;  %v5737_v63 = vld [vmem:[#allocation8 + $0x20] sm:$0xff] }
0x326c   :  { %v5698_v2 = vrot.slane %v9256_v36, 4 }
0x326d   :  { %v5689_v34 = vadd.f32 %v5687_v14, %v5679_v29  ;;  %7274 = vmatpush1.bf16.msra.mxu1 %v9264_v12  ;;  %v9270_v29 = vpack.c.bf16 %v5739_v0, %v5737_v63 }
0x326e   :  { %7276 = vmatprep.subr.bf16.mxu1 %v9266_v23 }
0x326f   :  { %7513 = vtanh.f32 %v5689_v34  ;;  %v6786_v3 = vmul.f32 -1.442695, %v5689_v34 }
0x3271   :  { %7515 = vpow2.f32 %v6786_v3  ;;  %7278 = vmatpush1.bf16.msra.mxu1 %v9270_v29 }
0x3272   :  { %7158 = vmatprep.subr.bf16.mxu1 %v9753_v46 }
0x3279   :  { %v7514_v48 = vpop.eup %7513 }
0x327a   :  { %5702 = vrot.lane.b32.xlu1 %v7514_v48, %s7792_s16 }
0x327b   :  { %v7516_v47 = vpop.eup %7515 }
0x327c   :  { %v5693_v15 = vadd.f32 1.0, %v7516_v47 }
0x327e   :  { %7517 = vrcp.f32 %v5693_v15 }
0x3288   :  { %v7518_v28 = vpop.eup %7517 }
0x3289   :  { %v5700_v32 = vmul.f32 %v7518_v28, %v5698_v2 }
0x32ec   :  { %v5703_v60 = vpop.permute.xlu1 %5702 }
0x32ed   :  { %v5705_v17 = vmul.f32 %v7518_v28, %v5703_v60 }
0x32ef   :  { %5707 = vrot.lane.b32.xlu1 %v5705_v17, %s7804_s11 }
0x3361   :  { %v5708_v25 = vpop.permute.xlu1 %5707 }
0x3362   :  { %v9259_v42 = vadd.f32 %v5708_v25, %v5700_v32 }
0x3364   :  { %7519 = vtanh.f32 %v9259_v42 }
0x336e   :  { %v7520_v14 = vpop.eup %7519 }
0x336f   :  { %5713 = vrot.lane.b32.xlu0 %v7520_v14, %s7792_s16 }
0x33e1   :  { %v5714_v34 = vpop.permute.xlu0 %5713 }
0x33e2   :  { %v5716_v48 = vmul.f32 %v7518_v28, %v5714_v34 }
0x33e4   :  { %v5718_v3 = vrot.slane %v5716_v48, 4  ;;  %v7553_v48 = vld [vmem:[#allocation13 + $0x5] ss:$0 sm:$0xff] }
0x33e6   :  { %5719 = vrot.lane.b32.xlu1 %v5718_v3, %s7804_s11 }
0x3458   :  { %v5720_v47 = vpop.permute.xlu1 %5719 }
0x3459   :  { %v5723_v15 = vsel %vm5249_vm14, %v5720_v47, %v9090_v24 }
0x345a   :  { %6787 = vmatmul.mubr.msk.f32.vlgmr.msra.gmra.mrb[62].mxu1 %vm258_vm1, %v5723_v15 }
0x345b   :  { %7159 = vmatpush3.bf16.msra.mxu1 %v8020_v4  ;;  %7160 = vmatprep.mubr.msk.bf16.mxu1 %vm7800_vm0, %v9753_v46 }
0x345c   :  { %7170 = vmatprep.subr.bf16.mxu1 %v9753_v46 }
0x352d   :  { %v5810_v28 = vpop.f32.mrb[62].mxu1 }
0x352e   :  { %v9287_v60 = vadd.f32 %v5810_v28, %v8144_v20  ;;  %v9289_v17 = vpop.f32.mrb[63].mxu1 }
0x3530   :  { %v5834_v2 = vrot.slane %v9287_v60, %v8147_v21 }
0x3532   :  { %v5835_v32 = vcombine.high %v5834_v2, %v5834_v2  ;;  %v5842_v24 = vrot.slane %v5834_v2, %v8147_v21 }
0x3534   :  { %v5849_v25 = vrot.slane %v5835_v32, %v8147_v21  ;;  %v5850_v4 = vcombine.high %v5842_v24, %v5842_v24  ;;  %v5855_v16 = vrot.slane %v5842_v24, %v8128_v54 }
0x3536   :  { %v5873_v13 = vadd.f32 %v5855_v16, %v8159_v31  ;;  %v5872_v7 = vadd.f32 %v5855_v16, %v8157_v30  ;;  %v5863_v20 = vrot.slane %v5850_v4, %v8128_v54  ;;  %v5859_v61 = vrot.slane %v5849_v25, %v8128_v54 }
0x3537   :  { %v5851_v8 = vcombine.high %v5849_v25, %v5849_v25 }
0x3538   :  { %v5881_v55 = vmax.f32 %v5873_v13, 0.0  ;;  %v5880_v63 = vmax.f32 %v5872_v7, 0.0  ;;  %v5876_v0 = vadd.f32 %v5863_v20, %v8167_v41  ;;  %v5874_v14 = vadd.f32 %v5859_v61, %v8163_v38 }
0x3539   :  { %v5875_v21 = vadd.f32 %v5859_v61, %v8165_v40  ;;  %v5867_v34 = vrot.slane %v5851_v8, %v8128_v54  ;;  %v5877_v2 = vadd.f32 %v5863_v20, %v8169_v43 }
0x353a   :  { %v5889_v3 = vmul.f32 %v7553_v48, %v5881_v55  ;;  %v5888_v31 = vmul.f32 %v7553_v48, %v5880_v63  ;;  %v5884_v47 = vmax.f32 %v5876_v0, 0.0  ;;  %v5882_v30 = vmax.f32 %v5874_v14, 0.0 }
0x353b   :  { %v5883_v15 = vmax.f32 %v5875_v21, 0.0  ;;  %v5878_v28 = vadd.f32 %v5867_v34, %v8175_v49  ;;  %v5885_v25 = vmax.f32 %v5877_v2, 0.0  ;;  %v5879_v4 = vadd.f32 %v5867_v34, %v8181_v59 }
0x353c   :  { %v5899_v32 = vsel %vm258_vm1, %v5889_v3, 0.0  ;;  %v5896_v41 = vsel %vm258_vm1, %v5888_v31, 0.0  ;;  %v5892_v24 = vmul.f32 %v7553_v48, %v5884_v47  ;;  %v5890_v38 = vmul.f32 %v7553_v48, %v5882_v30 }
0x353d   :  { %5900 = vadd.xlane.f32.xlu1 %v5899_v32  ;;  %5897 = vadd.xlane.f32.xlu0 %v5896_v41  ;;  %v5886_v40 = vmax.f32 %v5878_v28, 0.0  ;;  %v5891_v7 = vmul.f32 %v7553_v48, %v5883_v15  ;;  %v5893_v61 = vmul.f32 %v7553_v48, %v5885_v25  ;;  %v5887_v8 = vmax.f32 %v5879_v4, 0.0 }
0x353e   :  { %v5908_v16 = vsel %vm258_vm1, %v5892_v24, 0.0  ;;  %v5902_v13 = vsel %vm258_vm1, %v5890_v38, 0.0 }
0x353f   :  { %v5894_v49 = vmul.f32 %v7553_v48, %v5886_v40  ;;  %v5905_v43 = vsel %vm258_vm1, %v5891_v7, 0.0  ;;  %v5911_v55 = vsel %vm258_vm1, %v5893_v61, 0.0  ;;  %v5895_v63 = vmul.f32 %v7553_v48, %v5887_v8 }
0x3541   :  { %5909 = vadd.xlane.f32.xlu1 %v5908_v16  ;;  %5903 = vadd.xlane.f32.xlu0 %v5902_v13  ;;  %v5914_v20 = vsel %vm258_vm1, %v5894_v49, 0.0  ;;  %v5917_v59 = vsel %vm258_vm1, %v5895_v63, 0.0 }
0x3545   :  { %5906 = vadd.xlane.f32.xlu0 %v5905_v43  ;;  %5915 = vadd.xlane.f32.xlu1 %v5914_v20 }
0x3549   :  { %5912 = vadd.xlane.f32.xlu0 %v5911_v55 }
0x354d   :  { %5918 = vadd.xlane.f32.xlu0 %v5917_v59 }
0x35ca   :  { %v5898_v0 = vpop.xlane.xlu0 %5897  ;;  %v5901_v14 = vpop.xlane.xlu1 %5900 }
0x35cb   :  { %v5935_v30 = vrot.slane %v5901_v14, %v8211_v62  ;;  %v5931_v15 = vrot.slane %v5898_v0, %v8215_v1 }
0x35cd   :  { %v5936_v40 = vsel %vm802_vm8, %v5935_v30, %v5931_v15 }
0x35ce   :  { %v5904_v21 = vpop.xlane.xlu0 %5903  ;;  %v5910_v34 = vpop.xlane.xlu1 %5909 }
0x35cf   :  { %v5940_v28 = vrot.slane %v5904_v21, %v8215_v1  ;;  %v5949_v2 = vrot.slane %v5910_v34, %v8215_v1 }
0x35d2   :  { %v5907_v3 = vpop.xlane.xlu0 %5906  ;;  %v5916_v32 = vpop.xlane.xlu1 %5915 }
0x35d3   :  { %v5944_v31 = vrot.slane %v5907_v3, %v8211_v62  ;;  %v5958_v25 = vrot.slane %v5916_v32, %v8215_v1 }
0x35d5   :  { %v5945_v41 = vsel %vm802_vm8, %v5944_v31, %v5940_v28 }
0x35d6   :  { %v5913_v47 = vpop.xlane.xlu0 %5912  ;;  %v5964_v16 = vsel %vm316_vm3, %v5945_v41, %v5936_v40 }
0x35d7   :  { %v5953_v48 = vrot.slane %v5913_v47, %v8211_v62 }
0x35d9   :  { %v5954_v38 = vsel %vm802_vm8, %v5953_v48, %v5949_v2 }
0x35da   :  { %v5919_v24 = vpop.xlane.xlu0 %5918  ;;  %v5965_v7 = vsel %vm318_vm4, %v5954_v38, %v5964_v16 }
0x35db   :  { %v5962_v4 = vrot.slane %v5919_v24, %v8211_v62 }
0x35dd   :  { %v5963_v13 = vsel %vm802_vm8, %v5962_v4, %v5958_v25 }
0x35de   :  { %v5966_v49 = vsel %vm320_vm5, %v5963_v13, %v5965_v7 }
0x35df   :  { %v5968_v43 = vsel %vm589_vm7, %v5966_v49, -inf }
0x35e0   :  { %5969 = vmax.xlane.f32.xlu1 %v5968_v43 }
0x366d   :  { %v5970_v20 = vpop.xlane.xlu1 %5969 }
0x366e   :  { %v5975_v61 = vrot.slane %v5970_v20, %v8128_v54  ;;  %v5979_v8 = vrot.slane %v5970_v20, %v8234_v45  ;;  %v5983_v55 = vrot.slane %v5970_v20, %v8239_v57  ;;  %v5987_v48 = vrot.slane %v5970_v20, %v8243_v19 }
0x3670   :  { %v5992_v63 = vsub.f32 %v5898_v0, %v5975_v61  ;;  %v5993_v59 = vsub.f32 %v5901_v14, %v5975_v61  ;;  %v5995_v31 = vsub.f32 %v5907_v3, %v5979_v8  ;;  %v5994_v30 = vsub.f32 %v5904_v21, %v5979_v8 }
0x3671   :  { %v5997_v2 = vsub.f32 %v5913_v47, %v5983_v55  ;;  %v5996_v38 = vsub.f32 %v5910_v34, %v5983_v55  ;;  %v5999_v25 = vsub.f32 %v5919_v24, %v5987_v48  ;;  %v5998_v16 = vsub.f32 %v5916_v32, %v5987_v48 }
0x3672   :  { %v6000_v15 = vmul.f32 1.442695, %v5992_v63  ;;  %v6002_v28 = vmul.f32 1.442695, %v5993_v59  ;;  %v6006_v41 = vmul.f32 1.442695, %v5995_v31 }
0x3673   :  { %v6004_v40 = vmul.f32 1.442695, %v5994_v30  ;;  %v6010_v4 = vmul.f32 1.442695, %v5997_v2  ;;  %v6008_v13 = vmul.f32 1.442695, %v5996_v38 }
0x3674   :  { %7521 = vpow2.f32 %v6000_v15  ;;  %v6014_v0 = vmul.f32 1.442695, %v5999_v25  ;;  %v6012_v14 = vmul.f32 1.442695, %v5998_v16 }
0x3675   :  { %7523 = vpow2.f32 %v6002_v28 }
0x3676   :  { %7525 = vpow2.f32 %v6006_v41 }
0x3677   :  { %7527 = vpow2.f32 %v6004_v40 }
0x3678   :  { %7529 = vpow2.f32 %v6010_v4 }
0x3679   :  { %7531 = vpow2.f32 %v6008_v13 }
0x367a   :  { %7533 = vpow2.f32 %v6014_v0 }
0x367b   :  { %7535 = vpow2.f32 %v6012_v14 }
0x367e   :  { %v7522_v21 = vpop.eup %7521 }
0x367f   :  { %v7524_v3 = vpop.eup %7523  ;;  %6025 = vperm.xlu0 %7319, %v7522_v21  }
0x3680   :  { %6028 = vperm.xlu1 %7318, %v7524_v3   ;;  %v7526_v47 = vpop.eup %7525 }
0x3681   :  { %v7528_v34 = vpop.eup %7527 }
0x3682   :  { %v7530_v24 = vpop.eup %7529 }
0x3683   :  { %6034 = vperm.xlu0 %7319, %v7526_v47   ;;  %v7532_v7 = vpop.eup %7531 }
0x3684   :  { %6031 = vperm.xlu1 %7318, %v7528_v34   ;;  %v7534_v32 = vpop.eup %7533 }
0x3685   :  { %v7536_v49 = vpop.eup %7535 }
0x3687   :  { %6040 = vperm.xlu0 %7319, %v7530_v24  }
0x3688   :  { %6037 = vperm.xlu1 %7318, %v7532_v7  }
0x368b   :  { %6046 = vperm.xlu0 %7319, %v7534_v32  }
0x368c   :  { %6043 = vperm.xlu1 %7318, %v7536_v49  }
0x36fe   :  { %v6026_v43 = vpop.permute.xlu0 %6025 }
0x36ff   :  { %v6029_v20 = vpop.permute.xlu1 %6028  ;;  %v6051_v28 = vrot.slane %v6026_v43, %v8215_v1 }
0x3700   :  { %v6055_v15 = vrot.slane %v6029_v20, %v8211_v62 }
0x3702   :  { %v6035_v61 = vpop.permute.xlu0 %6034  ;;  %v6056_v4 = vsel %vm802_vm8, %v6055_v15, %v6051_v28 }
0x3703   :  { %v6032_v8 = vpop.permute.xlu1 %6031  ;;  %v6064_v63 = vrot.slane %v6035_v61, %v8211_v62 }
0x3704   :  { %v6060_v55 = vrot.slane %v6032_v8, %v8215_v1 }
0x3706   :  { %v6041_v59 = vpop.permute.xlu0 %6040  ;;  %v6065_v2 = vsel %vm802_vm8, %v6064_v63, %v6060_v55 }
0x3707   :  { %v6038_v31 = vpop.permute.xlu1 %6037  ;;  %v6073_v30 = vrot.slane %v6041_v59, %v8211_v62  ;;  %v6084_v13 = vsel %vm316_vm3, %v6065_v2, %v6056_v4 }
0x3708   :  { %v6069_v48 = vrot.slane %v6038_v31, %v8215_v1 }
0x370a   :  { %v6047_v41 = vpop.permute.xlu0 %6046  ;;  %v6074_v38 = vsel %vm802_vm8, %v6073_v30, %v6069_v48 }
0x370b   :  { %v6044_v40 = vpop.permute.xlu1 %6043  ;;  %v6082_v25 = vrot.slane %v6047_v41, %v8211_v62  ;;  %v6085_v14 = vsel %vm318_vm4, %v6074_v38, %v6084_v13 }
0x370c   :  { %v6078_v16 = vrot.slane %v6044_v40, %v8215_v1 }
0x370e   :  { %v6083_v0 = vsel %vm802_vm8, %v6082_v25, %v6078_v16 }
0x370f   :  { %v6086_v43 = vsel %vm320_vm5, %v6083_v0, %v6085_v14 }
0x3710   :  { %v6088_v20 = vsel %vm589_vm7, %v6086_v43, 0.0  ;;  %vm2763_vm7 = vcmask 519552  }
0x3711   :  { %6089 = vadd.xlane.f32.xlu1 %v6088_v20 }
0x379e   :  { %v6090_v61 = vpop.xlane.xlu1 %6089 }
0x379f   :  { %7537 = vrcp.f32 %v6090_v61 }
0x37a9   :  { %v7538_v8 = vpop.eup %7537 }
0x37aa   :  { %v6096_v55 = vrot.slane %v7538_v8, %v8128_v54  ;;  %v6100_v31 = vrot.slane %v7538_v8, %v8234_v45  ;;  %v6104_v54 = vrot.slane %v7538_v8, %v8239_v57 }
0x37ac   :  { %v9352_v63 = vmul.f32 %v7522_v21, %v6096_v55  ;;  %v9354_v59 = vmul.f32 %v7524_v3, %v6096_v55  ;;  %v9359_v28 = vmul.f32 %v7528_v34, %v6100_v31  ;;  %v9361_v48 = vmul.f32 %v7526_v47, %v6100_v31 }
0x37ad   :  { %v9366_v3 = vmul.f32 %v7532_v7, %v6104_v54  ;;  %v9368_v45 = vmul.f32 %v7530_v24, %v6104_v54  ;;  %v6108_v47 = vrot.slane %v7538_v8, %v8243_v19 }
0x37ae   :  { %v6200_v30 = vpack.c.bf16 %v9354_v59, %v9352_v63  ;;  %v6201_v41 = vpack.c.bf16 %v9361_v48, %v9359_v28 }
0x37af   :  { %v6202_v34 = vpack.c.bf16 %v9368_v45, %v9366_v3  ;;  %v9373_v25 = vmul.f32 %v7536_v49, %v6108_v47  ;;  %v9375_v4 = vmul.f32 %v7534_v32, %v6108_v47 }
0x37b0   :  { %v6205_v15 = vunpack.c.l.b16 %v6200_v30  ;;  %v6206_v2 = vunpack.c.h.b16 %v6200_v30  ;;  %v6267_v21 = vunpack.c.l.b16 %v6201_v41  ;;  %v6268_v38 = vunpack.c.h.b16 %v6201_v41 }
0x37b1   :  { %v6329_v40 = vunpack.c.l.b16 %v6202_v34  ;;  %v6330_v57 = vunpack.c.h.b16 %v6202_v34  ;;  %v6203_v7 = vpack.c.bf16 %v9375_v4, %v9373_v25 }
0x37b2   :  { %6208 = vperm.xlu0 %7319, %v6205_v15  }
0x37b3   :  { %v6391_v24 = vunpack.c.l.b16 %v6203_v7  ;;  %v6392_v16 = vunpack.c.h.b16 %v6203_v7 }
0x37b6   :  { %6211 = vperm.xlu0 %7319, %v6206_v2  }
0x37ba   :  { %6270 = vperm.xlu0 %7319, %v6267_v21  }
0x37be   :  { %6273 = vperm.xlu0 %7319, %v6268_v38  }
0x37c2   :  { %6332 = vperm.xlu0 %7319, %v6329_v40  }
0x37c6   :  { %6335 = vperm.xlu0 %7319, %v6330_v57  }
0x37ca   :  { %6394 = vperm.xlu0 %7319, %v6391_v24  }
0x37ce   :  { %6397 = vperm.xlu0 %7319, %v6392_v16  }
0x3831   :  { %v6209_v13 = vpop.permute.xlu0 %6208 }
0x3832   :  { %v6216_v19 = vrot.slane %v6209_v13, %v8215_v1 }
0x3835   :  { %v6212_v0 = vpop.permute.xlu0 %6211 }
0x3836   :  { %v6220_v14 = vrot.slane %v6212_v0, %v8211_v62 }
0x3838   :  { %v6221_v49 = vsel %vm802_vm8, %v6220_v14, %v6216_v19 }
0x3839   :  { %v6222_v32 = vpack.c.b16 %v6221_v49, %v6221_v49  ;;  %v6271_v43 = vpop.permute.xlu0 %6270 }
0x383a   :  { %v6278_v61 = vrot.slane %v6271_v43, %v8215_v1 }
0x383b   :  { %7155 = vmatmul.mubr.msk.bf16.vlgmr.msra.gmra.mrb[72].mxu0 %vm1089_vm9, %v6222_v32 }
0x383c   :  { %7165 = vmatpush3.bf16.msra.mxu0 %v8025_v5  ;;  %7166 = vmatprep.mubr.msk.bf16.mxu0 %vm7800_vm0, %v9753_v46 }
0x383d   :  { %v6274_v20 = vpop.permute.xlu0 %6273  ;;  %7279 = vmatprep.subr.bf16.mxu0 %v9754_v10 }
0x383e   :  { %v6282_v8 = vrot.slane %v6274_v20, %v8211_v62 }
0x3840   :  { %v6283_v55 = vsel %vm802_vm8, %v6282_v8, %v6278_v61 }
0x3841   :  { %v6284_v31 = vpack.c.b16 %v6283_v55, %v6283_v55  ;;  %v6333_v30 = vpop.permute.xlu0 %6332 }
0x3842   :  { %v6340_v15 = vrot.slane %v6333_v30, %v8215_v1 }
0x3843   :  { %7161 = vmatmul.mubr.msk.bf16.vlgmr.msra.gmra.mrb[72].mxu1 %vm1089_vm9, %v6284_v31 }
0x3844   :  { %7171 = vmatpush3.bf16.msra.mxu1 %v8031_v6  ;;  %7172 = vmatprep.mubr.msk.bf16.mxu1 %vm7800_vm0, %v9753_v46 }
0x3845   :  { %v6336_v5 = vpop.permute.xlu0 %6335  ;;  %7286 = vmatprep.subr.bf16.mxu1 %v9262_v50 }
0x3846   :  { %v6344_v2 = vrot.slane %v6336_v5, %v8211_v62  ;;  %v6466_v5 = vld [vmem:[#allocation10] sm:$0xff] }
0x3848   :  { %v6345_v41 = vsel %vm802_vm8, %v6344_v2, %v6340_v15  ;;  %v6467_v15 = vld [vmem:[#allocation10 + $0x8] sm:$0xff]  ;;  %v6468_v2 = vld [vmem:[#allocation10 + $0x10] sm:$0xff] }
0x3849   :  { %v6346_v54 = vpack.c.b16 %v6345_v41, %v6345_v41  ;;  %v6395_v21 = vpop.permute.xlu0 %6394  ;;  %v7280_v41 = vpack.c.bf16 %v6467_v15, %v6466_v5  ;;  %v9780_v5 = vld [vmem:[#allocation30_spill] sm:$0xff]  ;;  %v9781_v15 = vld [vmem:[#allocation32_spill] sm:$0xff] }
0x384a   :  { %v6402_v38 = vrot.slane %v6395_v21, %v8215_v1  ;;  %v9417_v21 = vadd.f32 %v9289_v17, %v8337_v9 }
0x384b   :  { %7167 = vmatmul.mubr.msk.bf16.vlgmr.msra.gmra.mrb[76].mxu0 %vm1089_vm9, %v6346_v54  ;;  %v6469_v54 = vld [vmem:[#allocation10 + $0x18] sm:$0xff] }
0x384c   :  { %7184 = vmatprep.mubr.msk.f32.mxu0 %vm7800_vm0, %v9753_v46  ;;  %7281 = vmatpush3.bf16.msra.mxu0 %v7280_v41  ;;  %v9783_v41 = vld [vmem:[#allocation36_spill] sm:$0xff]  ;;  %vm1063_vm0 = vcmask 257152  }
0x384d   :  { %v6398_v6 = vpop.permute.xlu0 %6397  ;;  %7282 = vmatprep.subr.bf16.mxu0 %v9754_v10 }
0x384e   :  { %v6406_v34 = vrot.slane %v6398_v6, %v8211_v62  ;;  %v7283_v6 = vpack.c.bf16 %v6469_v54, %v6468_v2  ;;  %v9782_v2 = vld [vmem:[#allocation34_spill] sm:$0xff] }
0x384f   :  { %v9784_v54 = vld [vmem:[#allocation38_spill] sm:$0xff] }
0x3850   :  { %v6407_v50 = vsel %vm802_vm8, %v6406_v34, %v6402_v38  ;;  %v5725_v38 = vrot.slane %v9259_v42, 4  ;;  %7284 = vmatpush3.bf16.msra.mxu0 %v7283_v6  ;;  %v6788_v34 = vmul.f32 -1.442695, %v9287_v60  ;;  %v9785_v6 = vld [vmem:[#allocation42_spill] sm:$0xff] }
0x3851   :  { %v6408_v47 = vpack.c.b16 %v6407_v50, %v6407_v50 }
0x3852   :  { %7539 = vpow2.f32 %v6788_v34  ;;  %v9787_v34 = vld [vmem:[#allocation46_spill] sm:$0xff] }
0x3853   :  { %7173 = vmatmul.mubr.msk.bf16.vlgmr.msra.gmra.mrb[76].mxu1 %vm1089_vm9, %v6408_v47  ;;  %vm3608_vm9 = vcmask 650752  }
0x3854   :  { %7288 = vmatpush1.bf16.msra.mxu1 %v9264_v12  ;;  %6660 = vmatprep.mubr.f32.mxu1 %v9753_v46 }
0x3855   :  { %7290 = vmatprep.subr.bf16.mxu1 %v9266_v23 }
0x3858   :  { %7292 = vmatpush1.bf16.msra.mxu1 %v9270_v29 }
0x385c   :  { %v7540_v17 = vpop.eup %7539 }
0x385d   :  { %v5824_v50 = vadd.f32 1.0, %v7540_v17  ;;  %v9789_v17 = vld [vmem:[#allocation48_spill] sm:$0xff] }
0x385f   :  { %7541 = vrcp.f32 %v5824_v50  ;;  %v9790_v50 = vld [vmem:[#allocation50_spill] sm:$0xff] }
0x3869   :  { %v7542_v47 = vpop.eup %7541 }
0x390e   :  { %v6260_v40 = vpop.f32.mrb[72].mxu0 }
0x390f   :  { %v7156_v57 = vpop.f32.mrb[73].mxu0 }
0x3910   :  { %v6263_v7 = vpop.f32.mrb[74].mxu0 }
0x3911   :  { %v7157_v24 = vpop.f32.mrb[75].mxu0 }
0x3916   :  { %v6322_v16 = vpop.f32.mrb[72].mxu1 }
0x3917   :  { %v6456_v13 = vrot.slane %v6322_v16, 7  ;;  %v7162_v0 = vpop.f32.mrb[73].mxu1 }
0x3918   :  { %v6325_v19 = vpop.f32.mrb[74].mxu1 }
0x3919   :  { %v6457_v14 = vsel %vm316_vm3, %v6456_v13, %v6260_v40  ;;  %v7163_v49 = vpop.f32.mrb[75].mxu1 }
0x391e   :  { %v6384_v32 = vpop.f32.mrb[76].mxu0 }
0x391f   :  { %v6458_v43 = vrot.slane %v6384_v32, 6  ;;  %v7168_v12 = vpop.f32.mrb[77].mxu0 }
0x3920   :  { %v6387_v20 = vpop.f32.mrb[78].mxu0 }
0x3921   :  { %v6459_v46 = vsel %vm318_vm4, %v6458_v43, %v6457_v14  ;;  %v7169_v23 = vpop.f32.mrb[79].mxu0 }
0x3926   :  { %v6446_v61 = vpop.f32.mrb[76].mxu1 }
0x3927   :  { %v6460_v29 = vrot.slane %v6446_v61, 5  ;;  %v7174_v8 = vpop.f32.mrb[77].mxu1 }
0x3928   :  { %v6449_v55 = vpop.f32.mrb[78].mxu1 }
0x3929   :  { %v7175_v31 = vpop.f32.mrb[79].mxu1  ;;  %v6461_v30 = vsel %vm320_vm5, %v6460_v29, %v6459_v46 }
0x392a   :  { %6462 = vrot.lane.b32.xlu0 %v6461_v30, %s7804_s11  ;;  %v9778_v31 = vld [vmem:[#allocation26_spill] sm:$0xff]  ;;  %v9779_v30 = vld [vmem:[#allocation28_spill] sm:$0xff] }
0x392e   :  { %6547 = vrot.lane.b32.xlu0 %v9287_v60, %s7792_s16 }
0x3932   :  { %6549 = vrot.lane.b32.xlu0 %v9417_v21, %s7792_s16 }
0x3936   :  { %5726 = vrot.lane.b32.xlu0 %v5725_v38, %s7805_s17  ;;  %v9786_v38 = vld [vmem:[#allocation44_spill] sm:$0xff] }
0x393a   :  { %5729 = vrot.lane.b32.xlu0 %v9256_v36, %s7805_s17 }
0x399c   :  { %v6463_v40 = vpop.permute.xlu0 %6462 }
0x399d   :  { %v6465_v57 = vmul.f32 %v7542_v47, %v6463_v40  ;;  %v9791_v47 = vld [vmem:[#allocation52_spill] sm:$0xff]  ;;  %v9792_v40 = vld [vmem:[#allocation54_spill] sm:$0xff] }
0x399f   :  { %6471 = vrot.lane.b32.xlu1 %v6465_v57, %s7805_s17  ;;  %v9793_v57 = vld [vmem:[#allocation56_spill] sm:$0xff] }
0x39a0   :  { %v6548_v10 = vpop.permute.xlu0 %6547 }
0x39a4   :  { %v6550_v7 = vpop.permute.xlu0 %6549 }
0x39a5   :  { %v6551_v42 = vsel %vm1421_vm10, %v6548_v10, %v6550_v7  ;;  %v9802_v10 = vld [vmem:[#allocation39_spill] sm:$0xff]  ;;  %vm4477_vm10 = vcmask 781952  }
0x39a6   :  { %v9803_v7 = vld [vmem:[#allocation43_spill] sm:$0xff] }
0x39a8   :  { %v5727_v24 = vpop.permute.xlu0 %5726 }
0x39ac   :  { %v5730_v16 = vpop.permute.xlu0 %5729 }
0x39ad   :  { %v5732_v36 = vsel %vm5249_vm14, %v5727_v24, %v5730_v16  ;;  %v9805_v24 = vld [vmem:[#allocation47_spill] sm:$0xff]  ;;  %v9806_v16 = vld [vmem:[#allocation41_spill] sm:$0xff] }
0x39ae   :  { %6562 = vrot.lane.b32.xlu0 %v5732_v36, %s7804_s11  ;;  %v9807_v36 = vld [vmem:[#allocation49_spill] sm:$0xff] }
0x3a11   :  { %v6472_v60 = vpop.permute.xlu1 %6471 }
0x3a12   :  { %7185 = vmatmul.mubr.msk.f32.vlgmr.msra.gmra.mrb[70].mxu0 %vm258_vm1, %v6472_v60  ;;  %v9808_v60 = vld [vmem:[#allocation51_spill] sm:$0xff] }
0x3a20   :  { %v6563_v61 = vpop.permute.xlu0 %6562 }
0x3ae5   :  { %v6541_v13 = vpop.f32.mrb[70].mxu0 }
0x3ae6   :  { %v6545_v0 = vadd.f32 %v6541_v13, %v8108_v39  ;;  %v7186_v19 = vpop.f32.mrb[71].mxu0  ;;  %v9809_v13 = vld [vmem:[#allocation53_spill] sm:$0xff] }
0x3ae7   :  { %v9811_v19 = vld [vmem:[#allocation59_spill] sm:$0xff] }
0x3ae8   :  { %v6553_v14 = vadd.f32 %v6551_v42, %v6545_v0  ;;  %v9804_v42 = vld [vmem:[#allocation45_spill] sm:$0xff]  ;;  %v9810_v0 = vld [vmem:[#allocation58_spill] sm:$0xff] }
0x3aea   :  { %7543 = vtanh.f32 %v6553_v14  ;;  %v6794_v32 = vmul.f32 -1.442695, %v6553_v14  ;;  %v9812_v14 = vld [vmem:[#allocation55_spill] sm:$0xff] }
0x3aec   :  { %7545 = vpow2.f32 %v6794_v32  ;;  %v9813_v32 = vld [vmem:[#allocation60_spill] sm:$0xff] }
0x3af4   :  { %v7544_v49 = vpop.eup %7543 }
0x3af5   :  { %6567 = vrot.lane.b32.xlu1 %v7544_v49, %s7792_s16 }
0x3af6   :  { %v7546_v43 = vpop.eup %7545 }
0x3af7   :  { %v6557_v12 = vadd.f32 1.0, %v7546_v43 }
0x3af9   :  { %7547 = vrcp.f32 %v6557_v12 }
0x3b03   :  { %v7548_v20 = vpop.eup %7547 }
0x3b04   :  { %v6565_v29 = vmul.f32 %v7548_v20, %v6563_v61 }
0x3b67   :  { %v6568_v46 = vpop.permute.xlu1 %6567 }
0x3b68   :  { %v6570_v23 = vmul.f32 %v7548_v20, %v6568_v46 }
0x3b6a   :  { %6572 = vrot.lane.b32.xlu1 %v6570_v23, %s7804_s11 }
0x3bdc   :  { %v6573_v8 = vpop.permute.xlu1 %6572 }
0x3bdd   :  { %v6575_v39 = vadd.f32 %v6573_v8, %v6565_v29 }
0x3bdf   :  { %7549 = vtanh.f32 %v6575_v39  ;;  %v9815_v39 = vld [vmem:[#allocation24_spill] sm:$0xff] }
0x3be9   :  { %v7550_v55 = vpop.eup %7549 }
0x3bea   :  { %6578 = vrot.lane.b32.xlu0 %v7550_v55, %s7792_s16  ;;  %v1025_v55 = vadd.s32 4294967272, %v9815_v39 }
0x3bee   :  { %997 = vperm.xlu0 %7319, %v8263_v22   ;;  %v9788_v22 = vld [vmem:[#allocation40_spill] sm:$0xff] }
0x3bf2   :  { %1003 = vperm.xlu0 %7319, %v9778_v31  }
0x3bf6   :  { %1009 = vperm.xlu0 %7319, %v9779_v30  }
0x3bfa   :  { %1015 = vperm.xlu0 %7319, %v9780_v5  }
0x3bfe   :  { %1844 = vperm.xlu0 %7319, %v9781_v15  }
0x3c02   :  { %1850 = vperm.xlu0 %7319, %v9782_v2  }
0x3c06   :  { %1856 = vperm.xlu0 %7319, %v9783_v41  }
0x3c0a   :  { %1862 = vperm.xlu0 %7319, %v9784_v54  }
0x3c0e   :  { %2697 = vperm.xlu0 %7319, %v9785_v6  }
0x3c12   :  { %2703 = vperm.xlu0 %7319, %v9786_v38  }
0x3c16   :  { %2709 = vperm.xlu0 %7319, %v9787_v34  }
0x3c1a   :  { %2715 = vperm.xlu0 %7319, %v9788_v22  }
0x3c1e   :  { %3540 = vperm.xlu0 %7319, %v9789_v17  }
0x3c22   :  { %3546 = vperm.xlu0 %7319, %v9790_v50  }
0x3c26   :  { %3552 = vperm.xlu0 %7319, %v9791_v47  }
0x3c2a   :  { %4409 = vperm.xlu0 %7319, %v8989_v26  }
0x3c2e   :  { %4415 = vperm.xlu0 %7319, %v8997_v37  }
0x3c32   :  { %3558 = vperm.xlu0 %7319, %v9792_v40  }
0x3c36   :  { %4421 = vperm.xlu0 %7319, %v9004_v33   ;;  %v9794_v33 = vld [vmem:[#allocation62_spill] sm:$0xff] }
0x3c3a   :  { %5261 = vperm.xlu0 %7319, %v9172_v44  }
0x3c3e   :  { %5267 = vperm.xlu0 %7319, %v9179_v27   ;;  %v9795_v27 = vld [vmem:[#allocation25_spill] sm:$0xff] }
0x3c42   :  { %4427 = vperm.xlu0 %7319, %v9793_v57  }
0x3c46   :  { %5273 = vperm.xlu0 %7319, %v9186_v35   ;;  %v9796_v35 = vld [vmem:[#allocation27_spill] sm:$0xff] }
0x3c4a   :  { %6130 = vperm.xlu0 %7319, %v9352_v63   ;;  %v9797_v63 = vld [vmem:[#allocation29_spill] sm:$0xff] }
0x3c4e   :  { %6136 = vperm.xlu0 %7319, %v9359_v28   ;;  %v9798_v28 = vld [vmem:[#allocation31_spill] sm:$0xff] }
0x3c52   :  { %5279 = vperm.xlu0 %7319, %v9193_v18   ;;  %v9799_v18 = vld [vmem:[#allocation33_spill] sm:$0xff] }
0x3c56   :  { %6142 = vperm.xlu0 %7319, %v9366_v3   ;;  %v9800_v3 = vld [vmem:[#allocation35_spill] sm:$0xff] }
0x3c5a   :  { %6148 = vperm.xlu0 %7319, %v9373_v25   ;;  %v9801_v25 = vld [vmem:[#allocation37_spill] sm:$0xff] }
0x3c5c   :  { %v6579_v26 = vpop.permute.xlu0 %6578 }
0x3c5d   :  { %v6581_v37 = vmul.f32 %v7548_v20, %v6579_v26  ;;  %v9814_v20 = vld [vmem:[#allocation57_spill] sm:$0xff] }
0x3c5f   :  { %v6582_v44 = vsel %vm5249_vm14, %v6581_v37, %v9794_v33 }
0x3c60   :  { %6592 = vrot.lane.b32.xlu1 %v6582_v44, %s7804_s11 }
0x3c64   :  { %1000 = vperm.xlu1 %7318, %v9795_v27  }
0x3c68   :  { %1006 = vperm.xlu1 %7318, %v9796_v35   ;;  %v1872_v35 = vadd.s32 4294967256, %v9815_v39 }
0x3c6c   :  { %1012 = vperm.xlu1 %7318, %v9797_v63   ;;  %v1867_v63 = vadd.s32 4294967264, %v9815_v39 }
0x3c6d   :  { %v998_v49 = vpop.permute.xlu0 %997 }
0x3c70   :  { %1018 = vperm.xlu1 %7318, %v9798_v28  }
0x3c71   :  { %v1004_v43 = vpop.permute.xlu0 %1003 }
0x3c74   :  { %1847 = vperm.xlu1 %7318, %v9799_v18   ;;  %v1875_v18 = vsub.s32 %v1872_v35, %v8125_v51 }
0x3c75   :  { %v1010_v12 = vpop.permute.xlu0 %1009 }
0x3c78   :  { %1853 = vperm.xlu1 %7318, %v9800_v3  }
0x3c79   :  { %v1016_v46 = vpop.permute.xlu0 %1015 }
0x3c7c   :  { %1859 = vperm.xlu1 %7318, %v9801_v25   ;;  %v1870_v25 = vsub.s32 %v1867_v63, %v8125_v51 }
0x3c7d   :  { %v9493_v23 = vpop.permute.xlu0 %1844 }
0x3c80   :  { %1865 = vperm.xlu1 %7318, %v9802_v10  }
0x3c81   :  { %v1851_v61 = vpop.permute.xlu0 %1850 }
0x3c84   :  { %2700 = vperm.xlu1 %7318, %v9803_v7  }
0x3c88   :  { %2706 = vperm.xlu1 %7318, %v9804_v42   ;;  %v1882_v42 = vrot.slane %v1851_v61, %v1870_v25 }
0x3c8c   :  { %2712 = vperm.xlu1 %7318, %v9805_v24  }
0x3c90   :  { %2718 = vperm.xlu1 %7318, %v9806_v16  }
0x3c94   :  { %3543 = vperm.xlu1 %7318, %v9807_v36  }
0x3c98   :  { %3549 = vperm.xlu1 %7318, %v9808_v60   ;;  %v1871_v60 = vrot.slane %v9493_v23, %v1870_v25 }
0x3c9c   :  { %3555 = vperm.xlu1 %7318, %v9809_v13  }
0x3ca0   :  { %4412 = vperm.xlu1 %7318, %v9810_v0  }
0x3ca4   :  { %4418 = vperm.xlu1 %7318, %v9811_v19  }
0x3ca8   :  { %3561 = vperm.xlu1 %7318, %v9812_v14  }
0x3cac   :  { %4424 = vperm.xlu1 %7318, %v9813_v32  }
0x3cb0   :  { %5264 = vperm.xlu1 %7318, %v9174_v53   ;;  %v1857_v53 = vpop.permute.xlu0 %1856 }
0x3cb1   :  { %v1891_v36 = vrot.slane %v1857_v53, %v1870_v25  ;;  %v2725_v53 = vadd.s32 4294967240, %v9815_v39 }
0x3cb4   :  { %5270 = vperm.xlu1 %7318, %v9181_v58   ;;  %v1863_v29 = vpop.permute.xlu0 %1862 }
0x3cb8   :  { %4430 = vperm.xlu1 %7318, %v9814_v20  }
0x3cbc   :  { %5276 = vperm.xlu1 %7318, %v9188_v52   ;;  %v9500_v52 = vpop.permute.xlu0 %2697 }
0x3cc0   :  { %6133 = vperm.xlu1 %7318, %v9354_v59   ;;  %v9502_v8 = vpop.permute.xlu0 %2703 }
0x3cc4   :  { %6139 = vperm.xlu1 %7318, %v9361_v48   ;;  %v1020_v48 = vadd.s32 4294967280, %v9815_v39 }
0x3cc8   :  { %5282 = vperm.xlu1 %7318, %v9195_v11   ;;  %v9506_v11 = vpop.permute.xlu0 %2709 }
0x3ccc   :  { %6145 = vperm.xlu1 %7318, %v9368_v45   ;;  %v1028_v45 = vsub.s32 %v1025_v55, %v8125_v51  ;;  %v9510_v6 = vpop.permute.xlu0 %2715 }
0x3cd0   :  { %6151 = vperm.xlu1 %7318, %v9375_v4   ;;  %v1023_v4 = vsub.s32 %v1020_v48, %v8125_v51  ;;  %v9514_v33 = vpop.permute.xlu0 %3540 }
0x3cd2   :  { %v6593_v58 = vpop.permute.xlu1 %6592  ;;  %v1035_v15 = vrot.slane %v1004_v43, %v1023_v4  ;;  %v1044_v54 = vrot.slane %v1010_v12, %v1023_v4  ;;  %v1024_v38 = vrot.slane %v998_v49, %v1023_v4  ;;  %v1053_v50 = vrot.slane %v1016_v46, %v1023_v4 }
0x3cd3   :  { %6795 = vmatmul.mubr.msk.f32.vlgmr.msra.gmra.mrb[80].mxu1 %vm258_vm1, %v6593_v58  ;;  %vm1877_vm1 = vcmask 392512   ;;  %v1900_v49 = vrot.slane %v1863_v29, %v1870_v25  ;;  %v2728_v29 = vsub.s32 %v2725_v53, %v8125_v51 }
0x3cd4   :  { %v9520_v3 = vpop.permute.xlu0 %3546 }
0x3cd8   :  { %v3553_v0 = vpop.permute.xlu0 %3552 }
0x3cdc   :  { %v9528_v23 = vpop.permute.xlu0 %4409 }
0x3ce3   :  { %v1001_v59 = vpop.permute.xlu1 %1000 }
0x3ce4   :  { %v1029_v2 = vrot.slane %v1001_v59, %v1028_v45  ;;  %v2720_v59 = vadd.s32 4294967248, %v9815_v39 }
0x3ce6   :  { %v1031_v47 = vsel %vm1030_vm15, %v1029_v2, %v1024_v38  ;;  %v2723_v48 = vsub.s32 %v2720_v59, %v8125_v51 }
0x3ce7   :  { %v1007_v31 = vpop.permute.xlu1 %1006 }
0x3ce8   :  { %v1039_v30 = vrot.slane %v1007_v31, %v1028_v45  ;;  %v2744_v2 = vrot.slane %v9506_v11, %v2723_v48 }
0x3cea   :  { %v1040_v34 = vsel %vm1030_vm15, %v1039_v30, %v1035_v15  ;;  %v2735_v30 = vrot.slane %v9502_v8, %v2723_v48 }
0x3ceb   :  { %v1013_v5 = vpop.permute.xlu1 %1012  ;;  %v1059_v57 = vsel %vm316_vm3, %v1040_v34, %v1031_v47  ;;  %v2753_v34 = vrot.slane %v9510_v6, %v2723_v48 }
0x3cec   :  { %v1048_v41 = vrot.slane %v1013_v5, %v1028_v45 }
0x3cee   :  { %v1049_v22 = vsel %vm1030_vm15, %v1048_v41, %v1044_v54  ;;  %v2724_v41 = vrot.slane %v9500_v52, %v2723_v48 }
0x3cef   :  { %v1019_v17 = vpop.permute.xlu1 %1018  ;;  %v1060_v26 = vsel %vm318_vm4, %v1049_v22, %v1059_v57 }
0x3cf0   :  { %v1057_v40 = vrot.slane %v1019_v17, %v1028_v45  ;;  %v4416_v45 = vpop.permute.xlu0 %4415 }
0x3cf2   :  { %v1058_v37 = vsel %vm1030_vm15, %v1057_v40, %v1053_v50 }
0x3cf3   :  { %v1061_v44 = vsel %vm320_vm5, %v1058_v37, %v1060_v26  ;;  %v1848_v27 = vpop.permute.xlu1 %1847 }
0x3cf4   :  { %1064 = vst.msk [vmem:[#allocation15] sm:$0xf] %vm1063_vm0, %v1061_v44  ;;  %v1876_v24 = vrot.slane %v1848_v27, %v1875_v18  ;;  %v3559_v50 = vpop.permute.xlu0 %3558 }
0x3cf6   :  { %v1878_v32 = vsel %vm1877_vm1, %v1876_v24, %v1871_v60 }
0x3cf7   :  { %v1854_v28 = vpop.permute.xlu1 %1853 }
0x3cf8   :  { %v1886_v10 = vrot.slane %v1854_v28, %v1875_v18  ;;  %v4422_v26 = vpop.permute.xlu0 %4421 }
0x3cf9   :  { %v4453_v59 = vrot.slane %v4422_v26, %v8215_v1 }
0x3cfa   :  { %v1887_v13 = vsel %vm1877_vm1, %v1886_v10, %v1882_v42  ;;  %v3584_v10 = vrot.slane %v3553_v0, %v8215_v1 }
0x3cfb   :  { %v1860_v7 = vpop.permute.xlu1 %1859  ;;  %v1906_v12 = vsel %vm316_vm3, %v1887_v13, %v1878_v32 }
0x3cfc   :  { %v1895_v16 = vrot.slane %v1860_v7, %v1875_v18  ;;  %v9540_v44 = vpop.permute.xlu0 %5261  ;;  %v3566_v7 = vrot.slane %v9514_v33, %v8215_v1 }
0x3cfe   :  { %v1896_v19 = vsel %vm1877_vm1, %v1895_v16, %v1891_v36  ;;  %v3593_v36 = vrot.slane %v3559_v50, %v8215_v1 }
0x3cff   :  { %v1866_v14 = vpop.permute.xlu1 %1865  ;;  %v1907_v20 = vsel %vm318_vm4, %v1896_v19, %v1906_v12 }
0x3d00   :  { %v1904_v43 = vrot.slane %v1866_v14, %v1875_v18  ;;  %v5268_v35 = vpop.permute.xlu0 %5267  ;;  %v3575_v18 = vrot.slane %v9520_v3, %v8215_v1 }
0x3d02   :  { %v1905_v46 = vsel %vm1877_vm1, %v1904_v43, %v1900_v49 }
0x3d03   :  { %v1908_v61 = vsel %vm320_vm5, %v1905_v46, %v1907_v20  ;;  %v2701_v58 = vpop.permute.xlu1 %2700 }
0x3d04   :  { %1911 = vst.msk [vmem:[#allocation15] sm:$0xf] %vm1910_vm2, %v1908_v61  ;;  %v2729_v5 = vrot.slane %v2701_v58, %v2728_v29  ;;  %v4428_v19 = vpop.permute.xlu0 %4427  ;;  %v4444_v58 = vrot.slane %v4416_v45, %v8215_v1 }
0x3d06   :  { %v2731_v22 = vsel %vm2730_vm6, %v2729_v5, %v2724_v41 }
0x3d07   :  { %v2707_v55 = vpop.permute.xlu1 %2706 }
0x3d08   :  { %v2739_v31 = vrot.slane %v2707_v55, %v2728_v29  ;;  %v5274_v43 = vpop.permute.xlu0 %5273 }
0x3d09   :  { %v5305_v26 = vrot.slane %v5274_v43, %v8215_v1 }
0x3d0a   :  { %v2740_v54 = vsel %vm2730_vm6, %v2739_v31, %v2735_v30  ;;  %v4462_v30 = vrot.slane %v4428_v19, %v8215_v1 }
0x3d0b   :  { %v2713_v4 = vpop.permute.xlu1 %2712  ;;  %v2759_v47 = vsel %vm316_vm3, %v2740_v54, %v2731_v22  ;;  %v9816_v22 = vld [vmem:[#allocation61_spill] sm:$0xff] }
0x3d0c   :  { %v2748_v15 = vrot.slane %v2713_v4, %v2728_v29  ;;  %v6131_v55 = vpop.permute.xlu0 %6130 }
0x3d0e   :  { %v2749_v38 = vsel %vm2730_vm6, %v2748_v15, %v2744_v2 }
0x3d0f   :  { %v2719_v39 = vpop.permute.xlu1 %2718  ;;  %v2760_v8 = vsel %vm318_vm4, %v2749_v38, %v2759_v47 }
0x3d10   :  { %v2757_v17 = vrot.slane %v2719_v39, %v2728_v29  ;;  %v4435_v29 = vrot.slane %v9528_v23, %v8215_v1  ;;  %v6137_v54 = vpop.permute.xlu0 %6136 }
0x3d12   :  { %v2758_v40 = vsel %vm2730_vm6, %v2757_v17, %v2753_v34  ;;  %v4094_v17 = vsel %vm3528_vm13, %v9816_v22, 0.0 }
0x3d13   :  { %v2761_v57 = vsel %vm320_vm5, %v2758_v40, %v2760_v8  ;;  %v3544_v11 = vpop.permute.xlu1 %3543 }
0x3d14   :  { %2764 = vst.msk [vmem:[#allocation15] sm:$0xf] %vm2763_vm7, %v2761_v57  ;;  %v3570_v25 = vrot.slane %v3544_v11, %v8211_v62  ;;  %v5280_v50 = vpop.permute.xlu0 %5279  ;;  %v5296_v57 = vrot.slane %v5268_v35, %v8215_v1 }
0x3d16   :  { %v3571_v60 = vsel %vm802_vm8, %v3570_v25, %v3566_v7 }
0x3d17   :  { %v3550_v52 = vpop.permute.xlu1 %3549 }
0x3d18   :  { %v3579_v6 = vrot.slane %v3550_v52, %v8211_v62  ;;  %v5287_v52 = vrot.slane %v9540_v44, %v8215_v1 }
0x3d1a   :  { %v3580_v42 = vsel %vm802_vm8, %v3579_v6, %v3575_v18 }
0x3d1b   :  { %v3556_v37 = vpop.permute.xlu1 %3555  ;;  %v3599_v3 = vsel %vm316_vm3, %v3580_v42, %v3571_v60 }
0x3d1c   :  { %v3588_v63 = vrot.slane %v3556_v37, %v8211_v62 }
0x3d1e   :  { %v3589_v24 = vsel %vm802_vm8, %v3588_v63, %v3584_v10 }
0x3d1f   :  { %v4413_v27 = vpop.permute.xlu1 %4412  ;;  %v3600_v0 = vsel %vm318_vm4, %v3589_v24, %v3599_v3 }
0x3d20   :  { %v4439_v53 = vrot.slane %v4413_v27, %v8211_v62  ;;  %v6143_v27 = vpop.permute.xlu0 %6142 }
0x3d21   :  { %v6174_v19 = vrot.slane %v6143_v27, %v8215_v1 }
0x3d22   :  { %v4440_v5 = vsel %vm802_vm8, %v4439_v53, %v4435_v29 }
0x3d23   :  { %v4419_v28 = vpop.permute.xlu1 %4418 }
0x3d24   :  { %v4448_v20 = vrot.slane %v4419_v28, %v8211_v62  ;;  %v5314_v28 = vrot.slane %v5280_v50, %v8215_v1  ;;  %v6149_v3 = vpop.permute.xlu0 %6148 }
0x3d26   :  { %v4449_v48 = vsel %vm802_vm8, %v4448_v20, %v4444_v58  ;;  %v5815_v20 = vsel %vm5249_vm14, %v9417_v21, 0.0 }
0x3d27   :  { %v3562_v16 = vpop.permute.xlu1 %3561  ;;  %v4468_v45 = vsel %vm316_vm3, %v4449_v48, %v4440_v5  ;;  %v4947_v48 = vsel %vm3528_vm13, %v9237_v56, 0.0 }
0x3d28   :  { %v3597_v13 = vrot.slane %v3562_v16, %v8211_v62  ;;  %v6165_v16 = vrot.slane %v6137_v54, %v8215_v1 }
0x3d2a   :  { %v3598_v14 = vsel %vm802_vm8, %v3597_v13, %v3593_v36 }
0x3d2b   :  { %v4425_v49 = vpop.permute.xlu1 %4424  ;;  %v3601_v33 = vsel %vm320_vm5, %v3598_v14, %v3600_v0  ;;  %v6156_v14 = vrot.slane %v6131_v55, %v8215_v1 }
0x3d2c   :  { %v3603_v32 = vsel %vm3528_vm13, %v3601_v33, 0.0  ;;  %v4457_v46 = vrot.slane %v4425_v49, %v8211_v62 }
0x3d2d   :  { %3605 = vrot.lane.b32.xlu0 %v3603_v32, %s7792_s16  ;;  %v6183_v32 = vrot.slane %v6149_v3, %v8215_v1 }
0x3d2e   :  { %v4458_v31 = vsel %vm802_vm8, %v4457_v46, %v4453_v59 }
0x3d2f   :  { %v5265_v12 = vpop.permute.xlu1 %5264  ;;  %v4469_v41 = vsel %vm318_vm4, %v4458_v31, %v4468_v45 }
0x3d30   :  { %v5291_v11 = vrot.slane %v5265_v12, %v8211_v62 }
0x3d32   :  { %v5292_v18 = vsel %vm802_vm8, %v5291_v11, %v5287_v52 }
0x3d33   :  { %v5271_v61 = vpop.permute.xlu1 %5270 }
0x3d34   :  { %v5300_v47 = vrot.slane %v5271_v61, %v8211_v62 }
0x3d36   :  { %v5301_v37 = vsel %vm802_vm8, %v5300_v47, %v5296_v57 }
0x3d37   :  { %v4431_v4 = vpop.permute.xlu1 %4430  ;;  %v5320_v35 = vsel %vm316_vm3, %v5301_v37, %v5292_v18 }
0x3d38   :  { %v4466_v15 = vrot.slane %v4431_v4, %v8211_v62 }
0x3d3a   :  { %v4467_v2 = vsel %vm802_vm8, %v4466_v15, %v4462_v30 }
0x3d3b   :  { %v5277_v38 = vpop.permute.xlu1 %5276  ;;  %v4470_v23 = vsel %vm320_vm5, %v4467_v2, %v4469_v41 }
0x3d3c   :  { %v4472_v39 = vsel %vm3528_vm13, %v4470_v23, 0.0  ;;  %v5309_v8 = vrot.slane %v5277_v38, %v8211_v62 }
0x3d3d   :  { %4474 = vrot.lane.b32.xlu1 %v4472_v39, %s7806_s19 }
0x3d3e   :  { %v5310_v6 = vsel %vm802_vm8, %v5309_v8, %v5305_v26 }
0x3d3f   :  { %v6134_v34 = vpop.permute.xlu1 %6133  ;;  %v5321_v44 = vsel %vm318_vm4, %v5310_v6, %v5320_v35 }
0x3d40   :  { %v6160_v36 = vrot.slane %v6134_v34, %v8211_v62 }
0x3d41   :  { %4096 = vrot.lane.b32.xlu1 %v4094_v17, %s7792_s16 }
0x3d42   :  { %v6161_v43 = vsel %vm802_vm8, %v6160_v36, %v6156_v14 }
0x3d43   :  { %v6140_v40 = vpop.permute.xlu1 %6139 }
0x3d44   :  { %v6169_v10 = vrot.slane %v6140_v40, %v8211_v62 }
0x3d46   :  { %v6170_v0 = vsel %vm802_vm8, %v6169_v10, %v6165_v16 }
0x3d47   :  { %v5283_v63 = vpop.permute.xlu1 %5282  ;;  %v6189_v46 = vsel %vm316_vm3, %v6170_v0, %v6161_v43  ;;  %vm5329_vm3 = vcmask 913152  }
0x3d48   :  { %v5318_v25 = vrot.slane %v5283_v63, %v8211_v62 }
0x3d4a   :  { %v5319_v7 = vsel %vm802_vm8, %v5318_v25, %v5314_v28 }
0x3d4b   :  { %v6146_v42 = vpop.permute.xlu1 %6145  ;;  %v5322_v24 = vsel %vm320_vm5, %v5319_v7, %v5321_v44 }
0x3d4c   :  { %v6178_v60 = vrot.slane %v6146_v42, %v8211_v62  ;;  %v5324_v13 = vsel %vm5249_vm14, %v5322_v24, 0.0 }
0x3d4d   :  { %5326 = vrot.lane.b32.xlu0 %v5324_v13, %s7805_s17 }
0x3d4e   :  { %v6179_v49 = vsel %vm802_vm8, %v6178_v60, %v6174_v19 }
0x3d4f   :  { %v6152_v33 = vpop.permute.xlu1 %6151  ;;  %v6190_v58 = vsel %vm318_vm4, %v6179_v49, %v6189_v46  ;;  %vm6198_vm4 = vcmask 1044352  }
0x3d50   :  { %v6187_v12 = vrot.slane %v6152_v33, %v8211_v62 }
0x3d51   :  { %5817 = vrot.lane.b32.xlu0 %v5815_v20, %s7792_s16  ;;  %s7808_s16 = smov [#allocation14]  }
0x3d52   :  { %v6188_v61 = vsel %vm802_vm8, %v6187_v12, %v6183_v32  ;;  %s6674_s30 = sshll.u32 %s7808_s16, 4  ;;  %s6675_s30 = int_to_ptr.vmem [resolvable:$true] %s6674_s30 }
0x3d53   :  { %v6191_v53 = vsel %vm320_vm5, %v6188_v61, %v6190_v58  ;;  %s7708_s3 = scalar_lea.vmem %s6675_s30, 256  ;;  %p7713_p1 = scmp.lt.s32.totalorder %s6675_s30, %s6675_s30 }
0x3d54   :  { %v6193_v1 = vsel %vm5249_vm14, %v6191_v53, 0.0  ;;  %p7709_p0 = scmp.ne.s32.totalorder %s6675_s30, %s7708_s3  ;;  %p7714_p2 = scmp.lt.s32.totalorder %s7708_s3, %s7708_s3 }
0x3d55   :  { %6195 = vrot.lane.b32.xlu1 %v6193_v1, %s7807_s2 }
0x3d56   :  { %p7715_p3 = por %p7714_p2, %p7713_p1 }
0x3d58   :  { %p7716_p4 = pnand %p7715_p3, %p7709_p0 }
0x3d9f   :  { %v3606_v62 = vpop.permute.xlu0 %3605 }
0x3da0   :  { %3609 = vst.msk [vmem:[#allocation15] sm:$0xf] %vm3608_vm9, %v3606_v62 }
0x3da6   :  { %v6662_v59 = vpop.f32.mrb[80].mxu1 }
0x3da7   :  { %v6663_v21 = vpop.f32.mrb[81].mxu1 }
0x3da8   :  { %v6664_v4 = vadd.f32 %v6663_v21, %v8337_v9 }
0x3daa   :  { %v6666_v5 = vsel %vm5249_vm14, %v6664_v4, 0.0 }
0x3daf   :  { %v4475_v55 = vpop.permute.xlu1 %4474 }
0x3db0   :  { %4478 = vst.msk [vmem:[#allocation15] sm:$0xf] %vm4477_vm10, %v4475_v55 }
0x3db3   :  { %v4097_v29 = vpop.permute.xlu1 %4096 }
0x3db4   :  { %4099 = vst.msk [vmem:[#allocation14 + $0x8] sm:$0xf] %vm587_vm11, %v4097_v29 }
0x3db5   :  { %4948 = vst.msk [vmem:[#allocation14 + $0x8] sm:$0xf] %vm1533_vm12, %v4947_v48 }
0x3dbf   :  { %v5327_v31 = vpop.permute.xlu0 %5326 }
0x3dc0   :  { %5330 = vst.msk [vmem:[#allocation15] sm:$0xf] %vm5329_vm3, %v5327_v31 }
0x3dc3   :  { %v5818_v30 = vpop.permute.xlu0 %5817 }
0x3dc4   :  { %5820 = vst.msk [vmem:[#allocation14 + $0xc] sm:$0xf] %vm587_vm11, %v5818_v30 }
0x3dc5   :  { %6667 = vst.msk [vmem:[#allocation14 + $0xc] sm:$0xf] %vm1533_vm12, %v6666_v5 }
0x3dc6   :  { %7719 = shalt.err (!%p7716_p4)
}
0x3dc7   :  { %s7720_s25 = scalar_lea.hbm %s9690_s12, 256 }
0x3dc8   :  { %p7721_p5 = scmp.ne.s32.totalorder %s9690_s12, %s7720_s25  ;;  %p7724_p6 = scmp.lt.u32.totalorder %s7720_s25, %s9690_s12 }
0x3dca   :  { %p7726_p7 = pnand %p7724_p6, %p7721_p5 }
0x3dcc   :  { %7729 = shalt.err (!%p7726_p7)
}
0x3dcd   :  { %6677 = dma.vmem_to_hbm [thread:$0]  %s6675_s30, 256, %s9690_s12, [#allocation4]   ;;  %v6196_v51 = vpop.permute.xlu1 %6195 }
0x3dce   :  { %6199 = vst.msk [vmem:[#allocation15] sm:$0xf] %vm6198_vm4, %v6196_v51  ;;  %s7730_s9 = scalar_lea.vmem %s9634_s20, 64  ;;  %p7735_p9 = scmp.lt.s32.totalorder %s9634_s20, %s9634_s20 }
0x3dcf   :  { %p7731_p8 = scmp.ne.s32.totalorder %s9634_s20, %s7730_s9  ;;  %p7736_p10 = scmp.lt.s32.totalorder %s7730_s9, %s7730_s9 }
0x3dd1   :  { %p7737_p11 = por %p7736_p10, %p7735_p9 }
0x3dd3   :  { %p7738_p12 = pnand %p7737_p11, %p7731_p8 }
0x3dd5   :  { %7741 = shalt.err (!%p7738_p12)
}
0x3dd6   :  { %s7742_s7 = scalar_lea.hbm %s9691_s13, 64 }
0x3dd7   :  { %p7743_p13 = scmp.ne.s32.totalorder %s9691_s13, %s7742_s7  ;;  %p7746_p0 = scmp.lt.u32.totalorder %s7742_s7, %s9691_s13 }
0x3dd9   :  { %p7748_p1 = pnand %p7746_p0, %p7743_p13 }
0x3ddb   :  { %7751 = shalt.err (!%p7748_p1)
}
0x3ddc   :  { %6687 = dma.vmem_to_hbm [thread:$0]  %s9634_s20, 64, %s9691_s13, [#allocation16]  }
0x3ddd   :  { %s7752_s17 = scalar_lea.vmem %s6695_s21, 64  ;;  %p7757_p3 = scmp.lt.s32.totalorder %s6695_s21, %s6695_s21 }
0x3dde   :  { %p7753_p2 = scmp.ne.s32.totalorder %s6695_s21, %s7752_s17  ;;  %p7758_p4 = scmp.lt.s32.totalorder %s7752_s17, %s7752_s17 }
0x3de0   :  { %p7759_p5 = por %p7758_p4, %p7757_p3 }
0x3de2   :  { %p7760_p6 = pnand %p7759_p5, %p7753_p2 }
0x3de4   :  { %7763 = shalt.err (!%p7760_p6)
}
0x3de5   :  { %s7764_s16 = scalar_lea.hbm %s9692_s14, 64 }
0x3de6   :  { %p7765_p7 = scmp.ne.s32.totalorder %s9692_s14, %s7764_s16  ;;  %p7768_p8 = scmp.lt.u32.totalorder %s7764_s16, %s9692_s14 }
0x3de8   :  { %p7770_p9 = pnand %p7768_p8, %p7765_p7 }
0x3dea   :  { %7773 = shalt.err (!%p7770_p9)
}
0x3deb   :  { %6697 = dma.vmem_to_hbm [thread:$0]  %s6695_s21, 64, %s9692_s14, [#allocation16]  }
0x3dec   :  { %7782 = dma.done.wait [#allocation4], 256  }
0x3ded   :  { %7783 = vsyncadd [#allocation4], 4294967040 }
0x3dee   :  { %7784 = dma.done.wait [#allocation16], 128  }
0x3def   :  { %7785 = vsyncadd [#allocation16], 4294967168 }
0x3df0   :  { %6707 = vsyncpa [#allocation3], 1 }
0x3df1   :  { %6708 = vsyncpa [#allocation6], 1 }
0x3df2   :  { %6709 = vsyncpa [#allocation9], 1 }
0x3df3   :  { %6710 = vsyncpa [#allocation12], 1 }
0x3df4   :  { %6711 = vsyncpa [#allocation4], 1 }
0x3df5   :  { %6712 = vsyncpa [#allocation16], 1 }

</bundles_post_ra>
